<compile_context>
chip_gen: v7x
topology: tpu7x:2x2x1
jax: 0.10.0
libtpu: 0.0.40
codegen_flags: <defaults>
</compile_context>

<pallas_src>
import functools

import jax
import jax.numpy as jnp
from jax import lax
from jax.experimental import pallas as pl
from jax.experimental.pallas import tpu as pltpu


# ----------------------------- tiling helpers -----------------------------

def _round_up(x, m):
    return ((x + m - 1) // m) * m


def _choose_tiles(n):
    """Padded node count Np (multiple of 128) and (row tile tm, contraction/col tile tk)."""
    if n <= 1024:
        np_ = _round_up(n, 128)
        tm = np_ // 2 if np_ >= 256 else np_     # >=2 parallel row blocks when possible (v7x)
        return np_, tm, np_
    np_ = _round_up(n, 128)
    for t in (512, 256, 128):                    # largest tile that divides Np (minimal padding)
        if np_ % t == 0:
            return np_, t, t
    return np_, 128, 128                         # unreachable: np_ % 128 == 0


def _feat_tiles(fe):
    """Padded feature width and contraction tile for the support matmul (v5e VMEM-safe)."""
    if fe <= 1024:
        return fe, fe                            # single block (block == full dims)
    fe_p = _round_up(fe, 512)
    return fe_p, 512


# ----------------------------- Pallas kernels -----------------------------

def _support_kernel(x_ref, w_ref, o_ref, acc_ref):
    # o[rows] = x[rows] @ W, with the feature contraction tiled over grid axis 1.
    k = pl.program_id(1)

    @pl.when(k == 0)
    def _():
        acc_ref[...] = jnp.zeros_like(acc_ref)

    acc_ref[...] += jnp.dot(x_ref[...], w_ref[...],
                            preferred_element_type=jnp.float32)

    @pl.when(k == pl.num_programs(1) - 1)
    def _():
        o_ref[...] = acc_ref[...].astype(o_ref.dtype)


def support_matmul(x2d, w, *, tm, tkf, out_dtype=jnp.float32):
    """out = x2d @ w ; x2d: [Np, Fe], w: [Fe, Wout] -> [Np, Wout]."""
    Np, Fe = x2d.shape
    Wout = w.shape[1]
    return pl.pallas_call(
        _support_kernel,
        out_shape=jax.ShapeDtypeStruct((Np, Wout), out_dtype),
        grid=(Np // tm, Fe // tkf),
        in_specs=[
            pl.BlockSpec((tm, tkf), lambda i, k: (i, k)),
            pl.BlockSpec((tkf, Wout), lambda i, k: (k, 0)),
        ],
        out_specs=pl.BlockSpec((tm, Wout), lambda i, k: (i, 0)),
        scratch_shapes=[pltpu.VMEM((tm, Wout), jnp.float32)],
        compiler_params=pltpu.CompilerParams(
            dimension_semantics=("parallel", "arbitrary")),
    )(x2d, w)


def _enc1_kernel(adj_ref, sup_ref, hcat_ref, ss_ref, acc_ref, *, S, H1):
    # Fused gc1|gce adj pass in folded layout.
    #   acc = adj @ [sup_x | sup_e_folded]   -> columns [H1 | S*H1]
    #   hx = relu(acc[:, :H1]); he = relu(acc[:, H1:]); h1 = he + tile(hx, S)
    #   hcat = [hx | h1_folded]; ss = per-copy sum(he^2) for this row tile (SNR).
    k = pl.program_id(1)

    @pl.when(k == 0)
    def _():
        acc_ref[...] = jnp.zeros_like(acc_ref)

    acc_ref[...] += jnp.dot(adj_ref[...], sup_ref[...],
                            preferred_element_type=jnp.float32)

    @pl.when(k == pl.num_programs(1) - 1)
    def _():
        r = jnp.maximum(acc_ref[...], 0.0)
        hx = r[:, :H1]                                   # [tm, H1]
        he = r[:, H1:]                                   # [tm, S*H1]
        h1 = he + jnp.concatenate([hx] * S, axis=-1)
        hcat_ref[...] = jnp.concatenate([hx, h1], axis=-1)

        # per-copy sum of squares of hiddene -> row 0, lanes 0..S-1 of an (8,128) tile
        he2 = he * he
        row = lax.broadcasted_iota(jnp.int32, (8, 128), 0)
        lane = lax.broadcasted_iota(jnp.int32, (8, 128), 1)
        tile = jnp.zeros((8, 128), jnp.float32)
        for s in range(S):
            ssum = jnp.sum(he2[:, s * H1:(s + 1) * H1])
            tile = tile + jnp.where((row == 0) & (lane == s), ssum, 0.0)
        ss_ref[...] = tile


def enc1_adj(adj, sup1, *, S, H1, tm, tk):
    """Returns (hcat, ss): hcat=[hiddenx | hidden1_folded], ss=per-row-tile SS(hiddene)."""
    Np = adj.shape[0]
    W1 = sup1.shape[1]                                   # (1+S)*H1
    n_rt = Np // tm
    kern = functools.partial(_enc1_kernel, S=S, H1=H1)
    return pl.pallas_call(
        kern,
        out_shape=(
            jax.ShapeDtypeStruct((Np, W1), jnp.float32),
            jax.ShapeDtypeStruct((n_rt * 8, 128), jnp.float32),
        ),
        grid=(n_rt, Np // tk),
        in_specs=[
            pl.BlockSpec((tm, tk), lambda i, k: (i, k)),
            pl.BlockSpec((tk, W1), lambda i, k: (k, 0)),
        ],
        out_specs=(
            pl.BlockSpec((tm, W1), lambda i, k: (i, 0)),
            pl.BlockSpec((8, 128), lambda i, k: (i, 0)),
        ),
        scratch_shapes=[pltpu.VMEM((tm, W1), jnp.float32)],
        compiler_params=pltpu.CompilerParams(
            dimension_semantics=("parallel", "arbitrary")),
    )(adj, sup1)


def _enc2_kernel(adj_ref, sup_ref, eps_ref, mulv_ref, z_ref, acc_ref,
                 *, S, K, J, H2, full):
    # Fused gc2|gc3 adj pass (mu and logvar share one adj stream) + reparameterize.
    #   acc columns: [mu_0..mu_{S-1} | lv]  (lv = H2 shared cols if 'semi', S*H2 if 'full')
    #   z_j = eps_j * exp(lv_{K+j}/2) + mu_{K+j}
    k = pl.program_id(1)

    @pl.when(k == 0)
    def _():
        acc_ref[...] = jnp.zeros_like(acc_ref)

    acc_ref[...] += jnp.dot(adj_ref[...], sup_ref[...],
                            preferred_element_type=jnp.float32)

    @pl.when(k == pl.num_programs(1) - 1)
    def _():
        r = acc_ref[...]
        mulv_ref[...] = r
        eps = eps_ref[...]
        zs = []
        for j in range(J):
            c = K + j
            mu_j = r[:, c * H2:(c + 1) * H2]
            lv_off = S * H2 + (c * H2 if full else 0)
            lv_j = r[:, lv_off:lv_off + H2]
            eps_j = eps[:, j * H2:(j + 1) * H2]
            zs.append(eps_j * jnp.exp(lv_j * 0.5) + mu_j)
        z_ref[...] = zs[0] if J == 1 else jnp.concatenate(zs, axis=-1)


def enc2_adj(adj, sup2, eps_f, *, S, K, J, H2, full, tm, tk):
    """Returns (mulv, z_folded): mulv = adj@sup2 (mu|logvar folded), z folded [Np, J*H2]."""
    Np = adj.shape[0]
    Wc = sup2.shape[1]
    kern = functools.partial(_enc2_kernel, S=S, K=K, J=J, H2=H2, full=full)
    return pl.pallas_call(
        kern,
        out_shape=(
            jax.ShapeDtypeStruct((Np, Wc), jnp.float32),
            jax.ShapeDtypeStruct((Np, J * H2), jnp.float32),
        ),
        grid=(Np // tm, Np // tk),
        in_specs=[
            pl.BlockSpec((tm, tk), lambda i, k: (i, k)),
            pl.BlockSpec((tk, Wc), lambda i, k: (k, 0)),
            pl.BlockSpec((tm, J * H2), lambda i, k: (i, 0)),
        ],
        out_specs=(
            pl.BlockSpec((tm, Wc), lambda i, k: (i, 0)),
            pl.BlockSpec((tm, J * H2), lambda i, k: (i, 0)),
        ),
        scratch_shapes=[pltpu.VMEM((tm, Wc), jnp.float32)],
        compiler_params=pltpu.CompilerParams(
            dimension_semantics=("parallel", "arbitrary")),
    )(adj, sup2, eps_f)


def _gram_sigmoid_kernel(zr_ref, zc_ref, out_ref):
    # adj_[s, i_block, j_block] = sigmoid(z_rows @ z_cols^T) -- contract last dims.
    lgt = lax.dot_general(zr_ref[0], zc_ref[0],
                          (((1,), (1,)), ((), ())),
                          preferred_element_type=jnp.float32)
    out_ref[0] = jax.nn.sigmoid(lgt)


def gram_decode(z, *, tm, tn):
    """adj_ = sigmoid(z @ z^T), tiled over (copy, row block, col block)."""
    J, Np, H = z.shape
    return pl.pallas_call(
        _gram_sigmoid_kernel,
        out_shape=jax.ShapeDtypeStruct((J, Np, Np), jnp.float32),
        grid=(J, Np // tm, Np // tn),
        in_specs=[
            pl.BlockSpec((1, tm, H), lambda s, i, j: (s, i, 0)),
            pl.BlockSpec((1, tn, H), lambda s, i, j: (s, j, 0)),
        ],
        out_specs=pl.BlockSpec((1, tm, tn), lambda s, i, j: (s, i, j)),
        compiler_params=pltpu.CompilerParams(
            dimension_semantics=("parallel", "parallel", "parallel")),
    )(z, z)


# ----------------------------- model wrapper -----------------------------

def init_params(key, ndim, input_feat_dim, hidden_dim1, hidden_dim2):
    ks = jax.random.split(key, 5)

    def glorot(k, fan_in, fan_out):
        lim = (6.0 / (fan_in + fan_out)) ** 0.5
        return jax.random.uniform(k, (fan_in, fan_out), jnp.float32, -lim, lim)

    return {
        'W_gce': glorot(ks[0], ndim, hidden_dim1),
        'W_gc1': glorot(ks[1], input_feat_dim, hidden_dim1),
        'W_gc2': glorot(ks[2], hidden_dim1, hidden_dim2),
        'W_gc3': glorot(ks[3], hidden_dim1, hidden_dim2),
        # torch.nn.init.uniform_(rk_lgt, a=-6.0, b=0.0)
        'rk_lgt': jax.random.uniform(ks[4], (1, hidden_dim2), jnp.float32, -6.0, 0.0),
    }


@functools.partial(jax.jit,
                   static_argnames=('ndim', 'copyK', 'copyJ', 'encsto', 'matmul_dtype'))
def sigvae_forward(params, x, adj, key, *, ndim, copyK=1, copyJ=1, encsto='semi',
                   matmul_dtype=jnp.float32):
    """Returns (adj_, mu, logvar, z, z_scaled, eps, rk, snr) like GCNModelSIGVAE.forward."""
    assert x.ndim == 3, 'The input tensor dimension is not 3!'
    S = copyK + copyJ
    K, J = copyK, copyJ
    _, N, in_feat = x.shape
    H1 = params['W_gc1'].shape[1]
    H2 = params['W_gc2'].shape[1]
    full = (encsto == 'full')
    reweight = ((ndim + H1) / (in_feat + H1)) ** 0.5
    dt = matmul_dtype

    Np, tm, tk = _choose_tiles(N)
    pad = Np - N

    k_e, k_eps = jax.random.split(key)
    # ndist = Bernoulli(0.5); e = sample([K+J, N, ndim]).squeeze(-1) * reweight
    e = jax.random.bernoulli(k_e, 0.5, (S, N, ndim)).astype(jnp.float32) * reweight
    eps = jax.random.normal(k_eps, (J, N, H2), dtype=jnp.float32)

    # ---- fold the copy axis into the lane dimension, pad the node axis ----
    e_f = jnp.transpose(e, (1, 0, 2)).reshape(N, S * ndim)       # [N, S*ndim]
    xe = jnp.concatenate([x[0], e_f], axis=-1)                   # [N, F + S*ndim]
    Fe = in_feat + S * ndim
    Fe_p, tkf = _feat_tiles(Fe)
    xe_p = jnp.pad(xe, ((0, pad), (0, Fe_p - Fe)))
    adj_p = jnp.pad(adj, ((0, pad), (0, pad)))
    eps_f = jnp.transpose(eps, (1, 0, 2)).reshape(N, J * H2)
    eps_p = jnp.pad(eps_f, ((0, pad), (0, 0)))

    # ---- block weight for the fused gc1|gce support: [x|e_folded] @ W1_big ----
    H1cat = (1 + S) * H1
    w1_big = jnp.zeros((Fe_p, H1cat), jnp.float32)
    w1_big = w1_big.at[:in_feat, :H1].set(params['W_gc1'])
    for s in range(S):
        w1_big = w1_big.at[in_feat + s * ndim: in_feat + (s + 1) * ndim,
                           H1 + s * H1: H1 + (s + 1) * H1].set(params['W_gce'])

    # ---- block weight for the fused gc2|gc3 support: [hx|h1_folded] @ W2_big ----
    Wc = S * H2 + (S * H2 if full else H2)
    w2_big = jnp.zeros((H1cat, Wc), jnp.float32)
    for s in range(S):
        w2_big = w2_big.at[H1 + s * H1: H1 + (s + 1) * H1,
                           s * H2:(s + 1) * H2].set(params['W_gc2'])
        if full:
            w2_big = w2_big.at[H1 + s * H1: H1 + (s + 1) * H1,
                               S * H2 + s * H2: S * H2 + (s + 1) * H2].set(params['W_gc3'])
    if not full:
        w2_big = w2_big.at[:H1, S * H2: S * H2 + H2].set(params['W_gc3'])

    adj_c = adj_p.astype(dt)

    # ---- encoder layer 1 (single adj stream): hcat = [hiddenx | hidden1_folded] ----
    sup1 = support_matmul(xe_p.astype(dt), w1_big.astype(dt),
                          tm=tm, tkf=tkf, out_dtype=dt)
    hcat, ss = enc1_adj(adj_c, sup1, S=S, H1=H1, tm=tm, tk=tk)

    # ---- SNR (padded rows are exact zeros -> contribute nothing) ----
    p_signal = jnp.mean(hcat[:N, :H1] ** 2)
    ss_sums = ss.reshape(Np // tm, 8, 128)[:, 0, :S].sum(axis=0)  # [S]
    p_noise = ss_sums / (N * H1)
    snr = p_signal / p_noise

    # ---- encoder layer 2 (single adj stream) + fused reparameterize ----
    sup2 = support_matmul(hcat.astype(dt), w2_big.astype(dt),
                          tm=tm, tkf=H1cat, out_dtype=dt)
    mulv, z_f = enc2_adj(adj_c, sup2, eps_p, S=S, K=K, J=J, H2=H2, full=full,
                         tm=tm, tk=tk)

    # ---- unfold per-copy outputs ----
    mu = jnp.transpose(mulv[:N, :S * H2].reshape(N, S, H2), (1, 0, 2))
    if full:
        logvar = jnp.transpose(mulv[:N, S * H2:].reshape(N, S, H2), (1, 0, 2))
    else:
        logvar = jnp.broadcast_to(mulv[:N, S * H2: S * H2 + H2][None], (S, N, H2))
    z = jnp.transpose(z_f[:N].reshape(N, J, H2), (1, 0, 2))

    # ---- inner-product decoder (padded z rows are exact zeros; sliced off) ----
    z_p = jnp.transpose(z_f.reshape(Np, J, H2), (1, 0, 2))        # [J, Np, H2]
    adj_full = gram_decode(z_p, tm=tm, tn=tk)
    adj_ = adj_full[:, :N, :N]

    # gdc='ip', dropout=0 -> z_scaled == z ; returned rk == sigmoid(rk_lgt) (= rk.pow(2))
    z_scaled = z
    rk = jax.nn.sigmoid(params['rk_lgt'])
    return adj_, mu, logvar, z, z_scaled, eps, rk, snr


# ----------------------------- demo / smoke test -----------------------------

if __name__ == "__main__":
    # small shapes: N=200 nodes (pads to Np=256 -> 2 row tiles), feat=8, ndim=4,
    # hidden1=32, hidden2=16, K=J=1
    NDIM, IN_FEAT, H1, H2 = 4, 8, 32, 16
    N_NODES, K, J = 200, 1, 1

    root = jax.random.PRNGKey(0)
    k_param, k_x, k_adj, k_fwd = jax.random.split(root, 4)

    params = init_params(k_param, NDIM, IN_FEAT, H1, H2)

    x = jax.random.normal(k_x, (1, N_NODES, IN_FEAT), dtype=jnp.float32)
    # symmetric, row-normalized-ish adjacency (dense)
    a = jax.random.uniform(k_adj, (N_NODES, N_NODES), dtype=jnp.float32)
    a = (a + a.T) * 0.5 + jnp.eye(N_NODES, dtype=jnp.float32)
    adj = a / jnp.sum(a, axis=1, keepdims=True)

    outs = sigvae_forward(params, x, adj, k_fwd,
                          ndim=NDIM, copyK=K, copyJ=J, encsto='semi')
    outs = jax.block_until_ready(outs)
    adj_, mu, logvar, z, z_scaled, eps, rk, snr = outs

    # shape / sanity checks
    assert adj_.shape == (J, N_NODES, N_NODES)
    assert mu.shape == (K + J, N_NODES, H2)
    assert logvar.shape == (K + J, N_NODES, H2)
    assert z.shape == (J, N_NODES, H2)
    assert rk.shape == (1, H2)
    assert snr.shape == (K + J,)
    assert all(bool(jnp.all(jnp.isfinite(o))) for o in outs)

    # pure-JAX reference with the same random draws (same key-splitting order)
    k_e, k_eps = jax.random.split(k_fwd)
    S = K + J
    reweight = ((NDIM + H1) / (IN_FEAT + H1)) ** 0.5
    e_ref = jax.random.bernoulli(k_e, 0.5, (S, N_NODES, NDIM)).astype(jnp.float32) * reweight
    eps_ref = jax.random.normal(k_eps, (J, N_NODES, H2), dtype=jnp.float32)

    hp = lax.Precision.HIGHEST
    hx = jax.nn.relu(jnp.einsum('nm,bmf,fh->bnh', adj, x, params['W_gc1'], precision=hp))
    he = jax.nn.relu(jnp.einsum('nm,smf,fh->snh', adj, e_ref, params['W_gce'], precision=hp))
    h1 = hx + he
    snr_ref = jnp.mean(hx ** 2) / jnp.mean(he ** 2, axis=(-2, -1))
    mu_ref = jnp.einsum('nm,smh,hk->snk', adj, h1, params['W_gc2'], precision=hp)
    lv_semi_ref = jnp.einsum('nm,smh,hk->snk', adj, jnp.broadcast_to(hx, h1.shape),
                             params['W_gc3'], precision=hp)
    z_ref = eps_ref * jnp.exp(lv_semi_ref[K:] / 2.0) + mu_ref[K:]
    adj_ref = jax.nn.sigmoid(jnp.einsum('snk,smk->snm', z_ref, z_ref, precision=hp))

    tol = dict(atol=2e-3, rtol=2e-3)
    assert jnp.allclose(eps, eps_ref)
    assert jnp.allclose(mu, mu_ref, **tol)
    assert jnp.allclose(logvar, lv_semi_ref, **tol)
    assert jnp.allclose(z, z_ref, **tol)
    assert jnp.allclose(adj_, adj_ref, **tol)
    assert jnp.allclose(snr, snr_ref, **tol)

    # 'full' mode exercises the per-copy logvar layout of the fused gc2|gc3 pass
    outs_full = sigvae_forward(params, x, adj, k_fwd,
                               ndim=NDIM, copyK=K, copyJ=J, encsto='full')
    outs_full = jax.block_until_ready(outs_full)
    adj_f, mu_f, logvar_f, z_full, _, _, _, snr_full = outs_full
    lv_full_ref = jnp.einsum('nm,smh,hk->snk', adj, h1, params['W_gc3'], precision=hp)
    z_full_ref = eps_ref * jnp.exp(lv_full_ref[K:] / 2.0) + mu_ref[K:]
    adj_full_ref = jax.nn.sigmoid(jnp.einsum('snk,smk->snm', z_full_ref, z_full_ref,
                                              precision=hp))
    assert jnp.allclose(mu_f, mu_ref, **tol)
    assert jnp.allclose(logvar_f, lv_full_ref, **tol)
    assert jnp.allclose(z_full, z_full_ref, **tol)
    assert jnp.allclose(adj_f, adj_full_ref, **tol)
    assert jnp.allclose(snr_full, snr_ref, **tol)

    print("KERNEL_OK")
</pallas_src>

<mosaic_0001>
module attributes {stable_mosaic.version = 11 : i64} {
  func.func @_support_kernel(%arg0: i32, %arg1: i32, %arg2: memref<128x16xf32, #tpu.memory_space<vmem>>, %arg3: memref<16x96xf32, #tpu.memory_space<vmem>>, %arg4: memref<128x96xf32, #tpu.memory_space<vmem>>, %arg5: memref<128x96xf32, #tpu.memory_space<vmem>>) attributes {dimension_semantics = [#tpu.dimension_semantics<parallel>, #tpu.dimension_semantics<arbitrary>], iteration_bounds = array<i64: 2, 1>, scalar_prefetch = 0 : i64, scratch_operands = 1 : i64, tpu.core_type = #tpu.core_type<tc>, window_params = [{transform_indices = @transform_0, window_bounds = array<i64: 128, 16>}, {transform_indices = @transform_1, window_bounds = array<i64: 16, 96>}, {transform_indices = @transform_2, window_bounds = array<i64: 128, 96>}]} {
    %c0_i32 = arith.constant 0 : i32
    %0 = arith.cmpi eq, %arg1, %c0_i32 : i32
    %1 = arith.extui %0 : i1 to i32
    %c0_i32_0 = arith.constant 0 : i32
    %2 = arith.cmpi ne, %1, %c0_i32_0 : i32
    scf.if %2 {
      %cst_10 = arith.constant 0.000000e+00 : f32
      %12 = vector.broadcast %cst_10 : f32 to vector<128x96xf32>
      %c0_11 = arith.constant 0 : index
      %c0_12 = arith.constant 0 : index
      %13 = vector.load %arg5[%c0_11, %c0_12] : memref<128x96xf32, #tpu.memory_space<vmem>>, vector<128x96xf32>
      tpu.vector_store %arg5[%c0_11, %c0_12], %12 {strides = array<i32>} : memref<128x96xf32, #tpu.memory_space<vmem>>, vector<128x96xf32>,
    } else {
    }
    %c0 = arith.constant 0 : index
    %c0_1 = arith.constant 0 : index
    %3 = vector.load %arg5[%c0, %c0_1] : memref<128x96xf32, #tpu.memory_space<vmem>>, vector<128x96xf32>
    %c0_2 = arith.constant 0 : index
    %c0_3 = arith.constant 0 : index
    %4 = vector.load %arg2[%c0_2, %c0_3] : memref<128x16xf32, #tpu.memory_space<vmem>>, vector<128x16xf32>
    %c0_4 = arith.constant 0 : index
    %c0_5 = arith.constant 0 : index
    %5 = vector.load %arg3[%c0_4, %c0_5] : memref<16x96xf32, #tpu.memory_space<vmem>>, vector<16x96xf32>
    %cst = arith.constant dense<0.000000e+00> : vector<128x96xf32>
    %6 = tpu.matmul %4, %5, %cst {dimension_numbers = #tpu.dot_dimension_numbers<[1], [0], [0], [1], [0, 0, 1, 1], [], []>} : vector<128x16xf32>, vector<16x96xf32>, vector<128x96xf32> -> vector<128x96xf32>
    %7 = arith.addf %3, %6 : vector<128x96xf32>
    %c0_6 = arith.constant 0 : index
    %c0_7 = arith.constant 0 : index
    %8 = vector.load %arg5[%c0_6, %c0_7] : memref<128x96xf32, #tpu.memory_space<vmem>>, vector<128x96xf32>
    tpu.vector_store %arg5[%c0_6, %c0_7], %7 {strides = array<i32>} : memref<128x96xf32, #tpu.memory_space<vmem>>, vector<128x96xf32>,
    %c0_i32_8 = arith.constant 0 : i32
    %9 = arith.cmpi eq, %arg1, %c0_i32_8 : i32
    %10 = arith.extui %9 : i1 to i32
    %c0_i32_9 = arith.constant 0 : i32
    %11 = arith.cmpi ne, %10, %c0_i32_9 : i32
    scf.if %11 {
      %c0_10 = arith.constant 0 : index
      %c0_11 = arith.constant 0 : index
      %12 = vector.load %arg5[%c0_10, %c0_11] : memref<128x96xf32, #tpu.memory_space<vmem>>, vector<128x96xf32>
      %c0_12 = arith.constant 0 : index
      %c0_13 = arith.constant 0 : index
      %13 = vector.load %arg4[%c0_12, %c0_13] : memref<128x96xf32, #tpu.memory_space<vmem>>, vector<128x96xf32>
      tpu.vector_store %arg4[%c0_12, %c0_13], %12 {strides = array<i32>} : memref<128x96xf32, #tpu.memory_space<vmem>>, vector<128x96xf32>,
    } else {
    }
    return
  }
  func.func @transform_0(%arg0: i32, %arg1: i32) -> (i32, i32) {
    %c0_i32 = arith.constant 0 : i32
    return %arg0, %arg1 : i32, i32
  }
  func.func @transform_1(%arg0: i32, %arg1: i32) -> (i32, i32) {
    %c0_i32 = arith.constant 0 : i32
    %c0_i32_0 = arith.constant 0 : i32
    return %arg1, %c0_i32 : i32, i32
  }
  func.func @transform_2(%arg0: i32, %arg1: i32) -> (i32, i32) {
    %c0_i32 = arith.constant 0 : i32
    %c0_i32_0 = arith.constant 0 : i32
    return %arg0, %c0_i32 : i32, i32
  }
}

module attributes {stable_mosaic.version = 11 : i64} {
  func.func @_enc1_kernel(%arg0: i32, %arg1: i32, %arg2: memref<128x256xf32, #tpu.memory_space<vmem>>, %arg3: memref<256x96xf32, #tpu.memory_space<vmem>>, %arg4: memref<128x96xf32, #tpu.memory_space<vmem>>, %arg5: memref<8x128xf32, #tpu.memory_space<vmem>>, %arg6: memref<128x96xf32, #tpu.memory_space<vmem>>) attributes {dimension_semantics = [#tpu.dimension_semantics<parallel>, #tpu.dimension_semantics<arbitrary>], iteration_bounds = array<i64: 2, 1>, scalar_prefetch = 0 : i64, scratch_operands = 1 : i64, tpu.core_type = #tpu.core_type<tc>, window_params = [{transform_indices = @transform_0, window_bounds = array<i64: 128, 256>}, {transform_indices = @transform_1, window_bounds = array<i64: 256, 96>}, {transform_indices = @transform_2, window_bounds = array<i64: 128, 96>}, {transform_indices = @transform_3, window_bounds = array<i64: 8, 128>}]} {
    %c0_i32 = arith.constant 0 : i32
    %0 = arith.cmpi eq, %arg1, %c0_i32 : i32
    %1 = arith.extui %0 : i1 to i32
    %c0_i32_0 = arith.constant 0 : i32
    %2 = arith.cmpi ne, %1, %c0_i32_0 : i32
    scf.if %2 {
      %cst_10 = arith.constant 0.000000e+00 : f32
      %12 = vector.broadcast %cst_10 : f32 to vector<128x96xf32>
      %c0_11 = arith.constant 0 : index
      %c0_12 = arith.constant 0 : index
      %13 = vector.load %arg6[%c0_11, %c0_12] : memref<128x96xf32, #tpu.memory_space<vmem>>, vector<128x96xf32>
      tpu.vector_store %arg6[%c0_11, %c0_12], %12 {strides = array<i32>} : memref<128x96xf32, #tpu.memory_space<vmem>>, vector<128x96xf32>,
    } else {
    }
    %c0 = arith.constant 0 : index
    %c0_1 = arith.constant 0 : index
    %3 = vector.load %arg6[%c0, %c0_1] : memref<128x96xf32, #tpu.memory_space<vmem>>, vector<128x96xf32>
    %c0_2 = arith.constant 0 : index
    %c0_3 = arith.constant 0 : index
    %4 = vector.load %arg2[%c0_2, %c0_3] : memref<128x256xf32, #tpu.memory_space<vmem>>, vector<128x256xf32>
    %c0_4 = arith.constant 0 : index
    %c0_5 = arith.constant 0 : index
    %5 = vector.load %arg3[%c0_4, %c0_5] : memref<256x96xf32, #tpu.memory_space<vmem>>, vector<256x96xf32>
    %cst = arith.constant dense<0.000000e+00> : vector<128x96xf32>
    %6 = tpu.matmul %4, %5, %cst {dimension_numbers = #tpu.dot_dimension_numbers<[1], [0], [0], [1], [0, 0, 1, 1], [], []>} : vector<128x256xf32>, vector<256x96xf32>, vector<128x96xf32> -> vector<128x96xf32>
    %7 = arith.addf %3, %6 : vector<128x96xf32>
    %c0_6 = arith.constant 0 : index
    %c0_7 = arith.constant 0 : index
    %8 = vector.load %arg6[%c0_6, %c0_7] : memref<128x96xf32, #tpu.memory_space<vmem>>, vector<128x96xf32>
    tpu.vector_store %arg6[%c0_6, %c0_7], %7 {strides = array<i32>} : memref<128x96xf32, #tpu.memory_space<vmem>>, vector<128x96xf32>,
    %c0_i32_8 = arith.constant 0 : i32
    %9 = arith.cmpi eq, %arg1, %c0_i32_8 : i32
    %10 = arith.extui %9 : i1 to i32
    %c0_i32_9 = arith.constant 0 : i32
    %11 = arith.cmpi ne, %10, %c0_i32_9 : i32
    scf.if %11 {
      %c0_10 = arith.constant 0 : index
      %c0_11 = arith.constant 0 : index
      %12 = vector.load %arg6[%c0_10, %c0_11] : memref<128x96xf32, #tpu.memory_space<vmem>>, vector<128x96xf32>
      %cst_12 = arith.constant 0.000000e+00 : f32
      %13 = vector.broadcast %cst_12 : f32 to vector<128x96xf32>
      %14 = arith.maximumf %12, %13 : vector<128x96xf32>
      %15 = vector.extract_strided_slice %14 {offsets = [0, 0], sizes = [128, 32], strides = [1, 1]} : vector<128x96xf32> to vector<128x32xf32>
      %16 = vector.extract_strided_slice %14 {offsets = [0, 32], sizes = [128, 64], strides = [1, 1]} : vector<128x96xf32> to vector<128x64xf32>
      %17 = tpu.concatenate %15, %15 in 1 : vector<128x32xf32>, vector<128x32xf32> -> vector<128x64xf32>
      %18 = arith.addf %16, %17 : vector<128x64xf32>
      %19 = tpu.concatenate %15, %18 in 1 : vector<128x32xf32>, vector<128x64xf32> -> vector<128x96xf32>
      %c0_13 = arith.constant 0 : index
      %c0_14 = arith.constant 0 : index
      %20 = vector.load %arg4[%c0_13, %c0_14] : memref<128x96xf32, #tpu.memory_space<vmem>>, vector<128x96xf32>
      tpu.vector_store %arg4[%c0_13, %c0_14], %19 {strides = array<i32>} : memref<128x96xf32, #tpu.memory_space<vmem>>, vector<128x96xf32>,
      %21 = arith.mulf %16, %16 : vector<128x64xf32>
      %22 = tpu.iota {dimensions = array<i32: 0>} : vector<8x128xi32>
      %23 = tpu.iota {dimensions = array<i32: 1>} : vector<8x128xi32>
      %cst_15 = arith.constant 0.000000e+00 : f32
      %24 = vector.broadcast %cst_15 : f32 to vector<8x128xf32>
      %25 = vector.extract_strided_slice %21 {offsets = [0, 0], sizes = [128, 32], strides = [1, 1]} : vector<128x64xf32> to vector<128x32xf32>
      %26 = vector.shape_cast %25 : vector<128x32xf32> to vector<1x128x32xf32>
      %cst_16 = arith.constant dense<0.000000e+00> : vector<1xf32>
      %27 = vector.multi_reduction <add>, %26, %cst_16 [1, 2] : vector<1x128x32xf32> to vector<1xf32>
      %28 = vector.shape_cast %27 : vector<1xf32> to vector<1x1x1xf32>
      %29 = vector.extract %28[0, 0, 0] : f32 from vector<1x1x1xf32>
      %c0_i32_17 = arith.constant 0 : i32
      %30 = vector.broadcast %c0_i32_17 : i32 to vector<8x128xi32>
      %31 = arith.cmpi eq, %22, %30 : vector<8x128xi32>
      %c0_i32_18 = arith.constant 0 : i32
      %32 = vector.broadcast %c0_i32_18 : i32 to vector<8x128xi32>
      %33 = arith.cmpi eq, %23, %32 : vector<8x128xi32>
      %34 = arith.andi %31, %33 : vector<8x128xi1>
      %cst_19 = arith.constant 0.000000e+00 : f32
      %35 = vector.broadcast %29 : f32 to vector<8x128xf32>
      %36 = vector.broadcast %cst_19 : f32 to vector<8x128xf32>
      %37 = arith.select %34, %35, %36 : vector<8x128xi1>, vector<8x128xf32>
      %38 = arith.addf %24, %37 : vector<8x128xf32>
      %39 = vector.extract_strided_slice %21 {offsets = [0, 32], sizes = [128, 32], strides = [1, 1]} : vector<128x64xf32> to vector<128x32xf32>
      %40 = vector.shape_cast %39 : vector<128x32xf32> to vector<1x128x32xf32>
      %cst_20 = arith.constant dense<0.000000e+00> : vector<1xf32>
      %41 = vector.multi_reduction <add>, %40, %cst_20 [1, 2] : vector<1x128x32xf32> to vector<1xf32>
      %42 = vector.shape_cast %41 : vector<1xf32> to vector<1x1x1xf32>
      %43 = vector.extract %42[0, 0, 0] : f32 from vector<1x1x1xf32>
      %c0_i32_21 = arith.constant 0 : i32
      %44 = vector.broadcast %c0_i32_21 : i32 to vector<8x128xi32>
      %45 = arith.cmpi eq, %22, %44 : vector<8x128xi32>
      %c1_i32 = arith.constant 1 : i32
      %46 = vector.broadcast %c1_i32 : i32 to vector<8x128xi32>
      %47 = arith.cmpi eq, %23, %46 : vector<8x128xi32>
      %48 = arith.andi %45, %47 : vector<8x128xi1>
      %cst_22 = arith.constant 0.000000e+00 : f32
      %49 = vector.broadcast %43 : f32 to vector<8x128xf32>
      %50 = vector.broadcast %cst_22 : f32 to vector<8x128xf32>
      %51 = arith.select %48, %49, %50 : vector<8x128xi1>, vector<8x128xf32>
      %52 = arith.addf %38, %51 : vector<8x128xf32>
      %c0_23 = arith.constant 0 : index
      %c0_24 = arith.constant 0 : index
      %53 = vector.load %arg5[%c0_23, %c0_24] : memref<8x128xf32, #tpu.memory_space<vmem>>, vector<8x128xf32>
      tpu.vector_store %arg5[%c0_23, %c0_24], %52 {strides = array<i32>} : memref<8x128xf32, #tpu.memory_space<vmem>>, vector<8x128xf32>,
    } else {
    }
    return
  }
  func.func @transform_0(%arg0: i32, %arg1: i32) -> (i32, i32) {
    %c0_i32 = arith.constant 0 : i32
    return %arg0, %arg1 : i32, i32
  }
  func.func @transform_1(%arg0: i32, %arg1: i32) -> (i32, i32) {
    %c0_i32 = arith.constant 0 : i32
    %c0_i32_0 = arith.constant 0 : i32
    return %arg1, %c0_i32 : i32, i32
  }
  func.func @transform_2(%arg0: i32, %arg1: i32) -> (i32, i32) {
    %c0_i32 = arith.constant 0 : i32
    %c0_i32_0 = arith.constant 0 : i32
    return %arg0, %c0_i32 : i32, i32
  }
  func.func @transform_3(%arg0: i32, %arg1: i32) -> (i32, i32) {
    %c0_i32 = arith.constant 0 : i32
    %c0_i32_0 = arith.constant 0 : i32
    return %arg0, %c0_i32 : i32, i32
  }
}

module attributes {stable_mosaic.version = 11 : i64} {
  func.func @_support_kernel(%arg0: i32, %arg1: i32, %arg2: memref<128x96xf32, #tpu.memory_space<vmem>>, %arg3: memref<96x48xf32, #tpu.memory_space<vmem>>, %arg4: memref<128x48xf32, #tpu.memory_space<vmem>>, %arg5: memref<128x48xf32, #tpu.memory_space<vmem>>) attributes {dimension_semantics = [#tpu.dimension_semantics<parallel>, #tpu.dimension_semantics<arbitrary>], iteration_bounds = array<i64: 2, 1>, scalar_prefetch = 0 : i64, scratch_operands = 1 : i64, tpu.core_type = #tpu.core_type<tc>, window_params = [{transform_indices = @transform_0, window_bounds = array<i64: 128, 96>}, {transform_indices = @transform_1, window_bounds = array<i64: 96, 48>}, {transform_indices = @transform_2, window_bounds = array<i64: 128, 48>}]} {
    %c0_i32 = arith.constant 0 : i32
    %0 = arith.cmpi eq, %arg1, %c0_i32 : i32
    %1 = arith.extui %0 : i1 to i32
    %c0_i32_0 = arith.constant 0 : i32
    %2 = arith.cmpi ne, %1, %c0_i32_0 : i32
    scf.if %2 {
      %cst_10 = arith.constant 0.000000e+00 : f32
      %12 = vector.broadcast %cst_10 : f32 to vector<128x48xf32>
      %c0_11 = arith.constant 0 : index
      %c0_12 = arith.constant 0 : index
      %13 = vector.load %arg5[%c0_11, %c0_12] : memref<128x48xf32, #tpu.memory_space<vmem>>, vector<128x48xf32>
      tpu.vector_store %arg5[%c0_11, %c0_12], %12 {strides = array<i32>} : memref<128x48xf32, #tpu.memory_space<vmem>>, vector<128x48xf32>,
    } else {
    }
    %c0 = arith.constant 0 : index
    %c0_1 = arith.constant 0 : index
    %3 = vector.load %arg5[%c0, %c0_1] : memref<128x48xf32, #tpu.memory_space<vmem>>, vector<128x48xf32>
    %c0_2 = arith.constant 0 : index
    %c0_3 = arith.constant 0 : index
    %4 = vector.load %arg2[%c0_2, %c0_3] : memref<128x96xf32, #tpu.memory_space<vmem>>, vector<128x96xf32>
    %c0_4 = arith.constant 0 : index
    %c0_5 = arith.constant 0 : index
    %5 = vector.load %arg3[%c0_4, %c0_5] : memref<96x48xf32, #tpu.memory_space<vmem>>, vector<96x48xf32>
    %cst = arith.constant dense<0.000000e+00> : vector<128x48xf32>
    %6 = tpu.matmul %4, %5, %cst {dimension_numbers = #tpu.dot_dimension_numbers<[1], [0], [0], [1], [0, 0, 1, 1], [], []>} : vector<128x96xf32>, vector<96x48xf32>, vector<128x48xf32> -> vector<128x48xf32>
    %7 = arith.addf %3, %6 : vector<128x48xf32>
    %c0_6 = arith.constant 0 : index
    %c0_7 = arith.constant 0 : index
    %8 = vector.load %arg5[%c0_6, %c0_7] : memref<128x48xf32, #tpu.memory_space<vmem>>, vector<128x48xf32>
    tpu.vector_store %arg5[%c0_6, %c0_7], %7 {strides = array<i32>} : memref<128x48xf32, #tpu.memory_space<vmem>>, vector<128x48xf32>,
    %c0_i32_8 = arith.constant 0 : i32
    %9 = arith.cmpi eq, %arg1, %c0_i32_8 : i32
    %10 = arith.extui %9 : i1 to i32
    %c0_i32_9 = arith.constant 0 : i32
    %11 = arith.cmpi ne, %10, %c0_i32_9 : i32
    scf.if %11 {
      %c0_10 = arith.constant 0 : index
      %c0_11 = arith.constant 0 : index
      %12 = vector.load %arg5[%c0_10, %c0_11] : memref<128x48xf32, #tpu.memory_space<vmem>>, vector<128x48xf32>
      %c0_12 = arith.constant 0 : index
      %c0_13 = arith.constant 0 : index
      %13 = vector.load %arg4[%c0_12, %c0_13] : memref<128x48xf32, #tpu.memory_space<vmem>>, vector<128x48xf32>
      tpu.vector_store %arg4[%c0_12, %c0_13], %12 {strides = array<i32>} : memref<128x48xf32, #tpu.memory_space<vmem>>, vector<128x48xf32>,
    } else {
    }
    return
  }
  func.func @transform_0(%arg0: i32, %arg1: i32) -> (i32, i32) {
    %c0_i32 = arith.constant 0 : i32
    return %arg0, %arg1 : i32, i32
  }
  func.func @transform_1(%arg0: i32, %arg1: i32) -> (i32, i32) {
    %c0_i32 = arith.constant 0 : i32
    %c0_i32_0 = arith.constant 0 : i32
    return %arg1, %c0_i32 : i32, i32
  }
  func.func @transform_2(%arg0: i32, %arg1: i32) -> (i32, i32) {
    %c0_i32 = arith.constant 0 : i32
    %c0_i32_0 = arith.constant 0 : i32
    return %arg0, %c0_i32 : i32, i32
  }
}

module attributes {stable_mosaic.version = 11 : i64} {
  func.func @_enc2_kernel(%arg0: i32, %arg1: i32, %arg2: memref<128x256xf32, #tpu.memory_space<vmem>>, %arg3: memref<256x48xf32, #tpu.memory_space<vmem>>, %arg4: memref<128x16xf32, #tpu.memory_space<vmem>>, %arg5: memref<128x48xf32, #tpu.memory_space<vmem>>, %arg6: memref<128x16xf32, #tpu.memory_space<vmem>>, %arg7: memref<128x48xf32, #tpu.memory_space<vmem>>) attributes {dimension_semantics = [#tpu.dimension_semantics<parallel>, #tpu.dimension_semantics<arbitrary>], iteration_bounds = array<i64: 2, 1>, scalar_prefetch = 0 : i64, scratch_operands = 1 : i64, tpu.core_type = #tpu.core_type<tc>, window_params = [{transform_indices = @transform_0, window_bounds = array<i64: 128, 256>}, {transform_indices = @transform_1, window_bounds = array<i64: 256, 48>}, {transform_indices = @transform_2, window_bounds = array<i64: 128, 16>}, {transform_indices = @transform_3, window_bounds = array<i64: 128, 48>}, {transform_indices = @transform_4, window_bounds = array<i64: 128, 16>}]} {
    %c0_i32 = arith.constant 0 : i32
    %0 = arith.cmpi eq, %arg1, %c0_i32 : i32
    %1 = arith.extui %0 : i1 to i32
    %c0_i32_0 = arith.constant 0 : i32
    %2 = arith.cmpi ne, %1, %c0_i32_0 : i32
    scf.if %2 {
      %cst_10 = arith.constant 0.000000e+00 : f32
      %12 = vector.broadcast %cst_10 : f32 to vector<128x48xf32>
      %c0_11 = arith.constant 0 : index
      %c0_12 = arith.constant 0 : index
      %13 = vector.load %arg7[%c0_11, %c0_12] : memref<128x48xf32, #tpu.memory_space<vmem>>, vector<128x48xf32>
      tpu.vector_store %arg7[%c0_11, %c0_12], %12 {strides = array<i32>} : memref<128x48xf32, #tpu.memory_space<vmem>>, vector<128x48xf32>,
    } else {
    }
    %c0 = arith.constant 0 : index
    %c0_1 = arith.constant 0 : index
    %3 = vector.load %arg7[%c0, %c0_1] : memref<128x48xf32, #tpu.memory_space<vmem>>, vector<128x48xf32>
    %c0_2 = arith.constant 0 : index
    %c0_3 = arith.constant 0 : index
    %4 = vector.load %arg2[%c0_2, %c0_3] : memref<128x256xf32, #tpu.memory_space<vmem>>, vector<128x256xf32>
    %c0_4 = arith.constant 0 : index
    %c0_5 = arith.constant 0 : index
    %5 = vector.load %arg3[%c0_4, %c0_5] : memref<256x48xf32, #tpu.memory_space<vmem>>, vector<256x48xf32>
    %cst = arith.constant dense<0.000000e+00> : vector<128x48xf32>
    %6 = tpu.matmul %4, %5, %cst {dimension_numbers = #tpu.dot_dimension_numbers<[1], [0], [0], [1], [0, 0, 1, 1], [], []>} : vector<128x256xf32>, vector<256x48xf32>, vector<128x48xf32> -> vector<128x48xf32>
    %7 = arith.addf %3, %6 : vector<128x48xf32>
    %c0_6 = arith.constant 0 : index
    %c0_7 = arith.constant 0 : index
    %8 = vector.load %arg7[%c0_6, %c0_7] : memref<128x48xf32, #tpu.memory_space<vmem>>, vector<128x48xf32>
    tpu.vector_store %arg7[%c0_6, %c0_7], %7 {strides = array<i32>} : memref<128x48xf32, #tpu.memory_space<vmem>>, vector<128x48xf32>,
    %c0_i32_8 = arith.constant 0 : i32
    %9 = arith.cmpi eq, %arg1, %c0_i32_8 : i32
    %10 = arith.extui %9 : i1 to i32
    %c0_i32_9 = arith.constant 0 : i32
    %11 = arith.cmpi ne, %10, %c0_i32_9 : i32
    scf.if %11 {
      %c0_10 = arith.constant 0 : index
      %c0_11 = arith.constant 0 : index
      %12 = vector.load %arg7[%c0_10, %c0_11] : memref<128x48xf32, #tpu.memory_space<vmem>>, vector<128x48xf32>
      %c0_12 = arith.constant 0 : index
      %c0_13 = arith.constant 0 : index
      %13 = vector.load %arg5[%c0_12, %c0_13] : memref<128x48xf32, #tpu.memory_space<vmem>>, vector<128x48xf32>
      tpu.vector_store %arg5[%c0_12, %c0_13], %12 {strides = array<i32>} : memref<128x48xf32, #tpu.memory_space<vmem>>, vector<128x48xf32>,
      %c0_14 = arith.constant 0 : index
      %c0_15 = arith.constant 0 : index
      %14 = vector.load %arg4[%c0_14, %c0_15] : memref<128x16xf32, #tpu.memory_space<vmem>>, vector<128x16xf32>
      %15 = vector.extract_strided_slice %12 {offsets = [0, 16], sizes = [128, 16], strides = [1, 1]} : vector<128x48xf32> to vector<128x16xf32>
      %16 = vector.extract_strided_slice %12 {offsets = [0, 32], sizes = [128, 16], strides = [1, 1]} : vector<128x48xf32> to vector<128x16xf32>
      %cst_16 = arith.constant 5.000000e-01 : f32
      %17 = vector.broadcast %cst_16 : f32 to vector<128x16xf32>
      %18 = arith.mulf %16, %17 : vector<128x16xf32>
      %19 = math.exp %18 : vector<128x16xf32>
      %20 = arith.mulf %14, %19 : vector<128x16xf32>
      %21 = arith.addf %20, %15 : vector<128x16xf32>
      %c0_17 = arith.constant 0 : index
      %c0_18 = arith.constant 0 : index
      %22 = vector.load %arg6[%c0_17, %c0_18] : memref<128x16xf32, #tpu.memory_space<vmem>>, vector<128x16xf32>
      tpu.vector_store %arg6[%c0_17, %c0_18], %21 {strides = array<i32>} : memref<128x16xf32, #tpu.memory_space<vmem>>, vector<128x16xf32>,
    } else {
    }
    return
  }
  func.func @transform_0(%arg0: i32, %arg1: i32) -> (i32, i32) {
    %c0_i32 = arith.constant 0 : i32
    return %arg0, %arg1 : i32, i32
  }
  func.func @transform_1(%arg0: i32, %arg1: i32) -> (i32, i32) {
    %c0_i32 = arith.constant 0 : i32
    %c0_i32_0 = arith.constant 0 : i32
    return %arg1, %c0_i32 : i32, i32
  }
  func.func @transform_2(%arg0: i32, %arg1: i32) -> (i32, i32) {
    %c0_i32 = arith.constant 0 : i32
    %c0_i32_0 = arith.constant 0 : i32
    return %arg0, %c0_i32 : i32, i32
  }
  func.func @transform_3(%arg0: i32, %arg1: i32) -> (i32, i32) {
    %c0_i32 = arith.constant 0 : i32
    %c0_i32_0 = arith.constant 0 : i32
    return %arg0, %c0_i32 : i32, i32
  }
  func.func @transform_4(%arg0: i32, %arg1: i32) -> (i32, i32) {
    %c0_i32 = arith.constant 0 : i32
    %c0_i32_0 = arith.constant 0 : i32
    return %arg0, %c0_i32 : i32, i32
  }
}

module attributes {stable_mosaic.version = 11 : i64} {
  func.func @_gram_sigmoid_kernel(%arg0: i32, %arg1: i32, %arg2: i32, %arg3: memref<1x128x16xf32, #tpu.memory_space<vmem>>, %arg4: memref<1x256x16xf32, #tpu.memory_space<vmem>>, %arg5: memref<1x128x256xf32, #tpu.memory_space<vmem>>) attributes {dimension_semantics = [#tpu.dimension_semantics<parallel>, #tpu.dimension_semantics<parallel>, #tpu.dimension_semantics<parallel>], iteration_bounds = array<i64: 1, 2, 1>, scalar_prefetch = 0 : i64, scratch_operands = 0 : i64, tpu.core_type = #tpu.core_type<tc>, window_params = [{transform_indices = @transform_0, window_bounds = array<i64: 1, 128, 16>}, {transform_indices = @transform_1, window_bounds = array<i64: 1, 256, 16>}, {transform_indices = @transform_2, window_bounds = array<i64: 1, 128, 256>}]} {
    %c0 = arith.constant 0 : index
    %c0_0 = arith.constant 0 : index
    %c0_1 = arith.constant 0 : index
    %0 = vector.load %arg3[%c0, %c0_0, %c0_1] : memref<1x128x16xf32, #tpu.memory_space<vmem>>, vector<1x128x16xf32>
    %1 = vector.shape_cast %0 : vector<1x128x16xf32> to vector<128x16xf32>
    %c0_2 = arith.constant 0 : index
    %c0_3 = arith.constant 0 : index
    %c0_4 = arith.constant 0 : index
    %2 = vector.load %arg4[%c0_2, %c0_3, %c0_4] : memref<1x256x16xf32, #tpu.memory_space<vmem>>, vector<1x256x16xf32>
    %3 = vector.shape_cast %2 : vector<1x256x16xf32> to vector<256x16xf32>
    %cst = arith.constant dense<0.000000e+00> : vector<128x256xf32>
    %4 = tpu.matmul %1, %3, %cst {dimension_numbers = #tpu.dot_dimension_numbers<[1], [1], [0], [0], [0, 0, 1, 0], [], []>} : vector<128x16xf32>, vector<256x16xf32>, vector<128x256xf32> -> vector<128x256xf32>
    %5 = arith.negf %4 : vector<128x256xf32>
    %6 = math.exp %5 : vector<128x256xf32>
    %cst_5 = arith.constant 1.000000e+00 : f32
    %7 = vector.broadcast %cst_5 : f32 to vector<128x256xf32>
    %8 = arith.addf %7, %6 : vector<128x256xf32>
    %9 = arith.divf %7, %8 : vector<128x256xf32>
    %c0_6 = arith.constant 0 : index
    %c0_7 = arith.constant 0 : index
    %c0_8 = arith.constant 0 : index
    %10 = vector.load %arg5[%c0_6, %c0_7, %c0_8] : memref<1x128x256xf32, #tpu.memory_space<vmem>>, vector<1x128x256xf32>
    %11 = vector.shape_cast %10 : vector<1x128x256xf32> to vector<128x256xf32>
    %12 = vector.shape_cast %9 : vector<128x256xf32> to vector<1x128x256xf32>
    tpu.vector_store %arg5[%c0_6, %c0_7, %c0_8], %12 {strides = array<i32>} : memref<1x128x256xf32, #tpu.memory_space<vmem>>, vector<1x128x256xf32>,
    return
  }
  func.func @transform_0(%arg0: i32, %arg1: i32, %arg2: i32) -> (i32, i32, i32) {
    %c0_i32 = arith.constant 0 : i32
    %c0_i32_0 = arith.constant 0 : i32
    return %arg0, %arg1, %c0_i32 : i32, i32, i32
  }
  func.func @transform_1(%arg0: i32, %arg1: i32, %arg2: i32) -> (i32, i32, i32) {
    %c0_i32 = arith.constant 0 : i32
    %c0_i32_0 = arith.constant 0 : i32
    return %arg0, %arg2, %c0_i32 : i32, i32, i32
  }
  func.func @transform_2(%arg0: i32, %arg1: i32, %arg2: i32) -> (i32, i32, i32) {
    %c0_i32 = arith.constant 0 : i32
    return %arg0, %arg1, %arg2 : i32, i32, i32
  }
}

</mosaic_0001>

<bundles_post_ra>
// kernel: sigvae_forward.7
= control target key start
LH: loop header
LB: loop body
LE: loop exit
PB: predicated region body
PF: predicated region fallthrough
CT: control target
= control target key end

     0   :  { %s737_s9 = smov 0   ;;  %s739_s10 = smov 0   ;;  %s874_s0 = inlined_call_operand.vmem [shape: f32[256,16], index: 0, kind: input, shape index: {}]   ;;  %s875_s1 = inlined_call_operand.vmem [shape: f32[16,96], index: 1, kind: input, shape index: {}]   ;;  %s876_s2 = inlined_call_operand.vmem [shape: f32[256,96], index: 2, kind: output, shape index: {}]  }
   0x1   :  { %s741_s11 = smov 0  }
   0x2 LB: > { %s24_s12 = sadd.s32 1, %s715_s10  ;;  %p597_p0 = scmp.ge.s32.totalorder %s719_s11, 1  ;;  %s719_s11 = sphi %s741_s11, %s12_s11   ;;  %s715_s10 = sphi %s739_s10, %s879_s10   ;;  %s711_s9 = sphi %s737_s9, %s878_s9  }
   0x3   : > { %p26_p1 = scmp.ge.s32.totalorder %s24_s12, 2  ;;  %p141_p2 = scmp.lt.s32.totalorder %s719_s11, 3 }
   0x5   : > { %s881_s12 = smov (%p26_p1, %s24_s12), 0  ;;  %p142_p3 = pnand %p597_p0, %p141_p2 }
   0x6   : > { %v245_v0 = vld [vmem:[%s875_s1] sm:$0xff] (!%p142_p3)  ;;  %v246_v1 = vld [vmem:[%s875_s1 + $0x8] sm:$0xff] (!%p142_p3)  ;;  %s598_s17 = sshll.u32 (!%p142_p3), %s711_s9, 4  ;;  %vm196_vm0 = vcmask (!%p142_p3), 785408   ;;  %v721_v3 = vmov (!%p142_p3), 0.0   ;;  %vm247_vm1 = vcmask (!%p142_p3), 130048  }
   0x7   : > { %145 = sbr.rel (%p142_p3) target bundleno = 258 (0x102), region = 28  ;;  %v666_v2 = vpack.c.bf16 (!%p142_p3), %v246_v1, %v245_v0  ;;  %p764_p4 = scmp.lt.s32.totalorder (!%p142_p3), %s598_s17, 31  ;;  %198 = vst.msk [vmem:[#allocation2 + $0x8] sm:$0xff] (!%p142_p3), %vm196_vm0, %v721_v3  ;;  %197 = vst.msk [vmem:[#allocation2] sm:$0xff] (!%p142_p3), %vm196_vm0, %v721_v3 }
   0x8   : > { %199 = vst.msk [vmem:[#allocation2 + $0x10] sm:$0xff] (!%p142_p3), %vm196_vm0, %v721_v3  ;;  %200 = vst.msk [vmem:[#allocation2 + $0x18] sm:$0xff] (!%p142_p3), %vm196_vm0, %v721_v3 }
   0x9   : > { %201 = vst.msk [vmem:[#allocation2 + $0x20] sm:$0xff] (!%p142_p3), %vm196_vm0, %v721_v3  ;;  %202 = vst.msk [vmem:[#allocation2 + $0x28] sm:$0xff] (!%p142_p3), %vm196_vm0, %v721_v3  ;;  %667 = vmatprep.subr.bf16.mxu0 (!%p142_p3), %v666_v2  ;;  %670 = vmatprep.subr.bf16.mxu1 (!%p142_p3), %v666_v2 }
   0xa   : > { %203 = vst.msk [vmem:[#allocation2 + $0x30] sm:$0xff] (!%p142_p3), %vm196_vm0, %v721_v3  ;;  %204 = vst.msk [vmem:[#allocation2 + $0x38] sm:$0xff] (!%p142_p3), %vm196_vm0, %v721_v3  ;;  %669 = vmatpush3.bf16.msra.mxu0 (!%p142_p3), %v666_v2  ;;  %671 = vmatpush3.bf16.msra.mxu1 (!%p142_p3), %v666_v2 }
   0xb   : > { %205 = vst.msk [vmem:[#allocation2 + $0x40] sm:$0xff] (!%p142_p3), %vm196_vm0, %v721_v3  ;;  %206 = vst.msk [vmem:[#allocation2 + $0x48] sm:$0xff] (!%p142_p3), %vm196_vm0, %v721_v3 }
   0xc   : > { %207 = vst.msk [vmem:[#allocation2 + $0x50] sm:$0xff] (!%p142_p3), %vm196_vm0, %v721_v3  ;;  %208 = vst.msk [vmem:[#allocation2 + $0x58] sm:$0xff] (!%p142_p3), %vm196_vm0, %v721_v3 }
   0xd   : > { %209 = vst.msk [vmem:[#allocation2 + $0x60] sm:$0xff] (!%p142_p3), %vm196_vm0, %v721_v3  ;;  %210 = vst.msk [vmem:[#allocation2 + $0x68] sm:$0xff] (!%p142_p3), %vm196_vm0, %v721_v3 }
   0xe   : > { %211 = vst.msk [vmem:[#allocation2 + $0x70] sm:$0xff] %vm196_vm0, %v721_v3  ;;  %212 = vst.msk [vmem:[#allocation2 + $0x78] sm:$0xff] %vm196_vm0, %v721_v3  ;;  %s883_s17 = smov (!%p764_p4, %s598_s17), 31  ;;  %v214_v20 = vld [vmem:[#allocation2 + $0x8] sm:$0xff]  ;;  %v213_v22 = vld [vmem:[#allocation2] sm:$0xff] }
   0xf   : > { %s599_s19 = sshll.u32 %s883_s17, 3  ;;  %v216_v32 = vld [vmem:[#allocation2 + $0x18] sm:$0xff]  ;;  %v215_v34 = vld [vmem:[#allocation2 + $0x10] sm:$0xff] }
  0x10   : > { %s178_s22 = scalar_lea.vmem %s874_s0, %s599_s19  ;;  %v218_v44 = vld [vmem:[#allocation2 + $0x28] sm:$0xff]  ;;  %v217_v46 = vld [vmem:[#allocation2 + $0x20] sm:$0xff]  ;;  %s821_s25 = scalar_lea.vmem %s876_s2, %s599_s19 }
  0x11   : > { %v229_v4 = vld [vmem:[%s178_s22] sm:$0xff]  ;;  %v230_v6 = vld [vmem:[%s178_s22 + $0x8] sm:$0xff]  ;;  %v231_v8 = vld [vmem:[%s178_s22 + $0x10] sm:$0xff] }
  0x12   : > { %v237_v5 = vld [vmem:[%s178_s22 + $0x40] sm:$0xff]  ;;  %642 = vmatprep.mubr.msk.f32.mxu0 %vm247_vm1, %v229_v4  ;;  %v238_v7 = vld [vmem:[%s178_s22 + $0x48] sm:$0xff]  ;;  %v239_v9 = vld [vmem:[%s178_s22 + $0x50] sm:$0xff] }
  0x13   : > { %654 = vmatprep.mubr.msk.f32.mxu1 %vm247_vm1, %v237_v5  ;;  %643 = vmatmul.mubr.msk.f32.vlgmr.msra.gmra.mrb[0].mxu0 %vm247_vm1, %v230_v6  ;;  %v232_v10 = vld [vmem:[%s178_s22 + $0x18] sm:$0xff]  ;;  %v233_v12 = vld [vmem:[%s178_s22 + $0x20] sm:$0xff]  ;;  %v234_v14 = vld [vmem:[%s178_s22 + $0x28] sm:$0xff] }
  0x14   : > { %655 = vmatmul.mubr.msk.f32.vlgmr.msra.gmra.mrb[0].mxu1 %vm247_vm1, %v238_v7  ;;  %645 = vmatprep.mubr.msk.f32.mxu0 %vm247_vm1, %v231_v8  ;;  %v240_v11 = vld [vmem:[%s178_s22 + $0x58] sm:$0xff]  ;;  %v241_v13 = vld [vmem:[%s178_s22 + $0x60] sm:$0xff]  ;;  %v242_v15 = vld [vmem:[%s178_s22 + $0x68] sm:$0xff] }
  0x15   : > { %657 = vmatprep.mubr.msk.f32.mxu1 %vm247_vm1, %v239_v9  ;;  %v235_v16 = vld [vmem:[%s178_s22 + $0x30] sm:$0xff]  ;;  %v236_v18 = vld [vmem:[%s178_s22 + $0x38] sm:$0xff]  ;;  %v222_v21 = vld [vmem:[#allocation2 + $0x48] sm:$0xff] }
  0x16   : > { %v243_v17 = vld [vmem:[%s178_s22 + $0x70] sm:$0xff]  ;;  %v244_v19 = vld [vmem:[%s178_s22 + $0x78] sm:$0xff]  ;;  %v221_v23 = vld [vmem:[#allocation2 + $0x40] sm:$0xff] }
  0x17   : > { %646 = vmatmul.mubr.msk.f32.gmra.mrb[2].mxu0 %vm247_vm1, %v232_v10  ;;  %v224_v33 = vld [vmem:[#allocation2 + $0x58] sm:$0xff]  ;;  %v223_v35 = vld [vmem:[#allocation2 + $0x50] sm:$0xff]  ;;  %v226_v45 = vld [vmem:[#allocation2 + $0x68] sm:$0xff] }
  0x18   : > { %658 = vmatmul.mubr.msk.f32.gmra.mrb[2].mxu1 %vm247_vm1, %v240_v11  ;;  %648 = vmatprep.mubr.msk.f32.mxu0 %vm247_vm1, %v233_v12  ;;  %v225_v47 = vld [vmem:[#allocation2 + $0x60] sm:$0xff]  ;;  %v220_v54 = vld [vmem:[#allocation2 + $0x38] sm:$0xff]  ;;  %v219_v60 = vld [vmem:[#allocation2 + $0x30] sm:$0xff] }
  0x19   : > { %660 = vmatprep.mubr.msk.f32.mxu1 %vm247_vm1, %v241_v13  ;;  %v228_v55 = vld [vmem:[#allocation2 + $0x78] sm:$0xff]  ;;  %v227_v63 = vld [vmem:[#allocation2 + $0x70] sm:$0xff] }
  0x1b   : > { %649 = vmatmul.mubr.msk.f32.gmra.mrb[4].mxu0 %vm247_vm1, %v234_v14 }
  0x1c   : > { %661 = vmatmul.mubr.msk.f32.gmra.mrb[4].mxu1 %vm247_vm1, %v242_v15  ;;  %651 = vmatprep.mubr.msk.f32.mxu0 %vm247_vm1, %v235_v16 }
  0x1d   : > { %663 = vmatprep.mubr.msk.f32.mxu1 %vm247_vm1, %v243_v17 }
  0x1f   : > { %652 = vmatmul.mubr.msk.f32.gmra.mrb[6].mxu0 %vm247_vm1, %v236_v18 }
  0x20   : > { %664 = vmatmul.mubr.msk.f32.gmra.mrb[6].mxu1 %vm247_vm1, %v244_v19 }
  0xe6   : > { %v644_v24 = vpop.f32.mrb[0].mxu0 }
  0xe7   : > { %v656_v25 = vpop.f32.mrb[0].mxu1  ;;  %v442_v26 = vadd.f32 %v644_v24, %v214_v20  ;;  %v362_v28 = vpop.f32.mrb[1].mxu0 }
  0xe8   : > { %v450_v27 = vadd.f32 %v656_v25, %v222_v21  ;;  %v402_v29 = vpop.f32.mrb[1].mxu1  ;;  %v441_v30 = vadd.f32 %v362_v28, %v213_v22 }
  0xe9   : > { %v449_v31 = vadd.f32 %v402_v29, %v221_v23  ;;  %459 = vst.msk [vmem:[#allocation2 + $0x8] sm:$0xff] %vm196_vm0, %v442_v26 }
  0xea   : > { %467 = vst.msk [vmem:[#allocation2 + $0x48] sm:$0xff] %vm196_vm0, %v450_v27  ;;  %458 = vst.msk [vmem:[#allocation2] sm:$0xff] %vm196_vm0, %v441_v30  ;;  %v647_v36 = vpop.f32.mrb[2].mxu0 }
  0xeb   : > { %466 = vst.msk [vmem:[#allocation2 + $0x40] sm:$0xff] %vm196_vm0, %v449_v31  ;;  %v659_v37 = vpop.f32.mrb[2].mxu1  ;;  %v444_v38 = vadd.f32 %v647_v36, %v216_v32  ;;  %v372_v40 = vpop.f32.mrb[3].mxu0 }
  0xec   : > { %v452_v39 = vadd.f32 %v659_v37, %v224_v33  ;;  %v412_v41 = vpop.f32.mrb[3].mxu1  ;;  %v443_v42 = vadd.f32 %v372_v40, %v215_v34 }
  0xed   : > { %v451_v43 = vadd.f32 %v412_v41, %v223_v35  ;;  %461 = vst.msk [vmem:[#allocation2 + $0x18] sm:$0xff] %vm196_vm0, %v444_v38 }
  0xee   : > { %469 = vst.msk [vmem:[#allocation2 + $0x58] sm:$0xff] %vm196_vm0, %v452_v39  ;;  %460 = vst.msk [vmem:[#allocation2 + $0x10] sm:$0xff] %vm196_vm0, %v443_v42  ;;  %v650_v48 = vpop.f32.mrb[4].mxu0 }
  0xef   : > { %468 = vst.msk [vmem:[#allocation2 + $0x50] sm:$0xff] %vm196_vm0, %v451_v43  ;;  %v662_v49 = vpop.f32.mrb[4].mxu1  ;;  %v446_v50 = vadd.f32 %v650_v48, %v218_v44  ;;  %v382_v52 = vpop.f32.mrb[5].mxu0 }
  0xf0   : > { %v454_v51 = vadd.f32 %v662_v49, %v226_v45  ;;  %v422_v53 = vpop.f32.mrb[5].mxu1  ;;  %v478_v56 = vld [vmem:[#allocation2 + $0x8] sm:$0xff]  ;;  %v445_v58 = vadd.f32 %v382_v52, %v217_v46 }
  0xf1   : > { %v486_v57 = vld [vmem:[#allocation2 + $0x48] sm:$0xff]  ;;  %v453_v59 = vadd.f32 %v422_v53, %v225_v47  ;;  %494 = vst.msk [vmem:[%s821_s25 + $0x8] sm:$0xff] %vm196_vm0, %v478_v56  ;;  %v477_v61 = vld [vmem:[#allocation2] sm:$0xff]  ;;  %463 = vst.msk [vmem:[#allocation2 + $0x28] sm:$0xff] %vm196_vm0, %v446_v50 }
  0xf2   : > { %502 = vst.msk [vmem:[%s821_s25 + $0x48] sm:$0xff] %vm196_vm0, %v486_v57  ;;  %v485_v62 = vld [vmem:[#allocation2 + $0x40] sm:$0xff]  ;;  %471 = vst.msk [vmem:[#allocation2 + $0x68] sm:$0xff] %vm196_vm0, %v454_v51  ;;  %v653_v0 = vpop.f32.mrb[6].mxu0 }
  0xf3   : > { %493 = vst.msk [vmem:[%s821_s25] sm:$0xff] %vm196_vm0, %v477_v61  ;;  %501 = vst.msk [vmem:[%s821_s25 + $0x40] sm:$0xff] %vm196_vm0, %v485_v62  ;;  %v665_v1 = vpop.f32.mrb[6].mxu1  ;;  %v448_v2 = vadd.f32 %v653_v0, %v220_v54  ;;  %v392_v4 = vpop.f32.mrb[7].mxu0 }
  0xf4   : > { %462 = vst.msk [vmem:[#allocation2 + $0x20] sm:$0xff] %vm196_vm0, %v445_v58  ;;  %470 = vst.msk [vmem:[#allocation2 + $0x60] sm:$0xff] %vm196_vm0, %v453_v59  ;;  %v456_v3 = vadd.f32 %v665_v1, %v228_v55  ;;  %v432_v5 = vpop.f32.mrb[7].mxu1  ;;  %v480_v6 = vld [vmem:[#allocation2 + $0x18] sm:$0xff]  ;;  %v447_v8 = vadd.f32 %v392_v4, %v219_v60 }
  0xf5   : > { %v488_v7 = vld [vmem:[#allocation2 + $0x58] sm:$0xff]  ;;  %v455_v9 = vadd.f32 %v432_v5, %v227_v63  ;;  %496 = vst.msk [vmem:[%s821_s25 + $0x18] sm:$0xff] %vm196_vm0, %v480_v6  ;;  %v479_v10 = vld [vmem:[#allocation2 + $0x10] sm:$0xff]  ;;  %465 = vst.msk [vmem:[#allocation2 + $0x38] sm:$0xff] %vm196_vm0, %v448_v2 }
  0xf6   : > { %504 = vst.msk [vmem:[%s821_s25 + $0x58] sm:$0xff] %vm196_vm0, %v488_v7  ;;  %v487_v11 = vld [vmem:[#allocation2 + $0x50] sm:$0xff]  ;;  %473 = vst.msk [vmem:[#allocation2 + $0x78] sm:$0xff] %vm196_vm0, %v456_v3 }
  0xf7   : > { %495 = vst.msk [vmem:[%s821_s25 + $0x10] sm:$0xff] %vm196_vm0, %v479_v10  ;;  %503 = vst.msk [vmem:[%s821_s25 + $0x50] sm:$0xff] %vm196_vm0, %v487_v11 }
  0xf8   : > { %464 = vst.msk [vmem:[#allocation2 + $0x30] sm:$0xff] %vm196_vm0, %v447_v8  ;;  %472 = vst.msk [vmem:[#allocation2 + $0x70] sm:$0xff] %vm196_vm0, %v455_v9  ;;  %v482_v12 = vld [vmem:[#allocation2 + $0x28] sm:$0xff] }
  0xf9   : > { %v490_v13 = vld [vmem:[#allocation2 + $0x68] sm:$0xff]  ;;  %498 = vst.msk [vmem:[%s821_s25 + $0x28] sm:$0xff] %vm196_vm0, %v482_v12 }
  0xfa   : > { %506 = vst.msk [vmem:[%s821_s25 + $0x68] sm:$0xff] %vm196_vm0, %v490_v13 }
  0xfb   : > { %v481_v14 = vld [vmem:[#allocation2 + $0x20] sm:$0xff] }
  0xfc   : > { %v489_v15 = vld [vmem:[#allocation2 + $0x60] sm:$0xff]  ;;  %497 = vst.msk [vmem:[%s821_s25 + $0x20] sm:$0xff] %vm196_vm0, %v481_v14  ;;  %v484_v16 = vld [vmem:[#allocation2 + $0x38] sm:$0xff] }
  0xfd   : > { %505 = vst.msk [vmem:[%s821_s25 + $0x60] sm:$0xff] %vm196_vm0, %v489_v15  ;;  %v492_v17 = vld [vmem:[#allocation2 + $0x78] sm:$0xff]  ;;  %500 = vst.msk [vmem:[%s821_s25 + $0x38] sm:$0xff] %vm196_vm0, %v484_v16 }
  0xfe   : > { %508 = vst.msk [vmem:[%s821_s25 + $0x78] sm:$0xff] %vm196_vm0, %v492_v17 }
  0xff   : > { %v483_v18 = vld [vmem:[#allocation2 + $0x30] sm:$0xff] }
 0x100   : > { %v491_v19 = vld [vmem:[#allocation2 + $0x70] sm:$0xff]  ;;  %499 = vst.msk [vmem:[%s821_s25 + $0x30] sm:$0xff] %vm196_vm0, %v483_v18 }
 0x101   : > { %507 = vst.msk [vmem:[%s821_s25 + $0x70] sm:$0xff] %vm196_vm0, %v491_v19 }
 0x102 PF: > { %s12_s11 = sadd.s32 1, %s719_s11   ;;  %s878_s9 = smov %s715_s10 }
 0x103   : > { %p9_p5 = scmp.ge.s32.totalorder %s12_s11, 4   ;;  %s879_s10 = smov %s881_s12 }
 0x105   :  { %11 = sbr.rel (!%p9_p5) target bundleno = 2 (0x2), region = 69 }

// kernel: sigvae_forward.8
= control target key start
LH: loop header
LB: loop body
LE: loop exit
PB: predicated region body
PF: predicated region fallthrough
CT: control target
= control target key end

     0   :  { %s1309_s12 = smov 0   ;;  %s1311_s13 = smov 0   ;;  %s1806_s0 = inlined_call_operand.vmem [shape: f32[256,256], index: 0, kind: input, shape index: {}]   ;;  %s1807_s1 = inlined_call_operand.vmem [shape: f32[256,96], index: 1, kind: input, shape index: {}]   ;;  %s1808_s2 = inlined_call_operand.vmem [shape: f32[256,96], index: 2, kind: output, shape index: {0}]   ;;  %s1809_s3 = inlined_call_operand.vmem [shape: f32[16,128], index: 3, kind: output, shape index: {1}]  }
   0x1   :  { %s1313_s14 = smov 0  }
   0x2 LB: > { %s26_s15 = sadd.s32 1, %s1279_s13  ;;  %p1091_p0 = scmp.ge.s32.totalorder %s1283_s14, 1  ;;  %s1283_s14 = sphi %s1313_s14, %s14_s14   ;;  %s1279_s13 = sphi %s1311_s13, %s1811_s13   ;;  %s1275_s12 = sphi %s1309_s12, %s1810_s12  }
   0x3   : > { %p28_p1 = scmp.ge.s32.totalorder %s26_s15, 2  ;;  %p172_p2 = scmp.lt.s32.totalorder %s1283_s14, 3 }
   0x5   : > { %s1813_s15 = smov (%p28_p1, %s26_s15), 0  ;;  %p173_p3 = pnand %p1091_p0, %p172_p2 }
   0x6   : > { %v323_v0 = vld [vmem:[%s1807_s1 + $0x80] sm:$0xff] (!%p173_p3)  ;;  %v324_v1 = vld [vmem:[%s1807_s1 + $0x88] sm:$0xff] (!%p173_p3)  ;;  %s1092_s22 = sshll.u32 (!%p173_p3), %s1275_s12, 4  ;;  %v325_v5 = vld [vmem:[%s1807_s1 + $0x90] sm:$0xff] (!%p173_p3)  ;;  %vm242_vm0 = vcmask (!%p173_p3), 785408   ;;  %s1287_s19 = smov (!%p173_p3), 96  }
   0x7   : > { %176 = sbr.rel (%p173_p3) target bundleno = 714 (0x2ca), region = 28  ;;  %v307_v2 = vld [vmem:[%s1807_s1] sm:$0xff] (!%p173_p3)  ;;  %v1181_v3 = vpack.c.bf16 (!%p173_p3), %v324_v1, %v323_v0  ;;  %v308_v4 = vld [vmem:[%s1807_s1 + $0x8] sm:$0xff] (!%p173_p3)  ;;  %v326_v6 = vld [vmem:[%s1807_s1 + $0x98] sm:$0xff] (!%p173_p3)  ;;  %p212_p4 = scmp.lt.s32.totalorder (!%p173_p3), %s1092_s22, 31  ;;  %vm616_vm1 = vcmask (!%p173_p3), 261120  }
   0x8   : > { %v1183_v7 = vpack.c.bf16 (!%p173_p3), %v308_v4, %v307_v2  ;;  %v1185_v8 = vpack.c.bf16 (!%p173_p3), %v326_v6, %v325_v5  ;;  %v309_v9 = vld [vmem:[%s1807_s1 + $0x10] sm:$0xff] (!%p173_p3)  ;;  %v310_v10 = vld [vmem:[%s1807_s1 + $0x18] sm:$0xff] (!%p173_p3)  ;;  %v327_v11 = vld [vmem:[%s1807_s1 + $0xa0] sm:$0xff] (!%p173_p3)  ;;  %s1288_s20 = smov (!%p173_p3), 32   ;;  %p234_p5 = scmp.lt.s32.totalorder (!%p173_p3), %s1275_s12, 1 }
   0x9   : > { %1182 = vmatprep.subr.bf16.mxu0 (!%p173_p3), %v1181_v3  ;;  %1213 = vmatprep.subr.bf16.mxu1 (!%p173_p3), %v1181_v3  ;;  %v328_v12 = vld [vmem:[%s1807_s1 + $0xa8] sm:$0xff] (!%p173_p3)  ;;  %v1187_v13 = vpack.c.bf16 (!%p173_p3), %v310_v10, %v309_v9  ;;  %v311_v15 = vld [vmem:[%s1807_s1 + $0x20] sm:$0xff] (!%p173_p3)  ;;  %v329_v17 = vld [vmem:[%s1807_s1 + $0xb0] sm:$0xff] (!%p173_p3) }
   0xa   : > { %1184 = vmatpush3.bf16.msra.mxu0 (!%p173_p3), %v1183_v7  ;;  %1221 = vmatpush3.bf16.msra.mxu1 (!%p173_p3), %v1183_v7  ;;  %v1189_v14 = vpack.c.bf16 (!%p173_p3), %v328_v12, %v327_v11  ;;  %v312_v16 = vld [vmem:[%s1807_s1 + $0x28] sm:$0xff] (!%p173_p3)  ;;  %v330_v18 = vld [vmem:[%s1807_s1 + $0xb8] sm:$0xff] (!%p173_p3)  ;;  %v313_v21 = vld [vmem:[%s1807_s1 + $0x30] sm:$0xff] (!%p173_p3) }
   0xb   : > { %1186 = vmatprep.subr.bf16.mxu0 (!%p173_p3), %v1185_v8  ;;  %1214 = vmatprep.subr.bf16.mxu1 (!%p173_p3), %v1185_v8  ;;  %v1191_v19 = vpack.c.bf16 (!%p173_p3), %v312_v16, %v311_v15  ;;  %v1193_v20 = vpack.c.bf16 (!%p173_p3), %v330_v18, %v329_v17  ;;  %v314_v22 = vld [vmem:[%s1807_s1 + $0x38] sm:$0xff] (!%p173_p3)  ;;  %v331_v23 = vld [vmem:[%s1807_s1 + $0xc0] sm:$0xff] (!%p173_p3)  ;;  %v332_v24 = vld [vmem:[%s1807_s1 + $0xc8] sm:$0xff] (!%p173_p3)  ;;  %v1285_v16 = vmov (!%p173_p3), 0.0  }
   0xc   : > { %v1195_v27 = vpack.c.bf16 (!%p173_p3), %v314_v22, %v313_v21  ;;  %v1197_v28 = vpack.c.bf16 (!%p173_p3), %v332_v24, %v331_v23  ;;  %v315_v29 = vld [vmem:[%s1807_s1 + $0x40] sm:$0xff] (!%p173_p3)  ;;  %v316_v30 = vld [vmem:[%s1807_s1 + $0x48] sm:$0xff] (!%p173_p3)  ;;  %v333_v31 = vld [vmem:[%s1807_s1 + $0xd0] sm:$0xff] (!%p173_p3)  ;;  %243 = vst.msk [vmem:[#allocation2] sm:$0xff] (!%p173_p3), %vm242_vm0, %v1285_v16 }
   0xd   : > { %v334_v32 = vld [vmem:[%s1807_s1 + $0xd8] sm:$0xff] (!%p173_p3)  ;;  %v1199_v33 = vpack.c.bf16 (!%p173_p3), %v316_v30, %v315_v29  ;;  %v317_v35 = vld [vmem:[%s1807_s1 + $0x50] sm:$0xff] (!%p173_p3)  ;;  %v335_v37 = vld [vmem:[%s1807_s1 + $0xe0] sm:$0xff] (!%p173_p3)  ;;  %244 = vst.msk [vmem:[#allocation2 + $0x8] sm:$0xff] (!%p173_p3), %vm242_vm0, %v1285_v16 }
   0xe   : > { %s1815_s22 = smov (!%p212_p4, %s1092_s22), 31  ;;  %1188 = vmatpush3.bf16.msra.mxu0 %v1187_v13  ;;  %1222 = vmatpush3.bf16.msra.mxu1 %v1187_v13  ;;  %v1201_v34 = vpack.c.bf16 %v334_v32, %v333_v31  ;;  %v318_v36 = vld [vmem:[%s1807_s1 + $0x58] sm:$0xff]  ;;  %v336_v38 = vld [vmem:[%s1807_s1 + $0xe8] sm:$0xff]  ;;  %v319_v41 = vld [vmem:[%s1807_s1 + $0x60] sm:$0xff]  ;;  %245 = vst.msk [vmem:[#allocation2 + $0x10] sm:$0xff] %vm242_vm0, %v1285_v16  ;;  %s1817_s12 = smov (!%p234_p5, %s1275_s12), 1 }
   0xf   : > { %s1100_s18 = sshll.u32 %s1815_s22, 4  ;;  %1190 = vmatprep.subr.bf16.mxu0 %v1189_v14  ;;  %1215 = vmatprep.subr.bf16.mxu1 %v1189_v14  ;;  %v1203_v39 = vpack.c.bf16 %v318_v36, %v317_v35  ;;  %v1205_v40 = vpack.c.bf16 %v336_v38, %v335_v37  ;;  %v320_v42 = vld [vmem:[%s1807_s1 + $0x68] sm:$0xff]  ;;  %v337_v43 = vld [vmem:[%s1807_s1 + $0xf0] sm:$0xff]  ;;  %v338_v44 = vld [vmem:[%s1807_s1 + $0xf8] sm:$0xff]  ;;  %246 = vst.msk [vmem:[#allocation2 + $0x18] sm:$0xff] %vm242_vm0, %v1285_v16  ;;  %s1096_s21 = sshll.u32 %s1815_s22, 3 }
  0x10   : > { %s1378_s26 = scalar_lea.vmem %s1806_s0, %s1100_s18  ;;  %v1207_v45 = vpack.c.bf16 %v320_v42, %v319_v41  ;;  %v1209_v46 = vpack.c.bf16 %v338_v44, %v337_v43  ;;  %v321_v47 = vld [vmem:[%s1807_s1 + $0x70] sm:$0xff]  ;;  %v322_v48 = vld [vmem:[%s1807_s1 + $0x78] sm:$0xff]  ;;  %247 = vst.msk [vmem:[#allocation2 + $0x20] sm:$0xff] %vm242_vm0, %v1285_v16  ;;  %248 = vst.msk [vmem:[#allocation2 + $0x28] sm:$0xff] %vm242_vm0, %v1285_v16  ;;  %s1710_s25 = scalar_lea.vmem %s1808_s2, %s1096_s21 }
  0x11   : > { %v276_v25 = vld [vmem:[%s1378_s26 + $0x8] sm:$0xff]  ;;  %v1211_v49 = vpack.c.bf16 %v322_v48, %v321_v47  ;;  %v275_v50 = vld [vmem:[%s1378_s26] sm:$0xff]  ;;  %v278_v52 = vld [vmem:[%s1378_s26 + $0x18] sm:$0xff]  ;;  %249 = vst.msk [vmem:[#allocation2 + $0x30] sm:$0xff] %vm242_vm0, %v1285_v16  ;;  %s1097_s27 = sshll.u32 %s1817_s12, 3 }
  0x12   : > { %403 = vmatprep.mubr.f32.mxu0 %v276_v25  ;;  %v292_v26 = vld [vmem:[%s1378_s26 + $0x88] sm:$0xff]  ;;  %1192 = vmatpush3.bf16.msra.mxu0 %v1191_v19  ;;  %v291_v51 = vld [vmem:[%s1378_s26 + $0x80] sm:$0xff]  ;;  %v294_v53 = vld [vmem:[%s1378_s26 + $0x98] sm:$0xff]  ;;  %250 = vst.msk [vmem:[#allocation2 + $0x38] sm:$0xff] %vm242_vm0, %v1285_v16  ;;  %s237_s4 = scalar_lea.vmem %s1809_s3, %s1097_s27 }
  0x13   : > { %1223 = vmatpush3.bf16.msra.mxu1 %v1191_v19  ;;  %1194 = vmatprep.subr.bf16.mxu0 %v1193_v20  ;;  %v277_v54 = vld [vmem:[%s1378_s26 + $0x10] sm:$0xff]  ;;  %v280_v56 = vld [vmem:[%s1378_s26 + $0x28] sm:$0xff]  ;;  %v279_v58 = vld [vmem:[%s1378_s26 + $0x20] sm:$0xff]  ;;  %251 = vst.msk [vmem:[#allocation2 + $0x40] sm:$0xff] %vm242_vm0, %v1285_v16 }
  0x14   : > { %1216 = vmatprep.subr.bf16.mxu1 %v1193_v20  ;;  %443 = vmatprep.mubr.f32.mxu1 %v292_v26  ;;  %v293_v55 = vld [vmem:[%s1378_s26 + $0x90] sm:$0xff]  ;;  %v296_v57 = vld [vmem:[%s1378_s26 + $0xa8] sm:$0xff]  ;;  %v295_v59 = vld [vmem:[%s1378_s26 + $0xa0] sm:$0xff]  ;;  %252 = vst.msk [vmem:[#allocation2 + $0x48] sm:$0xff] %vm242_vm0, %v1285_v16 }
  0x15   : > { %v282_v60 = vld [vmem:[%s1378_s26 + $0x38] sm:$0xff]  ;;  %v281_v62 = vld [vmem:[%s1378_s26 + $0x30] sm:$0xff]  ;;  %v284_v0 = vld [vmem:[%s1378_s26 + $0x48] sm:$0xff]  ;;  %253 = vst.msk [vmem:[#allocation2 + $0x50] sm:$0xff] %vm242_vm0, %v1285_v16 }
  0x16   : > { %1196 = vmatpush3.bf16.msra.mxu0 %v1195_v27  ;;  %v298_v61 = vld [vmem:[%s1378_s26 + $0xb8] sm:$0xff]  ;;  %v297_v63 = vld [vmem:[%s1378_s26 + $0xb0] sm:$0xff]  ;;  %v300_v1 = vld [vmem:[%s1378_s26 + $0xc8] sm:$0xff]  ;;  %254 = vst.msk [vmem:[#allocation2 + $0x58] sm:$0xff] %vm242_vm0, %v1285_v16 }
  0x17   : > { %1224 = vmatpush3.bf16.msra.mxu1 %v1195_v27  ;;  %1198 = vmatprep.subr.bf16.mxu0 %v1197_v28  ;;  %v283_v2 = vld [vmem:[%s1378_s26 + $0x40] sm:$0xff]  ;;  %v286_v4 = vld [vmem:[%s1378_s26 + $0x58] sm:$0xff]  ;;  %v285_v6 = vld [vmem:[%s1378_s26 + $0x50] sm:$0xff]  ;;  %255 = vst.msk [vmem:[#allocation2 + $0x60] sm:$0xff] %vm242_vm0, %v1285_v16 }
  0x18   : > { %1217 = vmatprep.subr.bf16.mxu1 %v1197_v28  ;;  %v299_v3 = vld [vmem:[%s1378_s26 + $0xc0] sm:$0xff]  ;;  %v302_v5 = vld [vmem:[%s1378_s26 + $0xd8] sm:$0xff]  ;;  %v301_v7 = vld [vmem:[%s1378_s26 + $0xd0] sm:$0xff]  ;;  %256 = vst.msk [vmem:[#allocation2 + $0x68] sm:$0xff] %vm242_vm0, %v1285_v16 }
  0x19   : > { %v288_v8 = vld [vmem:[%s1378_s26 + $0x68] sm:$0xff]  ;;  %v287_v10 = vld [vmem:[%s1378_s26 + $0x60] sm:$0xff]  ;;  %v290_v12 = vld [vmem:[%s1378_s26 + $0x78] sm:$0xff]  ;;  %257 = vst.msk [vmem:[#allocation2 + $0x70] sm:$0xff] %vm242_vm0, %v1285_v16 }
  0x1a   : > { %1200 = vmatpush3.bf16.msra.mxu0 %v1199_v33  ;;  %v304_v9 = vld [vmem:[%s1378_s26 + $0xe8] sm:$0xff]  ;;  %v303_v11 = vld [vmem:[%s1378_s26 + $0xe0] sm:$0xff]  ;;  %v306_v13 = vld [vmem:[%s1378_s26 + $0xf8] sm:$0xff]  ;;  %258 = vst.msk [vmem:[#allocation2 + $0x78] sm:$0xff] %vm242_vm0, %v1285_v16 }
  0x1b   : > { %1225 = vmatpush3.bf16.msra.mxu1 %v1199_v33  ;;  %1202 = vmatprep.subr.bf16.mxu0 %v1201_v34  ;;  %v289_v14 = vld [vmem:[%s1378_s26 + $0x70] sm:$0xff]  ;;  %v259_v19 = vld [vmem:[#allocation2] sm:$0xff]  ;;  %v260_v29 = vld [vmem:[#allocation2 + $0x8] sm:$0xff] }
  0x1c   : > { %1218 = vmatprep.subr.bf16.mxu1 %v1201_v34  ;;  %v305_v15 = vld [vmem:[%s1378_s26 + $0xf0] sm:$0xff]  ;;  %v267_v21 = vld [vmem:[#allocation2 + $0x40] sm:$0xff]  ;;  %v268_v31 = vld [vmem:[#allocation2 + $0x48] sm:$0xff]  ;;  %s1286_s26 = smov 64  }
  0x1d   : > { %v269_v41 = vld [vmem:[#allocation2 + $0x50] sm:$0xff]  ;;  %v262_v48 = vld [vmem:[#allocation2 + $0x18] sm:$0xff] }
  0x1e   : > { %1204 = vmatpush3.bf16.msra.mxu0 %v1203_v39 }
  0x1f   : > { %1226 = vmatpush3.bf16.msra.mxu1 %v1203_v39  ;;  %1206 = vmatprep.subr.bf16.mxu0 %v1205_v40  ;;  %v261_v39 = vld [vmem:[#allocation2 + $0x10] sm:$0xff]  ;;  %v272_v16 = vld [vmem:[#allocation2 + $0x68] sm:$0xff] }
  0x20   : > { %1219 = vmatprep.subr.bf16.mxu1 %v1205_v40 }
  0x22   : > { %1208 = vmatpush3.bf16.msra.mxu0 %v1207_v45 }
  0x23   : > { %1227 = vmatpush3.bf16.msra.mxu1 %v1207_v45  ;;  %1210 = vmatprep.subr.bf16.mxu0 %v1209_v46 }
  0x24   : > { %1220 = vmatprep.subr.bf16.mxu1 %v1209_v46 }
  0x26   : > { %1212 = vmatpush3.bf16.msra.mxu0 %v1211_v49 }
  0x27   : > { %1228 = vmatpush3.bf16.msra.mxu1 %v1211_v49 }
  0x29   : > { %404 = vmatmul.mubr.f32.vlgmr.msra.gmra.mrb[0].mxu0 %v275_v50 }
  0x2a   : > { %444 = vmatmul.mubr.f32.vlgmr.msra.gmra.mrb[0].mxu1 %v291_v51  ;;  %408 = vmatprep.mubr.f32.mxu0 %v278_v52 }
  0x2b   : > { %448 = vmatprep.mubr.f32.mxu1 %v294_v53  ;;  %v270_v53 = vld [vmem:[#allocation2 + $0x58] sm:$0xff] }
  0x2d   : > { %409 = vmatmul.mubr.f32.gmra.mrb[2].mxu0 %v277_v54 }
  0x2e   : > { %449 = vmatmul.mubr.f32.gmra.mrb[2].mxu1 %v293_v55  ;;  %413 = vmatprep.mubr.f32.mxu0 %v280_v56 }
  0x2f   : > { %453 = vmatprep.mubr.f32.mxu1 %v296_v57 }
  0x31   : > { %414 = vmatmul.mubr.f32.gmra.mrb[4].mxu0 %v279_v58 }
  0x32   : > { %454 = vmatmul.mubr.f32.gmra.mrb[4].mxu1 %v295_v59  ;;  %418 = vmatprep.mubr.f32.mxu0 %v282_v60 }
  0x33   : > { %458 = vmatprep.mubr.f32.mxu1 %v298_v61 }
  0x35   : > { %419 = vmatmul.mubr.f32.gmra.mrb[6].mxu0 %v281_v62 }
  0x36   : > { %459 = vmatmul.mubr.f32.gmra.mrb[6].mxu1 %v297_v63  ;;  %423 = vmatprep.mubr.f32.mxu0 %v284_v0 }
  0x37   : > { %463 = vmatprep.mubr.f32.mxu1 %v300_v1  ;;  %v263_v1 = vld [vmem:[#allocation2 + $0x20] sm:$0xff] }
  0x39   : > { %424 = vmatmul.mubr.f32.gmra.mrb[8].mxu0 %v283_v2 }
  0x3a   : > { %464 = vmatmul.mubr.f32.gmra.mrb[8].mxu1 %v299_v3  ;;  %428 = vmatprep.mubr.f32.mxu0 %v286_v4  ;;  %v271_v3 = vld [vmem:[#allocation2 + $0x60] sm:$0xff] }
  0x3b   : > { %468 = vmatprep.mubr.f32.mxu1 %v302_v5 }
  0x3d   : > { %429 = vmatmul.mubr.f32.gmra.mrb[10].mxu0 %v285_v6 }
  0x3e   : > { %469 = vmatmul.mubr.f32.gmra.mrb[10].mxu1 %v301_v7  ;;  %433 = vmatprep.mubr.f32.mxu0 %v288_v8 }
  0x3f   : > { %473 = vmatprep.mubr.f32.mxu1 %v304_v9 }
  0x41   : > { %434 = vmatmul.mubr.f32.gmra.mrb[12].mxu0 %v287_v10 }
  0x42   : > { %474 = vmatmul.mubr.f32.gmra.mrb[12].mxu1 %v303_v11  ;;  %438 = vmatprep.mubr.f32.mxu0 %v290_v12 }
  0x43   : > { %478 = vmatprep.mubr.f32.mxu1 %v306_v13 }
  0x45   : > { %439 = vmatmul.mubr.f32.gmra.mrb[14].mxu0 %v289_v14  ;;  %v264_v14 = vld [vmem:[#allocation2 + $0x28] sm:$0xff] }
  0x46   : > { %479 = vmatmul.mubr.f32.gmra.mrb[14].mxu1 %v305_v15 }
  0xfc   : > { %v1133_v17 = vpop.f32.mrb[0].mxu0 }
  0xfd   : > { %v1157_v18 = vpop.f32.mrb[0].mxu1  ;;  %v1134_v20 = vpop.f32.mrb[1].mxu0 }
  0xfe   : > { %v1158_v22 = vpop.f32.mrb[1].mxu1  ;;  %v1135_v23 = vadd.f32 %v1134_v20, %v1133_v17 }
  0xff   : > { %v1159_v24 = vadd.f32 %v1158_v22, %v1157_v18 }
 0x100   : > { %v484_v25 = vadd.f32 %v1135_v23, %v259_v19  ;;  %v1136_v27 = vpop.f32.mrb[2].mxu0 }
 0x101   : > { %v492_v26 = vadd.f32 %v1159_v24, %v267_v21  ;;  %v1160_v28 = vpop.f32.mrb[2].mxu1  ;;  %v1137_v30 = vpop.f32.mrb[3].mxu0 }
 0x102   : > { %v1161_v32 = vpop.f32.mrb[3].mxu1  ;;  %501 = vst.msk [vmem:[#allocation2] sm:$0xff] %vm242_vm0, %v484_v25  ;;  %v1138_v33 = vadd.f32 %v1137_v30, %v1136_v27  ;;  %v265_v27 = vld [vmem:[#allocation2 + $0x30] sm:$0xff] }
 0x103   : > { %509 = vst.msk [vmem:[#allocation2 + $0x40] sm:$0xff] %vm242_vm0, %v492_v26  ;;  %v1162_v34 = vadd.f32 %v1161_v32, %v1160_v28 }
 0x104   : > { %v485_v35 = vadd.f32 %v1138_v33, %v260_v29  ;;  %v1139_v37 = vpop.f32.mrb[4].mxu0  ;;  %v273_v29 = vld [vmem:[#allocation2 + $0x70] sm:$0xff] }
 0x105   : > { %v493_v36 = vadd.f32 %v1162_v34, %v268_v31  ;;  %v1163_v38 = vpop.f32.mrb[4].mxu1  ;;  %v1140_v40 = vpop.f32.mrb[5].mxu0 }
 0x106   : > { %v1164_v42 = vpop.f32.mrb[5].mxu1  ;;  %502 = vst.msk [vmem:[#allocation2 + $0x8] sm:$0xff] %vm242_vm0, %v485_v35  ;;  %v1141_v43 = vadd.f32 %v1140_v40, %v1139_v37  ;;  %v266_v40 = vld [vmem:[#allocation2 + $0x38] sm:$0xff] }
 0x107   : > { %510 = vst.msk [vmem:[#allocation2 + $0x48] sm:$0xff] %vm242_vm0, %v493_v36  ;;  %v1165_v44 = vadd.f32 %v1164_v42, %v1163_v38  ;;  %v274_v42 = vld [vmem:[#allocation2 + $0x78] sm:$0xff] }
 0x108   : > { %v486_v45 = vadd.f32 %v1141_v43, %v261_v39  ;;  %v1142_v47 = vpop.f32.mrb[6].mxu0 }
 0x109   : > { %v494_v46 = vadd.f32 %v1165_v44, %v269_v41  ;;  %v1166_v49 = vpop.f32.mrb[6].mxu1  ;;  %v520_v50 = vld [vmem:[#allocation2] sm:$0xff]  ;;  %v1143_v52 = vpop.f32.mrb[7].mxu0 }
 0x10a   : > { %v528_v51 = vld [vmem:[#allocation2 + $0x40] sm:$0xff]  ;;  %v1167_v54 = vpop.f32.mrb[7].mxu1  ;;  %503 = vst.msk [vmem:[#allocation2 + $0x10] sm:$0xff] %vm242_vm0, %v486_v45  ;;  %v1487_v55 = vmax.f32 %v520_v50, 0.0  ;;  %v1144_v57 = vadd.f32 %v1143_v52, %v1142_v47 }
 0x10b   : > { %511 = vst.msk [vmem:[#allocation2 + $0x50] sm:$0xff] %vm242_vm0, %v494_v46  ;;  %v1490_v56 = vmax.f32 %v528_v51, 0.0  ;;  %v1168_v58 = vadd.f32 %v1167_v54, %v1166_v49 }
 0x10c   : > { %v745_v59 = vmul.f32 %v1487_v55, %v1487_v55  ;;  %v487_v60 = vadd.f32 %v1144_v57, %v262_v48  ;;  %v1145_v62 = vpop.f32.mrb[8].mxu0 }
 0x10d   : > { %v495_v61 = vadd.f32 %v1168_v58, %v270_v53  ;;  %v1169_v63 = vpop.f32.mrb[8].mxu1  ;;  %v521_v0 = vld [vmem:[#allocation2 + $0x8] sm:$0xff]  ;;  %v1146_v2 = vpop.f32.mrb[9].mxu0  ;;  %v753_v5 = vmul.f32 %v1490_v56, %v1490_v56 }
 0x10e   : > { %v1170_v4 = vpop.f32.mrb[9].mxu1  ;;  %875 = vrot.lane.b32.xlu1 %v745_v59, %s1286_s26  ;;  %781 = vrot.lane.b32.xlu0 %v745_v59, %s1287_s19  ;;  %504 = vst.msk [vmem:[#allocation2 + $0x18] sm:$0xff] %vm242_vm0, %v487_v60  ;;  %v1499_v6 = vmax.f32 %v521_v0, 0.0  ;;  %v1147_v7 = vadd.f32 %v1146_v2, %v1145_v62  ;;  %v529_v9 = vld [vmem:[#allocation2 + $0x48] sm:$0xff] }
 0x10f   : > { %512 = vst.msk [vmem:[#allocation2 + $0x58] sm:$0xff] %vm242_vm0, %v495_v61  ;;  %v1171_v8 = vadd.f32 %v1170_v4, %v1169_v63  ;;  %v1506_v19 = vmax.f32 %v529_v9, 0.0 }
 0x110   : > { %v488_v10 = vadd.f32 %v1147_v7, %v263_v1  ;;  %v1148_v11 = vpop.f32.mrb[10].mxu0  ;;  %v746_v18 = vmul.f32 %v1499_v6, %v1499_v6 }
 0x111   : > { %v496_v12 = vadd.f32 %v1171_v8, %v271_v3  ;;  %v1172_v13 = vpop.f32.mrb[10].mxu1  ;;  %v1149_v15 = vpop.f32.mrb[11].mxu0  ;;  %v522_v22 = vld [vmem:[#allocation2 + $0x10] sm:$0xff]  ;;  %v754_v31 = vmul.f32 %v1506_v19, %v1506_v19 }
 0x112   : > { %v1173_v17 = vpop.f32.mrb[11].mxu1  ;;  %891 = vrot.lane.b32.xlu1 %v753_v5, %s1286_s26  ;;  %797 = vrot.lane.b32.xlu0 %v753_v5, %s1287_s19  ;;  %505 = vst.msk [vmem:[#allocation2 + $0x20] sm:$0xff] %vm242_vm0, %v488_v10  ;;  %v1150_v20 = vadd.f32 %v1149_v15, %v1148_v11  ;;  %v1514_v32 = vmax.f32 %v522_v22, 0.0  ;;  %v530_v35 = vld [vmem:[#allocation2 + $0x50] sm:$0xff] }
 0x113   : > { %513 = vst.msk [vmem:[#allocation2 + $0x60] sm:$0xff] %vm242_vm0, %v496_v12  ;;  %v1174_v21 = vadd.f32 %v1173_v17, %v1172_v13  ;;  %v1522_v45 = vmax.f32 %v530_v35, 0.0 }
 0x114   : > { %v489_v23 = vadd.f32 %v1150_v20, %v264_v14  ;;  %v1151_v24 = vpop.f32.mrb[12].mxu0  ;;  %v747_v44 = vmul.f32 %v1514_v32, %v1514_v32 }
 0x115   : > { %v497_v25 = vadd.f32 %v1174_v21, %v272_v16  ;;  %v1175_v26 = vpop.f32.mrb[12].mxu1  ;;  %v1152_v28 = vpop.f32.mrb[13].mxu0  ;;  %v523_v48 = vld [vmem:[#allocation2 + $0x18] sm:$0xff]  ;;  %v755_v51 = vmul.f32 %v1522_v45, %v1522_v45 }
 0x116   : > { %v1176_v30 = vpop.f32.mrb[13].mxu1  ;;  %877 = vrot.lane.b32.xlu1 %v746_v18, %s1286_s26  ;;  %783 = vrot.lane.b32.xlu0 %v746_v18, %s1287_s19  ;;  %506 = vst.msk [vmem:[#allocation2 + $0x28] sm:$0xff] %vm242_vm0, %v489_v23  ;;  %v1153_v33 = vadd.f32 %v1152_v28, %v1151_v24  ;;  %v1530_v52 = vmax.f32 %v523_v48, 0.0  ;;  %v531_v53 = vld [vmem:[#allocation2 + $0x58] sm:$0xff] }
 0x117   : > { %514 = vst.msk [vmem:[#allocation2 + $0x68] sm:$0xff] %vm242_vm0, %v497_v25  ;;  %v1177_v34 = vadd.f32 %v1176_v30, %v1175_v26  ;;  %v1538_v57 = vmax.f32 %v531_v53, 0.0 }
 0x118   : > { %v490_v36 = vadd.f32 %v1153_v33, %v265_v27  ;;  %v1154_v37 = vpop.f32.mrb[14].mxu0  ;;  %v748_v54 = vmul.f32 %v1530_v52, %v1530_v52 }
 0x119   : > { %v498_v38 = vadd.f32 %v1177_v34, %v273_v29  ;;  %v1178_v39 = vpop.f32.mrb[14].mxu1  ;;  %v1155_v41 = vpop.f32.mrb[15].mxu0  ;;  %v524_v58 = vld [vmem:[#allocation2 + $0x20] sm:$0xff]  ;;  %v756_v59 = vmul.f32 %v1538_v57, %v1538_v57 }
 0x11a   : > { %v1179_v43 = vpop.f32.mrb[15].mxu1  ;;  %893 = vrot.lane.b32.xlu1 %v754_v31, %s1286_s26  ;;  %799 = vrot.lane.b32.xlu0 %v754_v31, %s1287_s19  ;;  %507 = vst.msk [vmem:[#allocation2 + $0x30] sm:$0xff] %vm242_vm0, %v490_v36  ;;  %v1156_v46 = vadd.f32 %v1155_v41, %v1154_v37  ;;  %v1544_v60 = vmax.f32 %v524_v58, 0.0  ;;  %v532_v7 = vld [vmem:[#allocation2 + $0x60] sm:$0xff] }
 0x11b   : > { %515 = vst.msk [vmem:[#allocation2 + $0x70] sm:$0xff] %vm242_vm0, %v498_v38  ;;  %v1180_v47 = vadd.f32 %v1179_v43, %v1178_v39  ;;  %v1568_v9 = vmax.f32 %v532_v7, 0.0 }
 0x11c   : > { %v491_v49 = vadd.f32 %v1156_v46, %v266_v40  ;;  %v749_v62 = vmul.f32 %v1544_v60, %v1544_v60 }
 0x11d   : > { %v499_v50 = vadd.f32 %v1180_v47, %v274_v42  ;;  %v525_v61 = vld [vmem:[#allocation2 + $0x28] sm:$0xff]  ;;  %v757_v11 = vmul.f32 %v1568_v9, %v1568_v9 }
 0x11e   : > { %879 = vrot.lane.b32.xlu1 %v747_v44, %s1286_s26  ;;  %785 = vrot.lane.b32.xlu0 %v747_v44, %s1287_s19  ;;  %508 = vst.msk [vmem:[#allocation2 + $0x38] sm:$0xff] %vm242_vm0, %v491_v49  ;;  %v1550_v63 = vmax.f32 %v525_v61, 0.0  ;;  %v533_v10 = vld [vmem:[#allocation2 + $0x68] sm:$0xff] }
 0x11f   : > { %516 = vst.msk [vmem:[#allocation2 + $0x78] sm:$0xff] %vm242_vm0, %v499_v50  ;;  %v1574_v12 = vmax.f32 %v533_v10, 0.0 }
 0x120   : > { %v750_v1 = vmul.f32 %v1550_v63, %v1550_v63 }
 0x121   : > { %v526_v0 = vld [vmem:[#allocation2 + $0x30] sm:$0xff]  ;;  %v758_v14 = vmul.f32 %v1574_v12, %v1574_v12 }
 0x122   : > { %895 = vrot.lane.b32.xlu1 %v755_v51, %s1286_s26  ;;  %801 = vrot.lane.b32.xlu0 %v755_v51, %s1287_s19  ;;  %v1556_v2 = vmax.f32 %v526_v0, 0.0  ;;  %v534_v13 = vld [vmem:[#allocation2 + $0x70] sm:$0xff] }
 0x123   : > { %v1580_v15 = vmax.f32 %v534_v13, 0.0 }
 0x124   : > { %v751_v4 = vmul.f32 %v1556_v2, %v1556_v2 }
 0x125   : > { %v527_v3 = vld [vmem:[#allocation2 + $0x38] sm:$0xff]  ;;  %v759_v17 = vmul.f32 %v1580_v15, %v1580_v15 }
 0x126   : > { %881 = vrot.lane.b32.xlu1 %v748_v54, %s1286_s26  ;;  %787 = vrot.lane.b32.xlu0 %v748_v54, %s1287_s19  ;;  %v1562_v5 = vmax.f32 %v527_v3, 0.0  ;;  %v535_v16 = vld [vmem:[#allocation2 + $0x78] sm:$0xff] }
 0x127   : > { %v1586_v18 = vmax.f32 %v535_v16, 0.0 }
 0x128   : > { %v752_v8 = vmul.f32 %v1562_v5, %v1562_v5 }
 0x129   : > { %v760_v20 = vmul.f32 %v1586_v18, %v1586_v18 }
 0x12a   : > { %897 = vrot.lane.b32.xlu1 %v756_v59, %s1286_s26  ;;  %803 = vrot.lane.b32.xlu0 %v756_v59, %s1287_s19 }
 0x12e   : > { %883 = vrot.lane.b32.xlu1 %v749_v62, %s1286_s26  ;;  %789 = vrot.lane.b32.xlu0 %v749_v62, %s1287_s19 }
 0x132   : > { %885 = vrot.lane.b32.xlu1 %v750_v1, %s1286_s26  ;;  %791 = vrot.lane.b32.xlu0 %v750_v1, %s1287_s19 }
 0x136   : > { %887 = vrot.lane.b32.xlu1 %v751_v4, %s1286_s26  ;;  %793 = vrot.lane.b32.xlu0 %v751_v4, %s1287_s19 }
 0x13a   : > { %889 = vrot.lane.b32.xlu1 %v752_v8, %s1286_s26  ;;  %795 = vrot.lane.b32.xlu0 %v752_v8, %s1287_s19 }
 0x13e   : > { %899 = vrot.lane.b32.xlu1 %v757_v11, %s1286_s26  ;;  %805 = vrot.lane.b32.xlu0 %v757_v11, %s1287_s19 }
 0x142   : > { %901 = vrot.lane.b32.xlu1 %v758_v14, %s1286_s26  ;;  %807 = vrot.lane.b32.xlu0 %v758_v14, %s1287_s19 }
 0x146   : > { %903 = vrot.lane.b32.xlu1 %v759_v17, %s1286_s26  ;;  %809 = vrot.lane.b32.xlu0 %v759_v17, %s1287_s19 }
 0x14a   : > { %905 = vrot.lane.b32.xlu1 %v760_v20, %s1286_s26  ;;  %811 = vrot.lane.b32.xlu0 %v760_v20, %s1287_s19 }
 0x14e   : > { %570 = vrot.lane.b32.xlu1 %v1499_v6, %s1288_s20  ;;  %568 = vrot.lane.b32.xlu0 %v1487_v55, %s1288_s20 }
 0x152   : > { %574 = vrot.lane.b32.xlu1 %v1530_v52, %s1288_s20  ;;  %572 = vrot.lane.b32.xlu0 %v1514_v32, %s1288_s20 }
 0x156   : > { %578 = vrot.lane.b32.xlu1 %v1550_v63, %s1288_s20  ;;  %576 = vrot.lane.b32.xlu0 %v1544_v60, %s1288_s20 }
 0x15a   : > { %582 = vrot.lane.b32.xlu1 %v1562_v5, %s1288_s20  ;;  %580 = vrot.lane.b32.xlu0 %v1556_v2, %s1288_s20 }
 0x15e   : > { %586 = vrot.lane.b32.xlu1 %v1506_v19, %s1288_s20  ;;  %584 = vrot.lane.b32.xlu0 %v1490_v56, %s1288_s20 }
 0x162   : > { %590 = vrot.lane.b32.xlu1 %v1538_v57, %s1288_s20  ;;  %588 = vrot.lane.b32.xlu0 %v1522_v45, %s1288_s20 }
 0x166   : > { %594 = vrot.lane.b32.xlu1 %v1574_v12, %s1288_s20  ;;  %592 = vrot.lane.b32.xlu0 %v1568_v9, %s1288_s20 }
 0x180   : > { %v876_v21 = vpop.permute.xlu1 %875  ;;  %v782_v22 = vpop.permute.xlu0 %781 }
 0x181   : > { %v923_v42 = vsel %vm616_vm1, %v876_v21, 0.0  ;;  %v829_v43 = vsel %vm616_vm1, %v782_v22, 0.0 }
 0x184   : > { %v892_v23 = vpop.permute.xlu1 %891  ;;  %v798_v24 = vpop.permute.xlu0 %797 }
 0x188   : > { %v878_v25 = vpop.permute.xlu1 %877  ;;  %v784_v26 = vpop.permute.xlu0 %783 }
 0x189   : > { %v924_v38 = vsel %vm616_vm1, %v878_v25, 0.0  ;;  %v830_v39 = vsel %vm616_vm1, %v784_v26, 0.0 }
 0x18a   : > { %v925_v47 = vadd.f32 %v924_v38, %v923_v42  ;;  %v831_v48 = vadd.f32 %v830_v39, %v829_v43 }
 0x18c   : > { %v894_v27 = vpop.permute.xlu1 %893  ;;  %v800_v28 = vpop.permute.xlu0 %799 }
 0x18d   : > { %v940_v42 = vsel %vm616_vm1, %v894_v27, 0.0  ;;  %v846_v43 = vsel %vm616_vm1, %v800_v28, 0.0 }
 0x190   : > { %v880_v29 = vpop.permute.xlu1 %879  ;;  %v786_v30 = vpop.permute.xlu0 %785 }
 0x191   : > { %v926_v44 = vsel %vm616_vm1, %v880_v29, 0.0  ;;  %v832_v46 = vsel %vm616_vm1, %v786_v30, 0.0 }
 0x192   : > { %v927_v51 = vadd.f32 %v926_v44, %v925_v47  ;;  %v833_v53 = vadd.f32 %v832_v46, %v831_v48 }
 0x194   : > { %v896_v31 = vpop.permute.xlu1 %895  ;;  %v802_v33 = vpop.permute.xlu0 %801 }
 0x195   : > { %v942_v47 = vsel %vm616_vm1, %v896_v31, 0.0  ;;  %v848_v48 = vsel %vm616_vm1, %v802_v33, 0.0 }
 0x198   : > { %v882_v34 = vpop.permute.xlu1 %881  ;;  %v788_v35 = vpop.permute.xlu0 %787 }
 0x199   : > { %v928_v49 = vsel %vm616_vm1, %v882_v34, 0.0  ;;  %v834_v50 = vsel %vm616_vm1, %v788_v35, 0.0  ;;  %v938_v34 = vsel %vm616_vm1, %v892_v23, 0.0  ;;  %v844_v35 = vsel %vm616_vm1, %v798_v24, 0.0 }
 0x19a   : > { %v929_v62 = vadd.f32 %v928_v49, %v927_v51  ;;  %v835_v0 = vadd.f32 %v834_v50, %v833_v53 }
 0x19c   : > { %v898_v36 = vpop.permute.xlu1 %897  ;;  %v804_v37 = vpop.permute.xlu0 %803 }
 0x19d   : > { %v944_v24 = vsel %vm616_vm1, %v898_v36, 0.0  ;;  %v850_v53 = vsel %vm616_vm1, %v804_v37, 0.0 }
 0x1a0   : > { %v884_v40 = vpop.permute.xlu1 %883  ;;  %v790_v41 = vpop.permute.xlu0 %789 }
 0x1a1   : > { %v930_v59 = vsel %vm616_vm1, %v884_v40, 0.0  ;;  %v836_v61 = vsel %vm616_vm1, %v790_v41, 0.0 }
 0x1a2   : > { %v931_v4 = vadd.f32 %v930_v59, %v929_v62  ;;  %v837_v7 = vadd.f32 %v836_v61, %v835_v0 }
 0x1a4   : > { %v886_v54 = vpop.permute.xlu1 %885  ;;  %v792_v58 = vpop.permute.xlu0 %791 }
 0x1a5   : > { %v932_v1 = vsel %vm616_vm1, %v886_v54, 0.0  ;;  %v838_v3 = vsel %vm616_vm1, %v792_v58, 0.0 }
 0x1a6   : > { %v933_v14 = vadd.f32 %v932_v1, %v931_v4  ;;  %v839_v16 = vadd.f32 %v838_v3, %v837_v7 }
 0x1a8   : > { %v888_v8 = vpop.permute.xlu1 %887  ;;  %v794_v10 = vpop.permute.xlu0 %793 }
 0x1a9   : > { %v934_v11 = vsel %vm616_vm1, %v888_v8, 0.0  ;;  %v840_v13 = vsel %vm616_vm1, %v794_v10, 0.0 }
 0x1aa   : > { %v935_v17 = vadd.f32 %v934_v11, %v933_v14  ;;  %v841_v20 = vadd.f32 %v840_v13, %v839_v16 }
 0x1ac   : > { %v890_v21 = vpop.permute.xlu1 %889  ;;  %v796_v22 = vpop.permute.xlu0 %795 }
 0x1ad   : > { %v936_v25 = vsel %vm616_vm1, %v890_v21, 0.0  ;;  %v842_v26 = vsel %vm616_vm1, %v796_v22, 0.0 }
 0x1ae   : > { %v937_v29 = vadd.f32 %v936_v25, %v935_v17  ;;  %v843_v30 = vadd.f32 %v842_v26, %v841_v20 }
 0x1b0   : > { %v939_v38 = vadd.f32 %v938_v34, %v937_v29  ;;  %v845_v39 = vadd.f32 %v844_v35, %v843_v30  ;;  %v900_v40 = vpop.permute.xlu1 %899  ;;  %v806_v41 = vpop.permute.xlu0 %805 }
 0x1b1   : > { %v946_v27 = vsel %vm616_vm1, %v900_v40, 0.0  ;;  %v852_v28 = vsel %vm616_vm1, %v806_v41, 0.0 }
 0x1b2   : > { %v941_v44 = vadd.f32 %v940_v42, %v939_v38  ;;  %v847_v46 = vadd.f32 %v846_v43, %v845_v39 }
 0x1b4   : > { %v943_v49 = vadd.f32 %v942_v47, %v941_v44  ;;  %v849_v50 = vadd.f32 %v848_v48, %v847_v46  ;;  %v902_v51 = vpop.permute.xlu1 %901  ;;  %v808_v23 = vpop.permute.xlu0 %807 }
 0x1b5   : > { %v948_v33 = vsel %vm616_vm1, %v902_v51, 0.0  ;;  %v854_v0 = vsel %vm616_vm1, %v808_v23, 0.0 }
 0x1b6   : > { %v945_v54 = vadd.f32 %v944_v24, %v943_v49  ;;  %v851_v58 = vadd.f32 %v850_v53, %v849_v50 }
 0x1b8   : > { %v947_v59 = vadd.f32 %v946_v27, %v945_v54  ;;  %v853_v61 = vadd.f32 %v852_v28, %v851_v58  ;;  %v904_v62 = vpop.permute.xlu1 %903  ;;  %v810_v31 = vpop.permute.xlu0 %809 }
 0x1b9   : > { %v950_v36 = vsel %vm616_vm1, %v904_v62, 0.0  ;;  %v856_v37 = vsel %vm616_vm1, %v810_v31, 0.0 }
 0x1ba   : > { %v949_v1 = vadd.f32 %v948_v33, %v947_v59  ;;  %v855_v3 = vadd.f32 %v854_v0, %v853_v61 }
 0x1bc   : > { %v951_v4 = vadd.f32 %v950_v36, %v949_v1  ;;  %v857_v7 = vadd.f32 %v856_v37, %v855_v3  ;;  %v906_v8 = vpop.permute.xlu1 %905  ;;  %v812_v10 = vpop.permute.xlu0 %811 }
 0x1bd   : > { %v952_v11 = vsel %vm616_vm1, %v906_v8, 0.0  ;;  %v858_v13 = vsel %vm616_vm1, %v812_v10, 0.0 }
 0x1be   : > { %v953_v14 = vadd.f32 %v952_v11, %v951_v4  ;;  %v859_v16 = vadd.f32 %v858_v13, %v857_v7 }
 0x1c0   : > { %954 = vadd.xlane.f32.xlu1 %v953_v14  ;;  %860 = vadd.xlane.f32.xlu0 %v859_v16  ;;  %v571_v17 = vpop.permute.xlu1 %570  ;;  %v569_v20 = vpop.permute.xlu0 %568 }
 0x1c1   : > { %v618_v26 = vsel %vm616_vm1, %v1499_v6, %v571_v17  ;;  %v617_v35 = vsel %vm616_vm1, %v1487_v55, %v569_v20 }
 0x1c4   : > { %v575_v21 = vpop.permute.xlu1 %574  ;;  %v573_v22 = vpop.permute.xlu0 %572 }
 0x1c5   : > { %v620_v34 = vsel %vm616_vm1, %v1530_v52, %v575_v21  ;;  %v619_v41 = vsel %vm616_vm1, %v1514_v32, %v573_v22 }
 0x1c8   : > { %v579_v25 = vpop.permute.xlu1 %578  ;;  %v577_v29 = vpop.permute.xlu0 %576 }
 0x1c9   : > { %v622_v39 = vsel %vm616_vm1, %v1550_v63, %v579_v25  ;;  %v621_v43 = vsel %vm616_vm1, %v1544_v60, %v577_v29 }
 0x1cc   : > { %v583_v30 = vpop.permute.xlu1 %582  ;;  %v581_v38 = vpop.permute.xlu0 %580 }
 0x1cd   : > { %v624_v42 = vsel %vm616_vm1, %v1562_v5, %v583_v30  ;;  %v623_v48 = vsel %vm616_vm1, %v1556_v2, %v581_v38 }
 0x1d0   : > { %v587_v40 = vpop.permute.xlu1 %586  ;;  %v585_v44 = vpop.permute.xlu0 %584 }
 0x1d1   : > { %598 = vrot.lane.b32.xlu1 %v1586_v18, %s1288_s20  ;;  %v626_v47 = vsel %vm616_vm1, %v1506_v19, %v587_v40  ;;  %v625_v23 = vsel %vm616_vm1, %v1490_v56, %v585_v44 }
 0x1d4   : > { %v591_v46 = vpop.permute.xlu1 %590  ;;  %v589_v49 = vpop.permute.xlu0 %588 }
 0x1d5   : > { %651 = vrot.lane.b32.xlu1 %v618_v26, %s1288_s20  ;;  %v628_v50 = vsel %vm616_vm1, %v1538_v57, %v591_v46  ;;  %v627_v53 = vsel %vm616_vm1, %v1522_v45, %v589_v49 }
 0x1d6   : > { %596 = vrot.lane.b32.xlu0 %v1580_v15, %s1288_s20 }
 0x1d8   : > { %v595_v51 = vpop.permute.xlu1 %594  ;;  %v593_v54 = vpop.permute.xlu0 %592 }
 0x1d9   : > { %655 = vrot.lane.b32.xlu1 %v620_v34, %s1288_s20  ;;  %v630_v24 = vsel %vm616_vm1, %v1574_v12, %v595_v51  ;;  %v629_v58 = vsel %vm616_vm1, %v1568_v9, %v593_v54 }
 0x1da   : > { %649 = vrot.lane.b32.xlu0 %v617_v35, %s1288_s20 }
 0x1dd   : > { %659 = vrot.lane.b32.xlu1 %v622_v39, %s1288_s20 }
 0x1de   : > { %653 = vrot.lane.b32.xlu0 %v619_v41, %s1288_s20 }
 0x1e1   : > { %663 = vrot.lane.b32.xlu1 %v624_v42, %s1288_s20 }
 0x1e2   : > { %657 = vrot.lane.b32.xlu0 %v621_v43, %s1288_s20 }
 0x1e5   : > { %667 = vrot.lane.b32.xlu1 %v626_v47, %s1288_s20 }
 0x1e6   : > { %661 = vrot.lane.b32.xlu0 %v623_v48, %s1288_s20 }
 0x1e9   : > { %671 = vrot.lane.b32.xlu1 %v628_v50, %s1288_s20 }
 0x1ea   : > { %665 = vrot.lane.b32.xlu0 %v625_v23, %s1288_s20 }
 0x1ed   : > { %675 = vrot.lane.b32.xlu1 %v630_v24, %s1288_s20 }
 0x1ee   : > { %669 = vrot.lane.b32.xlu0 %v627_v53, %s1288_s20 }
 0x1f2   : > { %673 = vrot.lane.b32.xlu0 %v629_v58, %s1288_s20 }
 0x24d   : > { %v955_v27 = vpop.xlane.xlu1 %954  ;;  %v861_v28 = vpop.xlane.xlu0 %860 }
 0x24e   : > { %v956_v59 = vrot.slane %v955_v27, 4  ;;  %v862_v61 = vrot.slane %v861_v28, 4 }
 0x250   : > { %v957_v62 = vadd.f32 %v956_v59, %v955_v27  ;;  %v863_v31 = vadd.f32 %v862_v61, %v861_v28 }
 0x251   : > { %v599_v33 = vpop.permute.xlu1 %598  ;;  %v597_v0 = vpop.permute.xlu0 %596 }
 0x252   : > { %v958_v1 = vrot.slane %v957_v62, 2  ;;  %v864_v3 = vrot.slane %v863_v31, 2  ;;  %v632_v36 = vsel %vm616_vm1, %v1586_v18, %v599_v33  ;;  %v631_v37 = vsel %vm616_vm1, %v1580_v15, %v597_v0 }
 0x253   : > { %679 = vrot.lane.b32.xlu1 %v632_v36, %s1288_s20  ;;  %677 = vrot.lane.b32.xlu0 %v631_v37, %s1288_s20 }
 0x254   : > { %v865_v4 = vadd.f32 %v864_v3, %v863_v31  ;;  %v959_v7 = vadd.f32 %v958_v1, %v957_v62 }
 0x255   : > { %v652_v8 = vpop.permute.xlu1 %651  ;;  %v650_v10 = vpop.permute.xlu0 %649 }
 0x256   : > { %v698_v11 = vadd.f32 %v652_v8, %v1499_v6  ;;  %v697_v13 = vadd.f32 %v650_v10, %v1487_v55  ;;  %v866_v14 = vrot.slane %v865_v4, 1  ;;  %v960_v16 = vrot.slane %v959_v7, 1 }
 0x258   : > { %v714_v17 = vsel %vm616_vm1, %v1499_v6, %v698_v11  ;;  %v713_v20 = vsel %vm616_vm1, %v1487_v55, %v697_v13  ;;  %v867_v21 = vadd.f32 %v866_v14, %v865_v4  ;;  %v961_v22 = vadd.f32 %v960_v16, %v959_v7 }
 0x259   : > { %730 = vst.msk [vmem:[%s1710_s25 + $0x8] sm:$0xff] %vm242_vm0, %v714_v17  ;;  %729 = vst.msk [vmem:[%s1710_s25] sm:$0xff] %vm242_vm0, %v713_v20  ;;  %v656_v25 = vpop.permute.xlu1 %655  ;;  %v654_v26 = vpop.permute.xlu0 %653 }
 0x25a   : > { %v700_v29 = vadd.f32 %v656_v25, %v1530_v52  ;;  %v699_v30 = vadd.f32 %v654_v26, %v1514_v32  ;;  %1229 = vpush %v867_v21 }
 0x25b   : > { %1231 = vpush %v961_v22 }
 0x25c   : > { %v716_v6 = vsel %vm616_vm1, %v1530_v52, %v700_v29  ;;  %v715_v55 = vsel %vm616_vm1, %v1514_v32, %v699_v30 }
 0x25d   : > { %732 = vst.msk [vmem:[%s1710_s25 + $0x18] sm:$0xff] %vm242_vm0, %v716_v6  ;;  %731 = vst.msk [vmem:[%s1710_s25 + $0x10] sm:$0xff] %vm242_vm0, %v715_v55  ;;  %v660_v34 = vpop.permute.xlu1 %659  ;;  %v658_v35 = vpop.permute.xlu0 %657 }
 0x25e   : > { %v702_v38 = vadd.f32 %v660_v34, %v1550_v63  ;;  %v701_v39 = vadd.f32 %v658_v35, %v1544_v60 }
 0x260   : > { %v718_v40 = vsel %vm616_vm1, %v1550_v63, %v702_v38  ;;  %v717_v52 = vsel %vm616_vm1, %v1544_v60, %v701_v39 }
 0x261   : > { %734 = vst.msk [vmem:[%s1710_s25 + $0x28] sm:$0xff] %vm242_vm0, %v718_v40  ;;  %733 = vst.msk [vmem:[%s1710_s25 + $0x20] sm:$0xff] %vm242_vm0, %v717_v52  ;;  %v664_v32 = vpop.permute.xlu1 %663  ;;  %v662_v41 = vpop.permute.xlu0 %661 }
 0x262   : > { %v704_v42 = vadd.f32 %v664_v32, %v1562_v5  ;;  %v703_v43 = vadd.f32 %v662_v41, %v1556_v2 }
 0x264   : > { %v720_v44 = vsel %vm616_vm1, %v1562_v5, %v704_v42  ;;  %v719_v63 = vsel %vm616_vm1, %v1556_v2, %v703_v43 }
 0x265   : > { %736 = vst.msk [vmem:[%s1710_s25 + $0x38] sm:$0xff] %vm242_vm0, %v720_v44  ;;  %735 = vst.msk [vmem:[%s1710_s25 + $0x30] sm:$0xff] %vm242_vm0, %v719_v63  ;;  %v668_v60 = vpop.permute.xlu1 %667  ;;  %v666_v46 = vpop.permute.xlu0 %665 }
 0x266   : > { %v706_v47 = vadd.f32 %v668_v60, %v1506_v19  ;;  %v705_v48 = vadd.f32 %v666_v46, %v1490_v56 }
 0x268   : > { %v722_v49 = vsel %vm616_vm1, %v1506_v19, %v706_v47  ;;  %v721_v5 = vsel %vm616_vm1, %v1490_v56, %v705_v48 }
 0x269   : > { %738 = vst.msk [vmem:[%s1710_s25 + $0x48] sm:$0xff] %vm242_vm0, %v722_v49  ;;  %737 = vst.msk [vmem:[%s1710_s25 + $0x40] sm:$0xff] %vm242_vm0, %v721_v5  ;;  %v672_v2 = vpop.permute.xlu1 %671  ;;  %v670_v50 = vpop.permute.xlu0 %669 }
 0x26a   : > { %v708_v51 = vadd.f32 %v672_v2, %v1538_v57  ;;  %v707_v23 = vadd.f32 %v670_v50, %v1522_v45 }
 0x26c   : > { %v724_v24 = vsel %vm616_vm1, %v1538_v57, %v708_v51  ;;  %v723_v19 = vsel %vm616_vm1, %v1522_v45, %v707_v23  ;;  %v761_v45 = vlaneseq }
 0x26d   : > { %740 = vst.msk [vmem:[%s1710_s25 + $0x58] sm:$0xff] %vm242_vm0, %v724_v24  ;;  %739 = vst.msk [vmem:[%s1710_s25 + $0x50] sm:$0xff] %vm242_vm0, %v723_v19  ;;  %v676_v56 = vpop.permute.xlu1 %675  ;;  %v674_v53 = vpop.permute.xlu0 %673 }
 0x26e   : > { %v710_v54 = vadd.f32 %v676_v56, %v1574_v12  ;;  %v709_v58 = vadd.f32 %v674_v53, %v1568_v9  ;;  %v762_v28 = vshrl.u32 %v761_v45, 7  ;;  %v764_v59 = vand.u32 127, %v761_v45 }
 0x270   : > { %v726_v27 = vsel %vm616_vm1, %v1574_v12, %v710_v54  ;;  %v725_v57 = vsel %vm616_vm1, %v1568_v9, %v709_v58  ;;  %vm869_vm2 = vcmp.eq.s32.totalorder %v762_v28, 0  ;;  %vm870_vm3 = vcmp.eq.s32.totalorder %v764_v59, 0 }
 0x271   : > { %742 = vst.msk [vmem:[%s1710_s25 + $0x68] sm:$0xff] %vm242_vm0, %v726_v27  ;;  %741 = vst.msk [vmem:[%s1710_s25 + $0x60] sm:$0xff] %vm242_vm0, %v725_v57  ;;  %vm963_vm4 = vcmp.eq.s32.totalorder %v764_v59, 1 }
 0x272   : > { %vm871_vm5 = vmand %vm869_vm2, %vm870_vm3 }
 0x273   : > { %vm964_vm6 = vmand %vm869_vm2, %vm963_vm4 }
 0x28b   : > { %s1230_s22 = spop %1229 }
 0x28c   : > { %v872_v12 = vstv %s1230_s22  ;;  %s1232_s28 = spop %1231 }
 0x28d   : > { %v873_v9 = vsel %vm871_vm5, %v872_v12, 0.0  ;;  %v965_v61 = vstv %s1232_s28 }
 0x28e   : > { %v966_v62 = vsel %vm964_vm6, %v965_v61, 0.0 }
 0x28f   : > { %v967_v31 = vadd.f32 %v966_v62, %v873_v9 }
 0x291   : > { %968 = vst [vmem:[%s237_s4] sm:$0xff] %v967_v31 }
 0x2c5   : > { %v680_v33 = vpop.permute.xlu1 %679  ;;  %v678_v0 = vpop.permute.xlu0 %677 }
 0x2c6   : > { %v712_v1 = vadd.f32 %v680_v33, %v1586_v18  ;;  %v711_v3 = vadd.f32 %v678_v0, %v1580_v15 }
 0x2c8   : > { %v728_v36 = vsel %vm616_vm1, %v1586_v18, %v712_v1  ;;  %v727_v37 = vsel %vm616_vm1, %v1580_v15, %v711_v3 }
 0x2c9   : > { %744 = vst.msk [vmem:[%s1710_s25 + $0x78] sm:$0xff] %vm242_vm0, %v728_v36  ;;  %743 = vst.msk [vmem:[%s1710_s25 + $0x70] sm:$0xff] %vm242_vm0, %v727_v37 }
 0x2ca PF: > { %s14_s14 = sadd.s32 1, %s1283_s14   ;;  %s1810_s12 = smov %s1279_s13 }
 0x2cb   : > { %p11_p6 = scmp.ge.s32.totalorder %s14_s14, 4   ;;  %s1811_s13 = smov %s1813_s15 }
 0x2cd   :  { %13 = sbr.rel (!%p11_p6) target bundleno = 2 (0x2), region = 81 }

// kernel: sigvae_forward.9
= control target key start
LH: loop header
LB: loop body
LE: loop exit
PB: predicated region body
PF: predicated region fallthrough
CT: control target
= control target key end

     0   :  { %s807_s9 = smov 0   ;;  %s809_s10 = smov 0   ;;  %s992_s0 = inlined_call_operand.vmem [shape: f32[256,96], index: 0, kind: input, shape index: {}]   ;;  %s993_s1 = inlined_call_operand.vmem [shape: f32[96,48], index: 1, kind: input, shape index: {}]   ;;  %s994_s2 = inlined_call_operand.vmem [shape: f32[256,48], index: 2, kind: output, shape index: {}]  }
   0x1   :  { %s811_s11 = smov 0  }
   0x2 LB: > { %s24_s12 = sadd.s32 1, %s785_s10  ;;  %p607_p0 = scmp.ge.s32.totalorder %s789_s11, 1  ;;  %s789_s11 = sphi %s811_s11, %s12_s11   ;;  %s785_s10 = sphi %s809_s10, %s997_s10   ;;  %s781_s9 = sphi %s807_s9, %s996_s9  }
   0x3   : > { %p26_p1 = scmp.ge.s32.totalorder %s24_s12, 2  ;;  %p141_p2 = scmp.lt.s32.totalorder %s789_s11, 3 }
   0x5   : > { %s999_s12 = smov (%p26_p1, %s24_s12), 0  ;;  %p142_p3 = pnand %p607_p0, %p141_p2 }
   0x6   : > { %v245_v0 = vld [vmem:[%s993_s1] sm:$0xff] (!%p142_p3)  ;;  %v246_v1 = vld [vmem:[%s993_s1 + $0x8] sm:$0xff] (!%p142_p3)  ;;  %v247_v2 = vld [vmem:[%s993_s1 + $0x10] sm:$0xff] (!%p142_p3)  ;;  %s608_s19 = sshll.u32 (!%p142_p3), %s781_s9, 4  ;;  %vm196_vm0 = vcmask (!%p142_p3), 392192   ;;  %v791_v8 = vmov (!%p142_p3), 0.0  }
   0x7   : > { %145 = sbr.rel (%p142_p3) target bundleno = 272 (0x110), region = 28  ;;  %v706_v3 = vpack.c.bf16 (!%p142_p3), %v246_v1, %v245_v0  ;;  %v248_v4 = vld [vmem:[%s993_s1 + $0x18] sm:$0xff] (!%p142_p3)  ;;  %p840_p4 = scmp.lt.s32.totalorder (!%p142_p3), %s608_s19, 31  ;;  %v249_v6 = vld [vmem:[%s993_s1 + $0x20] sm:$0xff] (!%p142_p3)  ;;  %v250_v7 = vld [vmem:[%s993_s1 + $0x28] sm:$0xff] (!%p142_p3)  ;;  %198 = vst.msk [vmem:[#allocation2 + $0x8] sm:$0xff] (!%p142_p3), %vm196_vm0, %v791_v8 }
   0x8   : > { %v710_v5 = vpack.c.bf16 (!%p142_p3), %v248_v4, %v247_v2  ;;  %197 = vst.msk [vmem:[#allocation2] sm:$0xff] (!%p142_p3), %vm196_vm0, %v791_v8  ;;  %199 = vst.msk [vmem:[#allocation2 + $0x10] sm:$0xff] (!%p142_p3), %vm196_vm0, %v791_v8  ;;  %v714_v9 = vpack.c.bf16 (!%p142_p3), %v250_v7, %v249_v6  ;;  %v251_v10 = vld [vmem:[%s993_s1 + $0x30] sm:$0xff] (!%p142_p3)  ;;  %v252_v11 = vld [vmem:[%s993_s1 + $0x38] sm:$0xff] (!%p142_p3)  ;;  %vm257_vm1 = vcmask (!%p142_p3), 785408  }
   0x9   : > { %200 = vst.msk [vmem:[#allocation2 + $0x18] sm:$0xff] (!%p142_p3), %vm196_vm0, %v791_v8  ;;  %201 = vst.msk [vmem:[#allocation2 + $0x20] sm:$0xff] (!%p142_p3), %vm196_vm0, %v791_v8  ;;  %707 = vmatprep.subr.bf16.mxu0 (!%p142_p3), %v706_v3  ;;  %730 = vmatprep.subr.bf16.mxu1 (!%p142_p3), %v706_v3  ;;  %v718_v14 = vpack.c.bf16 (!%p142_p3), %v252_v11, %v251_v10  ;;  %v253_v15 = vld [vmem:[%s993_s1 + $0x40] sm:$0xff] (!%p142_p3)  ;;  %v254_v16 = vld [vmem:[%s993_s1 + $0x48] sm:$0xff] (!%p142_p3) }
   0xa   : > { %202 = vst.msk [vmem:[#allocation2 + $0x28] sm:$0xff] (!%p142_p3), %vm196_vm0, %v791_v8  ;;  %203 = vst.msk [vmem:[#allocation2 + $0x30] sm:$0xff] (!%p142_p3), %vm196_vm0, %v791_v8  ;;  %709 = vmatpush3.bf16.msra.mxu0 (!%p142_p3), %v706_v3  ;;  %736 = vmatpush3.bf16.msra.mxu1 (!%p142_p3), %v706_v3  ;;  %v722_v17 = vpack.c.bf16 (!%p142_p3), %v254_v16, %v253_v15  ;;  %v255_v18 = vld [vmem:[%s993_s1 + $0x50] sm:$0xff] (!%p142_p3)  ;;  %v256_v19 = vld [vmem:[%s993_s1 + $0x58] sm:$0xff] (!%p142_p3) }
   0xb   : > { %204 = vst.msk [vmem:[#allocation2 + $0x38] sm:$0xff] (!%p142_p3), %vm196_vm0, %v791_v8  ;;  %205 = vst.msk [vmem:[#allocation2 + $0x40] sm:$0xff] (!%p142_p3), %vm196_vm0, %v791_v8  ;;  %711 = vmatprep.subr.bf16.mxu0 (!%p142_p3), %v710_v5  ;;  %731 = vmatprep.subr.bf16.mxu1 (!%p142_p3), %v710_v5  ;;  %v726_v20 = vpack.c.bf16 (!%p142_p3), %v256_v19, %v255_v18 }
   0xc   : > { %206 = vst.msk [vmem:[#allocation2 + $0x48] sm:$0xff] (!%p142_p3), %vm196_vm0, %v791_v8  ;;  %207 = vst.msk [vmem:[#allocation2 + $0x50] sm:$0xff] (!%p142_p3), %vm196_vm0, %v791_v8 }
   0xd   : > { %208 = vst.msk [vmem:[#allocation2 + $0x58] sm:$0xff] (!%p142_p3), %vm196_vm0, %v791_v8  ;;  %209 = vst.msk [vmem:[#allocation2 + $0x60] sm:$0xff] (!%p142_p3), %vm196_vm0, %v791_v8 }
   0xe   : > { %210 = vst.msk [vmem:[#allocation2 + $0x68] sm:$0xff] %vm196_vm0, %v791_v8  ;;  %211 = vst.msk [vmem:[#allocation2 + $0x70] sm:$0xff] %vm196_vm0, %v791_v8  ;;  %s1001_s19 = smov (!%p840_p4, %s608_s19), 31  ;;  %713 = vmatpush3.bf16.msra.mxu0 %v710_v5  ;;  %737 = vmatpush3.bf16.msra.mxu1 %v710_v5  ;;  %v214_v35 = vld [vmem:[#allocation2 + $0x8] sm:$0xff] }
   0xf   : > { %212 = vst.msk [vmem:[#allocation2 + $0x78] sm:$0xff] %vm196_vm0, %v791_v8  ;;  %s609_s27 = sshll.u32 %s1001_s19, 3  ;;  %715 = vmatprep.subr.bf16.mxu0 %v714_v9  ;;  %732 = vmatprep.subr.bf16.mxu1 %v714_v9  ;;  %v213_v37 = vld [vmem:[#allocation2] sm:$0xff]  ;;  %v215_v49 = vld [vmem:[#allocation2 + $0x10] sm:$0xff] }
  0x10   : > { %s882_s6 = scalar_lea.vmem %s992_s0, %s609_s27  ;;  %v216_v47 = vld [vmem:[#allocation2 + $0x18] sm:$0xff]  ;;  %v217_v61 = vld [vmem:[#allocation2 + $0x20] sm:$0xff]  ;;  %s939_s21 = scalar_lea.vmem %s994_s2, %s609_s27 }
  0x11   : > { %v229_v12 = vld [vmem:[%s882_s6] sm:$0xff]  ;;  %v230_v21 = vld [vmem:[%s882_s6 + $0x8] sm:$0xff]  ;;  %v231_v23 = vld [vmem:[%s882_s6 + $0x10] sm:$0xff] }
  0x12   : > { %v237_v13 = vld [vmem:[%s882_s6 + $0x40] sm:$0xff]  ;;  %682 = vmatprep.mubr.msk.f32.mxu0 %vm257_vm1, %v229_v12  ;;  %717 = vmatpush3.bf16.msra.mxu0 %v714_v9  ;;  %v238_v22 = vld [vmem:[%s882_s6 + $0x48] sm:$0xff]  ;;  %v239_v24 = vld [vmem:[%s882_s6 + $0x50] sm:$0xff] }
  0x13   : > { %694 = vmatprep.mubr.msk.f32.mxu1 %vm257_vm1, %v237_v13  ;;  %738 = vmatpush3.bf16.msra.mxu1 %v714_v9  ;;  %v232_v25 = vld [vmem:[%s882_s6 + $0x18] sm:$0xff]  ;;  %v233_v27 = vld [vmem:[%s882_s6 + $0x20] sm:$0xff]  ;;  %v234_v29 = vld [vmem:[%s882_s6 + $0x28] sm:$0xff] }
  0x14   : > { %719 = vmatprep.subr.bf16.mxu0 %v718_v14  ;;  %733 = vmatprep.subr.bf16.mxu1 %v718_v14  ;;  %v240_v26 = vld [vmem:[%s882_s6 + $0x58] sm:$0xff]  ;;  %v241_v28 = vld [vmem:[%s882_s6 + $0x60] sm:$0xff]  ;;  %v242_v30 = vld [vmem:[%s882_s6 + $0x68] sm:$0xff] }
  0x15   : > { %v235_v31 = vld [vmem:[%s882_s6 + $0x30] sm:$0xff]  ;;  %v236_v33 = vld [vmem:[%s882_s6 + $0x38] sm:$0xff]  ;;  %v222_v36 = vld [vmem:[#allocation2 + $0x48] sm:$0xff] }
  0x16   : > { %721 = vmatpush3.bf16.msra.mxu0 %v718_v14  ;;  %v243_v32 = vld [vmem:[%s882_s6 + $0x70] sm:$0xff]  ;;  %v244_v34 = vld [vmem:[%s882_s6 + $0x78] sm:$0xff]  ;;  %v221_v38 = vld [vmem:[#allocation2 + $0x40] sm:$0xff] }
  0x17   : > { %739 = vmatpush3.bf16.msra.mxu1 %v718_v14  ;;  %723 = vmatprep.subr.bf16.mxu0 %v722_v17  ;;  %v224_v48 = vld [vmem:[#allocation2 + $0x58] sm:$0xff]  ;;  %v223_v50 = vld [vmem:[#allocation2 + $0x50] sm:$0xff]  ;;  %v218_v59 = vld [vmem:[#allocation2 + $0x28] sm:$0xff] }
  0x18   : > { %734 = vmatprep.subr.bf16.mxu1 %v722_v17  ;;  %v226_v60 = vld [vmem:[#allocation2 + $0x68] sm:$0xff]  ;;  %v225_v62 = vld [vmem:[#allocation2 + $0x60] sm:$0xff]  ;;  %v220_v5 = vld [vmem:[#allocation2 + $0x38] sm:$0xff] }
  0x19   : > { %v228_v6 = vld [vmem:[#allocation2 + $0x78] sm:$0xff]  ;;  %v219_v11 = vld [vmem:[#allocation2 + $0x30] sm:$0xff] }
  0x1a   : > { %725 = vmatpush3.bf16.msra.mxu0 %v722_v17  ;;  %v227_v14 = vld [vmem:[#allocation2 + $0x70] sm:$0xff] }
  0x1b   : > { %740 = vmatpush3.bf16.msra.mxu1 %v722_v17  ;;  %727 = vmatprep.subr.bf16.mxu0 %v726_v20 }
  0x1c   : > { %735 = vmatprep.subr.bf16.mxu1 %v726_v20 }
  0x1e   : > { %729 = vmatpush3.bf16.msra.mxu0 %v726_v20 }
  0x1f   : > { %741 = vmatpush3.bf16.msra.mxu1 %v726_v20 }
  0x21   : > { %683 = vmatmul.mubr.msk.f32.vlgmr.msra.gmra.mrb[0].mxu0 %vm257_vm1, %v230_v21 }
  0x22   : > { %695 = vmatmul.mubr.msk.f32.vlgmr.msra.gmra.mrb[0].mxu1 %vm257_vm1, %v238_v22  ;;  %685 = vmatprep.mubr.msk.f32.mxu0 %vm257_vm1, %v231_v23 }
  0x23   : > { %697 = vmatprep.mubr.msk.f32.mxu1 %vm257_vm1, %v239_v24 }
  0x25   : > { %686 = vmatmul.mubr.msk.f32.gmra.mrb[2].mxu0 %vm257_vm1, %v232_v25 }
  0x26   : > { %698 = vmatmul.mubr.msk.f32.gmra.mrb[2].mxu1 %vm257_vm1, %v240_v26  ;;  %688 = vmatprep.mubr.msk.f32.mxu0 %vm257_vm1, %v233_v27 }
  0x27   : > { %700 = vmatprep.mubr.msk.f32.mxu1 %vm257_vm1, %v241_v28 }
  0x29   : > { %689 = vmatmul.mubr.msk.f32.gmra.mrb[4].mxu0 %vm257_vm1, %v234_v29 }
  0x2a   : > { %701 = vmatmul.mubr.msk.f32.gmra.mrb[4].mxu1 %vm257_vm1, %v242_v30  ;;  %691 = vmatprep.mubr.msk.f32.mxu0 %vm257_vm1, %v235_v31 }
  0x2b   : > { %703 = vmatprep.mubr.msk.f32.mxu1 %vm257_vm1, %v243_v32 }
  0x2d   : > { %692 = vmatmul.mubr.msk.f32.gmra.mrb[6].mxu0 %vm257_vm1, %v236_v33 }
  0x2e   : > { %704 = vmatmul.mubr.msk.f32.gmra.mrb[6].mxu1 %vm257_vm1, %v244_v34 }
  0xf4   : > { %v684_v39 = vpop.f32.mrb[0].mxu0 }
  0xf5   : > { %v696_v40 = vpop.f32.mrb[0].mxu1  ;;  %v452_v41 = vadd.f32 %v684_v39, %v214_v35  ;;  %v372_v43 = vpop.f32.mrb[1].mxu0 }
  0xf6   : > { %v460_v42 = vadd.f32 %v696_v40, %v222_v36  ;;  %v412_v44 = vpop.f32.mrb[1].mxu1  ;;  %v451_v45 = vadd.f32 %v372_v43, %v213_v37 }
  0xf7   : > { %v459_v46 = vadd.f32 %v412_v44, %v221_v38  ;;  %469 = vst.msk [vmem:[#allocation2 + $0x8] sm:$0xff] %vm196_vm0, %v452_v41 }
  0xf8   : > { %477 = vst.msk [vmem:[#allocation2 + $0x48] sm:$0xff] %vm196_vm0, %v460_v42  ;;  %468 = vst.msk [vmem:[#allocation2] sm:$0xff] %vm196_vm0, %v451_v45  ;;  %v687_v51 = vpop.f32.mrb[2].mxu0 }
  0xf9   : > { %476 = vst.msk [vmem:[#allocation2 + $0x40] sm:$0xff] %vm196_vm0, %v459_v46  ;;  %v699_v52 = vpop.f32.mrb[2].mxu1  ;;  %v454_v53 = vadd.f32 %v687_v51, %v216_v47  ;;  %v382_v55 = vpop.f32.mrb[3].mxu0 }
  0xfa   : > { %v462_v54 = vadd.f32 %v699_v52, %v224_v48  ;;  %v422_v56 = vpop.f32.mrb[3].mxu1  ;;  %v453_v57 = vadd.f32 %v382_v55, %v215_v49 }
  0xfb   : > { %v461_v58 = vadd.f32 %v422_v56, %v223_v50  ;;  %471 = vst.msk [vmem:[#allocation2 + $0x18] sm:$0xff] %vm196_vm0, %v454_v53 }
  0xfc   : > { %479 = vst.msk [vmem:[#allocation2 + $0x58] sm:$0xff] %vm196_vm0, %v462_v54  ;;  %470 = vst.msk [vmem:[#allocation2 + $0x10] sm:$0xff] %vm196_vm0, %v453_v57  ;;  %v690_v63 = vpop.f32.mrb[4].mxu0 }
  0xfd   : > { %478 = vst.msk [vmem:[#allocation2 + $0x50] sm:$0xff] %vm196_vm0, %v461_v58  ;;  %v702_v0 = vpop.f32.mrb[4].mxu1  ;;  %v456_v1 = vadd.f32 %v690_v63, %v218_v59  ;;  %v392_v3 = vpop.f32.mrb[5].mxu0 }
  0xfe   : > { %v464_v2 = vadd.f32 %v702_v0, %v226_v60  ;;  %v432_v4 = vpop.f32.mrb[5].mxu1  ;;  %v488_v7 = vld [vmem:[#allocation2 + $0x8] sm:$0xff]  ;;  %v455_v9 = vadd.f32 %v392_v3, %v217_v61 }
  0xff   : > { %v496_v8 = vld [vmem:[#allocation2 + $0x48] sm:$0xff]  ;;  %v463_v10 = vadd.f32 %v432_v4, %v225_v62  ;;  %504 = vst.msk [vmem:[%s939_s21 + $0x8] sm:$0xff] %vm196_vm0, %v488_v7  ;;  %v487_v12 = vld [vmem:[#allocation2] sm:$0xff]  ;;  %473 = vst.msk [vmem:[#allocation2 + $0x28] sm:$0xff] %vm196_vm0, %v456_v1 }
 0x100   : > { %512 = vst.msk [vmem:[%s939_s21 + $0x48] sm:$0xff] %vm196_vm0, %v496_v8  ;;  %v495_v13 = vld [vmem:[#allocation2 + $0x40] sm:$0xff]  ;;  %481 = vst.msk [vmem:[#allocation2 + $0x68] sm:$0xff] %vm196_vm0, %v464_v2  ;;  %v693_v15 = vpop.f32.mrb[6].mxu0 }
 0x101   : > { %503 = vst.msk [vmem:[%s939_s21] sm:$0xff] %vm196_vm0, %v487_v12  ;;  %511 = vst.msk [vmem:[%s939_s21 + $0x40] sm:$0xff] %vm196_vm0, %v495_v13  ;;  %v705_v16 = vpop.f32.mrb[6].mxu1  ;;  %v458_v17 = vadd.f32 %v693_v15, %v220_v5  ;;  %v402_v19 = vpop.f32.mrb[7].mxu0 }
 0x102   : > { %472 = vst.msk [vmem:[#allocation2 + $0x20] sm:$0xff] %vm196_vm0, %v455_v9  ;;  %480 = vst.msk [vmem:[#allocation2 + $0x60] sm:$0xff] %vm196_vm0, %v463_v10  ;;  %v466_v18 = vadd.f32 %v705_v16, %v228_v6  ;;  %v442_v20 = vpop.f32.mrb[7].mxu1  ;;  %v490_v21 = vld [vmem:[#allocation2 + $0x18] sm:$0xff]  ;;  %v457_v23 = vadd.f32 %v402_v19, %v219_v11 }
 0x103   : > { %v498_v22 = vld [vmem:[#allocation2 + $0x58] sm:$0xff]  ;;  %v465_v24 = vadd.f32 %v442_v20, %v227_v14  ;;  %506 = vst.msk [vmem:[%s939_s21 + $0x18] sm:$0xff] %vm196_vm0, %v490_v21  ;;  %v489_v25 = vld [vmem:[#allocation2 + $0x10] sm:$0xff]  ;;  %475 = vst.msk [vmem:[#allocation2 + $0x38] sm:$0xff] %vm196_vm0, %v458_v17 }
 0x104   : > { %514 = vst.msk [vmem:[%s939_s21 + $0x58] sm:$0xff] %vm196_vm0, %v498_v22  ;;  %v497_v26 = vld [vmem:[#allocation2 + $0x50] sm:$0xff]  ;;  %483 = vst.msk [vmem:[#allocation2 + $0x78] sm:$0xff] %vm196_vm0, %v466_v18 }
 0x105   : > { %505 = vst.msk [vmem:[%s939_s21 + $0x10] sm:$0xff] %vm196_vm0, %v489_v25  ;;  %513 = vst.msk [vmem:[%s939_s21 + $0x50] sm:$0xff] %vm196_vm0, %v497_v26 }
 0x106   : > { %474 = vst.msk [vmem:[#allocation2 + $0x30] sm:$0xff] %vm196_vm0, %v457_v23  ;;  %482 = vst.msk [vmem:[#allocation2 + $0x70] sm:$0xff] %vm196_vm0, %v465_v24  ;;  %v492_v27 = vld [vmem:[#allocation2 + $0x28] sm:$0xff] }
 0x107   : > { %v500_v28 = vld [vmem:[#allocation2 + $0x68] sm:$0xff]  ;;  %508 = vst.msk [vmem:[%s939_s21 + $0x28] sm:$0xff] %vm196_vm0, %v492_v27 }
 0x108   : > { %516 = vst.msk [vmem:[%s939_s21 + $0x68] sm:$0xff] %vm196_vm0, %v500_v28 }
 0x109   : > { %v491_v29 = vld [vmem:[#allocation2 + $0x20] sm:$0xff] }
 0x10a   : > { %v499_v30 = vld [vmem:[#allocation2 + $0x60] sm:$0xff]  ;;  %507 = vst.msk [vmem:[%s939_s21 + $0x20] sm:$0xff] %vm196_vm0, %v491_v29  ;;  %v494_v31 = vld [vmem:[#allocation2 + $0x38] sm:$0xff] }
 0x10b   : > { %515 = vst.msk [vmem:[%s939_s21 + $0x60] sm:$0xff] %vm196_vm0, %v499_v30  ;;  %v502_v32 = vld [vmem:[#allocation2 + $0x78] sm:$0xff]  ;;  %510 = vst.msk [vmem:[%s939_s21 + $0x38] sm:$0xff] %vm196_vm0, %v494_v31 }
 0x10c   : > { %518 = vst.msk [vmem:[%s939_s21 + $0x78] sm:$0xff] %vm196_vm0, %v502_v32 }
 0x10d   : > { %v493_v33 = vld [vmem:[#allocation2 + $0x30] sm:$0xff] }
 0x10e   : > { %v501_v34 = vld [vmem:[#allocation2 + $0x70] sm:$0xff]  ;;  %509 = vst.msk [vmem:[%s939_s21 + $0x30] sm:$0xff] %vm196_vm0, %v493_v33 }
 0x10f   : > { %517 = vst.msk [vmem:[%s939_s21 + $0x70] sm:$0xff] %vm196_vm0, %v501_v34 }
 0x110 PF: > { %s12_s11 = sadd.s32 1, %s789_s11   ;;  %s996_s9 = smov %s785_s10 }
 0x111   : > { %p9_p5 = scmp.ge.s32.totalorder %s12_s11, 4   ;;  %s997_s10 = smov %s999_s12 }
 0x113   :  { %11 = sbr.rel (!%p9_p5) target bundleno = 2 (0x2), region = 69 }

// kernel: sigvae_forward.10
= control target key start
LH: loop header
LB: loop body
LE: loop exit
PB: predicated region body
PF: predicated region fallthrough
CT: control target
= control target key end

     0   :  { %s1234_s15 = smov 0   ;;  %s1236_s16 = smov 0   ;;  %s1562_s0 = inlined_call_operand.vmem [shape: f32[256,256], index: 0, kind: input, shape index: {}]   ;;  %s1563_s1 = inlined_call_operand.vmem [shape: f32[256,48], index: 1, kind: input, shape index: {}]   ;;  %s1564_s2 = inlined_call_operand.vmem [shape: f32[256,16], index: 2, kind: input, shape index: {}]   ;;  %s1565_s3 = inlined_call_operand.vmem [shape: f32[256,48], index: 3, kind: output, shape index: {0}]   ;;  %s1566_s4 = inlined_call_operand.vmem [shape: f32[256,16], index: 4, kind: output, shape index: {1}]  }
   0x1   :  { %s1238_s17 = smov 0  }
   0x2 LB: > { %s27_s18 = sadd.s32 1, %s1200_s16  ;;  %p982_p0 = scmp.ge.s32.totalorder %s1204_s17, 1  ;;  %s1204_s17 = sphi %s1238_s17, %s15_s17   ;;  %s1200_s16 = sphi %s1236_s16, %s1568_s16   ;;  %s1196_s15 = sphi %s1234_s15, %s1567_s15  }
   0x3   : > { %p29_p1 = scmp.ge.s32.totalorder %s27_s18, 2  ;;  %p208_p2 = scmp.lt.s32.totalorder %s1204_s17, 3 }
   0x5   : > { %s1570_s18 = smov (%p29_p1, %s27_s18), 0  ;;  %p209_p3 = pnand %p982_p0, %p208_p2 }
   0x6   : > { %v375_v0 = vld [vmem:[%s1563_s1 + $0x80] sm:$0xff] (!%p209_p3)  ;;  %v376_v1 = vld [vmem:[%s1563_s1 + $0x88] sm:$0xff] (!%p209_p3)  ;;  %s983_s25 = sshll.u32 (!%p209_p3), %s1196_s15, 4  ;;  %v377_v5 = vld [vmem:[%s1563_s1 + $0x90] sm:$0xff] (!%p209_p3)  ;;  %vm294_vm0 = vcmask (!%p209_p3), 392192   ;;  %s1208_s26 = smov (!%p209_p3), 96  }
   0x7   : > { %212 = sbr.rel (%p209_p3) target bundleno = 448 (0x1c0), region = 32  ;;  %v359_v2 = vld [vmem:[%s1563_s1] sm:$0xff] (!%p209_p3)  ;;  %v1075_v3 = vpack.c.bf16 (!%p209_p3), %v376_v1, %v375_v0  ;;  %v360_v4 = vld [vmem:[%s1563_s1 + $0x8] sm:$0xff] (!%p209_p3)  ;;  %v378_v6 = vld [vmem:[%s1563_s1 + $0x98] sm:$0xff] (!%p209_p3)  ;;  %p256_p4 = scmp.lt.s32.totalorder (!%p209_p3), %s983_s25, 31  ;;  %vm828_vm1 = vcmask (!%p209_p3), 130048  }
   0x8   : > { %v1077_v7 = vpack.c.bf16 (!%p209_p3), %v360_v4, %v359_v2  ;;  %v1079_v8 = vpack.c.bf16 (!%p209_p3), %v378_v6, %v377_v5  ;;  %v361_v9 = vld [vmem:[%s1563_s1 + $0x10] sm:$0xff] (!%p209_p3)  ;;  %v362_v10 = vld [vmem:[%s1563_s1 + $0x18] sm:$0xff] (!%p209_p3)  ;;  %v379_v11 = vld [vmem:[%s1563_s1 + $0xa0] sm:$0xff] (!%p209_p3) }
   0x9   : > { %1076 = vmatprep.subr.bf16.mxu0 (!%p209_p3), %v1075_v3  ;;  %1107 = vmatprep.subr.bf16.mxu1 (!%p209_p3), %v1075_v3  ;;  %v380_v12 = vld [vmem:[%s1563_s1 + $0xa8] sm:$0xff] (!%p209_p3)  ;;  %v1081_v13 = vpack.c.bf16 (!%p209_p3), %v362_v10, %v361_v9  ;;  %v363_v15 = vld [vmem:[%s1563_s1 + $0x20] sm:$0xff] (!%p209_p3)  ;;  %v381_v17 = vld [vmem:[%s1563_s1 + $0xb0] sm:$0xff] (!%p209_p3) }
   0xa   : > { %1078 = vmatpush3.bf16.msra.mxu0 (!%p209_p3), %v1077_v7  ;;  %1115 = vmatpush3.bf16.msra.mxu1 (!%p209_p3), %v1077_v7  ;;  %v1083_v14 = vpack.c.bf16 (!%p209_p3), %v380_v12, %v379_v11  ;;  %v364_v16 = vld [vmem:[%s1563_s1 + $0x28] sm:$0xff] (!%p209_p3)  ;;  %v382_v18 = vld [vmem:[%s1563_s1 + $0xb8] sm:$0xff] (!%p209_p3)  ;;  %v365_v21 = vld [vmem:[%s1563_s1 + $0x30] sm:$0xff] (!%p209_p3) }
   0xb   : > { %1080 = vmatprep.subr.bf16.mxu0 (!%p209_p3), %v1079_v8  ;;  %1108 = vmatprep.subr.bf16.mxu1 (!%p209_p3), %v1079_v8  ;;  %v1085_v19 = vpack.c.bf16 (!%p209_p3), %v364_v16, %v363_v15  ;;  %v1087_v20 = vpack.c.bf16 (!%p209_p3), %v382_v18, %v381_v17  ;;  %v366_v22 = vld [vmem:[%s1563_s1 + $0x38] sm:$0xff] (!%p209_p3)  ;;  %v383_v23 = vld [vmem:[%s1563_s1 + $0xc0] sm:$0xff] (!%p209_p3)  ;;  %v384_v24 = vld [vmem:[%s1563_s1 + $0xc8] sm:$0xff] (!%p209_p3)  ;;  %v1206_v16 = vmov (!%p209_p3), 0.0  }
   0xc   : > { %v1089_v27 = vpack.c.bf16 (!%p209_p3), %v366_v22, %v365_v21  ;;  %v1091_v28 = vpack.c.bf16 (!%p209_p3), %v384_v24, %v383_v23  ;;  %v367_v29 = vld [vmem:[%s1563_s1 + $0x40] sm:$0xff] (!%p209_p3)  ;;  %v368_v30 = vld [vmem:[%s1563_s1 + $0x48] sm:$0xff] (!%p209_p3)  ;;  %v385_v31 = vld [vmem:[%s1563_s1 + $0xd0] sm:$0xff] (!%p209_p3)  ;;  %295 = vst.msk [vmem:[#allocation2] sm:$0xff] (!%p209_p3), %vm294_vm0, %v1206_v16 }
   0xd   : > { %v386_v32 = vld [vmem:[%s1563_s1 + $0xd8] sm:$0xff] (!%p209_p3)  ;;  %v1093_v33 = vpack.c.bf16 (!%p209_p3), %v368_v30, %v367_v29  ;;  %v369_v35 = vld [vmem:[%s1563_s1 + $0x50] sm:$0xff] (!%p209_p3)  ;;  %v387_v37 = vld [vmem:[%s1563_s1 + $0xe0] sm:$0xff] (!%p209_p3)  ;;  %296 = vst.msk [vmem:[#allocation2 + $0x8] sm:$0xff] (!%p209_p3), %vm294_vm0, %v1206_v16 }
   0xe   : > { %s1572_s25 = smov (!%p256_p4, %s983_s25), 31  ;;  %1082 = vmatpush3.bf16.msra.mxu0 %v1081_v13  ;;  %1116 = vmatpush3.bf16.msra.mxu1 %v1081_v13  ;;  %v1095_v34 = vpack.c.bf16 %v386_v32, %v385_v31  ;;  %v370_v36 = vld [vmem:[%s1563_s1 + $0x58] sm:$0xff]  ;;  %v388_v38 = vld [vmem:[%s1563_s1 + $0xe8] sm:$0xff]  ;;  %v371_v41 = vld [vmem:[%s1563_s1 + $0x60] sm:$0xff]  ;;  %297 = vst.msk [vmem:[#allocation2 + $0x10] sm:$0xff] %vm294_vm0, %v1206_v16 }
   0xf   : > { %s994_s21 = sshll.u32 %s1572_s25, 4  ;;  %1084 = vmatprep.subr.bf16.mxu0 %v1083_v14  ;;  %1109 = vmatprep.subr.bf16.mxu1 %v1083_v14  ;;  %v1097_v39 = vpack.c.bf16 %v370_v36, %v369_v35  ;;  %v1099_v40 = vpack.c.bf16 %v388_v38, %v387_v37  ;;  %v372_v42 = vld [vmem:[%s1563_s1 + $0x68] sm:$0xff]  ;;  %v389_v43 = vld [vmem:[%s1563_s1 + $0xf0] sm:$0xff]  ;;  %v390_v44 = vld [vmem:[%s1563_s1 + $0xf8] sm:$0xff]  ;;  %298 = vst.msk [vmem:[#allocation2 + $0x18] sm:$0xff] %vm294_vm0, %v1206_v16 }
  0x10   : > { %s1300_s29 = scalar_lea.vmem %s1562_s0, %s994_s21  ;;  %v1101_v45 = vpack.c.bf16 %v372_v42, %v371_v41  ;;  %v1103_v46 = vpack.c.bf16 %v390_v44, %v389_v43  ;;  %v373_v47 = vld [vmem:[%s1563_s1 + $0x70] sm:$0xff]  ;;  %v374_v48 = vld [vmem:[%s1563_s1 + $0x78] sm:$0xff]  ;;  %299 = vst.msk [vmem:[#allocation2 + $0x20] sm:$0xff] %vm294_vm0, %v1206_v16  ;;  %300 = vst.msk [vmem:[#allocation2 + $0x28] sm:$0xff] %vm294_vm0, %v1206_v16 }
  0x11   : > { %v328_v25 = vld [vmem:[%s1300_s29 + $0x8] sm:$0xff]  ;;  %v1105_v49 = vpack.c.bf16 %v374_v48, %v373_v47  ;;  %v327_v50 = vld [vmem:[%s1300_s29] sm:$0xff]  ;;  %v330_v52 = vld [vmem:[%s1300_s29 + $0x18] sm:$0xff]  ;;  %301 = vst.msk [vmem:[#allocation2 + $0x30] sm:$0xff] %vm294_vm0, %v1206_v16 }
  0x12   : > { %455 = vmatprep.mubr.f32.mxu0 %v328_v25  ;;  %v344_v26 = vld [vmem:[%s1300_s29 + $0x88] sm:$0xff]  ;;  %1086 = vmatpush3.bf16.msra.mxu0 %v1085_v19  ;;  %v343_v51 = vld [vmem:[%s1300_s29 + $0x80] sm:$0xff]  ;;  %v346_v53 = vld [vmem:[%s1300_s29 + $0x98] sm:$0xff]  ;;  %302 = vst.msk [vmem:[#allocation2 + $0x38] sm:$0xff] %vm294_vm0, %v1206_v16 }
  0x13   : > { %1117 = vmatpush3.bf16.msra.mxu1 %v1085_v19  ;;  %1088 = vmatprep.subr.bf16.mxu0 %v1087_v20  ;;  %v329_v54 = vld [vmem:[%s1300_s29 + $0x10] sm:$0xff]  ;;  %v332_v56 = vld [vmem:[%s1300_s29 + $0x28] sm:$0xff]  ;;  %v331_v58 = vld [vmem:[%s1300_s29 + $0x20] sm:$0xff]  ;;  %303 = vst.msk [vmem:[#allocation2 + $0x40] sm:$0xff] %vm294_vm0, %v1206_v16 }
  0x14   : > { %1110 = vmatprep.subr.bf16.mxu1 %v1087_v20  ;;  %495 = vmatprep.mubr.f32.mxu1 %v344_v26  ;;  %v345_v55 = vld [vmem:[%s1300_s29 + $0x90] sm:$0xff]  ;;  %v348_v57 = vld [vmem:[%s1300_s29 + $0xa8] sm:$0xff]  ;;  %v347_v59 = vld [vmem:[%s1300_s29 + $0xa0] sm:$0xff]  ;;  %304 = vst.msk [vmem:[#allocation2 + $0x48] sm:$0xff] %vm294_vm0, %v1206_v16 }
  0x15   : > { %v334_v60 = vld [vmem:[%s1300_s29 + $0x38] sm:$0xff]  ;;  %v333_v62 = vld [vmem:[%s1300_s29 + $0x30] sm:$0xff]  ;;  %v336_v0 = vld [vmem:[%s1300_s29 + $0x48] sm:$0xff]  ;;  %305 = vst.msk [vmem:[#allocation2 + $0x50] sm:$0xff] %vm294_vm0, %v1206_v16 }
  0x16   : > { %1090 = vmatpush3.bf16.msra.mxu0 %v1089_v27  ;;  %v350_v61 = vld [vmem:[%s1300_s29 + $0xb8] sm:$0xff]  ;;  %v349_v63 = vld [vmem:[%s1300_s29 + $0xb0] sm:$0xff]  ;;  %v352_v1 = vld [vmem:[%s1300_s29 + $0xc8] sm:$0xff]  ;;  %306 = vst.msk [vmem:[#allocation2 + $0x58] sm:$0xff] %vm294_vm0, %v1206_v16 }
  0x17   : > { %1118 = vmatpush3.bf16.msra.mxu1 %v1089_v27  ;;  %1092 = vmatprep.subr.bf16.mxu0 %v1091_v28  ;;  %v335_v2 = vld [vmem:[%s1300_s29 + $0x40] sm:$0xff]  ;;  %v338_v4 = vld [vmem:[%s1300_s29 + $0x58] sm:$0xff]  ;;  %v337_v6 = vld [vmem:[%s1300_s29 + $0x50] sm:$0xff]  ;;  %307 = vst.msk [vmem:[#allocation2 + $0x60] sm:$0xff] %vm294_vm0, %v1206_v16 }
  0x18   : > { %1111 = vmatprep.subr.bf16.mxu1 %v1091_v28  ;;  %v351_v3 = vld [vmem:[%s1300_s29 + $0xc0] sm:$0xff]  ;;  %v354_v5 = vld [vmem:[%s1300_s29 + $0xd8] sm:$0xff]  ;;  %v353_v7 = vld [vmem:[%s1300_s29 + $0xd0] sm:$0xff]  ;;  %308 = vst.msk [vmem:[#allocation2 + $0x68] sm:$0xff] %vm294_vm0, %v1206_v16 }
  0x19   : > { %v340_v8 = vld [vmem:[%s1300_s29 + $0x68] sm:$0xff]  ;;  %v339_v10 = vld [vmem:[%s1300_s29 + $0x60] sm:$0xff]  ;;  %v342_v12 = vld [vmem:[%s1300_s29 + $0x78] sm:$0xff]  ;;  %309 = vst.msk [vmem:[#allocation2 + $0x70] sm:$0xff] %vm294_vm0, %v1206_v16 }
  0x1a   : > { %1094 = vmatpush3.bf16.msra.mxu0 %v1093_v33  ;;  %v356_v9 = vld [vmem:[%s1300_s29 + $0xe8] sm:$0xff]  ;;  %v355_v11 = vld [vmem:[%s1300_s29 + $0xe0] sm:$0xff]  ;;  %v358_v13 = vld [vmem:[%s1300_s29 + $0xf8] sm:$0xff]  ;;  %310 = vst.msk [vmem:[#allocation2 + $0x78] sm:$0xff] %vm294_vm0, %v1206_v16 }
  0x1b   : > { %1119 = vmatpush3.bf16.msra.mxu1 %v1093_v33  ;;  %1096 = vmatprep.subr.bf16.mxu0 %v1095_v34  ;;  %v341_v14 = vld [vmem:[%s1300_s29 + $0x70] sm:$0xff]  ;;  %v311_v19 = vld [vmem:[#allocation2] sm:$0xff]  ;;  %v312_v29 = vld [vmem:[#allocation2 + $0x8] sm:$0xff] }
  0x1c   : > { %1112 = vmatprep.subr.bf16.mxu1 %v1095_v34  ;;  %v357_v15 = vld [vmem:[%s1300_s29 + $0xf0] sm:$0xff]  ;;  %v319_v21 = vld [vmem:[#allocation2 + $0x40] sm:$0xff]  ;;  %v320_v31 = vld [vmem:[#allocation2 + $0x48] sm:$0xff]  ;;  %s1407_s29 = sshll.u32 %s1572_s25, 3  ;;  %s1207_s25 = smov 112  }
  0x1d   : > { %v321_v41 = vld [vmem:[#allocation2 + $0x50] sm:$0xff]  ;;  %s1415_s24 = scalar_lea.vmem %s1565_s3, %s1407_s29  ;;  %v314_v48 = vld [vmem:[#allocation2 + $0x18] sm:$0xff]  ;;  %s1497_s30 = scalar_lea.vmem %s1564_s2, %s1407_s29 }
  0x1e   : > { %1098 = vmatpush3.bf16.msra.mxu0 %v1097_v39  ;;  %s1504_s7 = scalar_lea.vmem %s1566_s4, %s1407_s29 }
  0x1f   : > { %1120 = vmatpush3.bf16.msra.mxu1 %v1097_v39  ;;  %1100 = vmatprep.subr.bf16.mxu0 %v1099_v40  ;;  %v313_v39 = vld [vmem:[#allocation2 + $0x10] sm:$0xff] }
  0x20   : > { %1113 = vmatprep.subr.bf16.mxu1 %v1099_v40 }
  0x22   : > { %1102 = vmatpush3.bf16.msra.mxu0 %v1101_v45 }
  0x23   : > { %1121 = vmatpush3.bf16.msra.mxu1 %v1101_v45  ;;  %1104 = vmatprep.subr.bf16.mxu0 %v1103_v46 }
  0x24   : > { %1114 = vmatprep.subr.bf16.mxu1 %v1103_v46 }
  0x26   : > { %1106 = vmatpush3.bf16.msra.mxu0 %v1105_v49 }
  0x27   : > { %1122 = vmatpush3.bf16.msra.mxu1 %v1105_v49 }
  0x29   : > { %456 = vmatmul.mubr.f32.vlgmr.msra.gmra.mrb[0].mxu0 %v327_v50 }
  0x2a   : > { %496 = vmatmul.mubr.f32.vlgmr.msra.gmra.mrb[0].mxu1 %v343_v51  ;;  %460 = vmatprep.mubr.f32.mxu0 %v330_v52  ;;  %v322_v52 = vld [vmem:[#allocation2 + $0x58] sm:$0xff] }
  0x2b   : > { %500 = vmatprep.mubr.f32.mxu1 %v346_v53 }
  0x2d   : > { %461 = vmatmul.mubr.f32.gmra.mrb[2].mxu0 %v329_v54 }
  0x2e   : > { %501 = vmatmul.mubr.f32.gmra.mrb[2].mxu1 %v345_v55  ;;  %465 = vmatprep.mubr.f32.mxu0 %v332_v56 }
  0x2f   : > { %505 = vmatprep.mubr.f32.mxu1 %v348_v57 }
  0x31   : > { %466 = vmatmul.mubr.f32.gmra.mrb[4].mxu0 %v331_v58 }
  0x32   : > { %506 = vmatmul.mubr.f32.gmra.mrb[4].mxu1 %v347_v59  ;;  %470 = vmatprep.mubr.f32.mxu0 %v334_v60 }
  0x33   : > { %510 = vmatprep.mubr.f32.mxu1 %v350_v61 }
  0x35   : > { %471 = vmatmul.mubr.f32.gmra.mrb[6].mxu0 %v333_v62 }
  0x36   : > { %511 = vmatmul.mubr.f32.gmra.mrb[6].mxu1 %v349_v63  ;;  %475 = vmatprep.mubr.f32.mxu0 %v336_v0 }
  0x37   : > { %515 = vmatprep.mubr.f32.mxu1 %v352_v1  ;;  %v315_v1 = vld [vmem:[#allocation2 + $0x20] sm:$0xff] }
  0x39   : > { %476 = vmatmul.mubr.f32.gmra.mrb[8].mxu0 %v335_v2 }
  0x3a   : > { %516 = vmatmul.mubr.f32.gmra.mrb[8].mxu1 %v351_v3  ;;  %480 = vmatprep.mubr.f32.mxu0 %v338_v4 }
  0x3b   : > { %520 = vmatprep.mubr.f32.mxu1 %v354_v5 }
  0x3d   : > { %481 = vmatmul.mubr.f32.gmra.mrb[10].mxu0 %v337_v6 }
  0x3e   : > { %521 = vmatmul.mubr.f32.gmra.mrb[10].mxu1 %v353_v7  ;;  %485 = vmatprep.mubr.f32.mxu0 %v340_v8  ;;  %v323_v8 = vld [vmem:[#allocation2 + $0x60] sm:$0xff] }
  0x3f   : > { %525 = vmatprep.mubr.f32.mxu1 %v356_v9 }
  0x41   : > { %486 = vmatmul.mubr.f32.gmra.mrb[12].mxu0 %v339_v10 }
  0x42   : > { %526 = vmatmul.mubr.f32.gmra.mrb[12].mxu1 %v355_v11  ;;  %490 = vmatprep.mubr.f32.mxu0 %v342_v12 }
  0x43   : > { %530 = vmatprep.mubr.f32.mxu1 %v358_v13 }
  0x45   : > { %491 = vmatmul.mubr.f32.gmra.mrb[14].mxu0 %v341_v14 }
  0x46   : > { %531 = vmatmul.mubr.f32.gmra.mrb[14].mxu1 %v357_v15  ;;  %v316_v15 = vld [vmem:[#allocation2 + $0x28] sm:$0xff] }
  0xfc   : > { %v1027_v17 = vpop.f32.mrb[0].mxu0 }
  0xfd   : > { %v1051_v18 = vpop.f32.mrb[0].mxu1  ;;  %v1028_v20 = vpop.f32.mrb[1].mxu0 }
  0xfe   : > { %v1052_v22 = vpop.f32.mrb[1].mxu1  ;;  %v1029_v23 = vadd.f32 %v1028_v20, %v1027_v17 }
  0xff   : > { %v1053_v24 = vadd.f32 %v1052_v22, %v1051_v18 }
 0x100   : > { %v536_v25 = vadd.f32 %v1029_v23, %v311_v19  ;;  %v1030_v27 = vpop.f32.mrb[2].mxu0 }
 0x101   : > { %v544_v26 = vadd.f32 %v1053_v24, %v319_v21  ;;  %v1054_v28 = vpop.f32.mrb[2].mxu1  ;;  %v1031_v30 = vpop.f32.mrb[3].mxu0  ;;  %v324_v21 = vld [vmem:[#allocation2 + $0x68] sm:$0xff] }
 0x102   : > { %v1055_v32 = vpop.f32.mrb[3].mxu1  ;;  %553 = vst.msk [vmem:[#allocation2] sm:$0xff] %vm294_vm0, %v536_v25  ;;  %v1032_v33 = vadd.f32 %v1031_v30, %v1030_v27 }
 0x103   : > { %561 = vst.msk [vmem:[#allocation2 + $0x40] sm:$0xff] %vm294_vm0, %v544_v26  ;;  %v1056_v34 = vadd.f32 %v1055_v32, %v1054_v28 }
 0x104   : > { %v537_v35 = vadd.f32 %v1032_v33, %v312_v29  ;;  %v1033_v37 = vpop.f32.mrb[4].mxu0  ;;  %v317_v29 = vld [vmem:[#allocation2 + $0x30] sm:$0xff] }
 0x105   : > { %v545_v36 = vadd.f32 %v1056_v34, %v320_v31  ;;  %v1057_v38 = vpop.f32.mrb[4].mxu1  ;;  %v1034_v40 = vpop.f32.mrb[5].mxu0  ;;  %v325_v34 = vld [vmem:[#allocation2 + $0x70] sm:$0xff] }
 0x106   : > { %v1058_v42 = vpop.f32.mrb[5].mxu1  ;;  %554 = vst.msk [vmem:[#allocation2 + $0x8] sm:$0xff] %vm294_vm0, %v537_v35  ;;  %v1035_v43 = vadd.f32 %v1034_v40, %v1033_v37 }
 0x107   : > { %562 = vst.msk [vmem:[#allocation2 + $0x48] sm:$0xff] %vm294_vm0, %v545_v36  ;;  %v1059_v44 = vadd.f32 %v1058_v42, %v1057_v38  ;;  %v318_v42 = vld [vmem:[#allocation2 + $0x38] sm:$0xff] }
 0x108   : > { %v538_v45 = vadd.f32 %v1035_v43, %v313_v39  ;;  %v1036_v46 = vpop.f32.mrb[6].mxu0 }
 0x109   : > { %v546_v47 = vadd.f32 %v1059_v44, %v321_v41  ;;  %v1060_v49 = vpop.f32.mrb[6].mxu1  ;;  %v1037_v50 = vpop.f32.mrb[7].mxu0  ;;  %v572_v51 = vld [vmem:[#allocation2] sm:$0xff] }
 0x10a   : > { %v1061_v53 = vpop.f32.mrb[7].mxu1  ;;  %v580_v54 = vld [vmem:[#allocation2 + $0x40] sm:$0xff]  ;;  %555 = vst.msk [vmem:[#allocation2 + $0x10] sm:$0xff] %vm294_vm0, %v538_v45  ;;  %v1038_v55 = vadd.f32 %v1037_v50, %v1036_v46  ;;  %764 = vrot.lane.b32.xlu0 %v572_v51, %s1207_s25  ;;  %588 = vst.msk [vmem:[%s1415_s24] sm:$0xff] %vm294_vm0, %v572_v51  ;;  %v620_v56 = vmul.f32 0.5, %v572_v51  ;;  %v326_v45 = vld [vmem:[#allocation2 + $0x78] sm:$0xff] }
 0x10b   : > { %563 = vst.msk [vmem:[#allocation2 + $0x50] sm:$0xff] %vm294_vm0, %v546_v47  ;;  %v1062_v57 = vadd.f32 %v1061_v53, %v1060_v49  ;;  %596 = vst.msk [vmem:[%s1415_s24 + $0x40] sm:$0xff] %vm294_vm0, %v580_v54  ;;  %v628_v58 = vmul.f32 0.5, %v580_v54 }
 0x10c   : > { %v539_v59 = vadd.f32 %v1038_v55, %v314_v48  ;;  %v636_v60 = vmul.f32 1.442695, %v620_v56  ;;  %v1039_v62 = vpop.f32.mrb[8].mxu0 }
 0x10d   : > { %v547_v61 = vadd.f32 %v1062_v57, %v322_v52  ;;  %v1063_v63 = vpop.f32.mrb[8].mxu1  ;;  %v573_v0 = vld [vmem:[#allocation2 + $0x8] sm:$0xff]  ;;  %v1040_v2 = vpop.f32.mrb[9].mxu0  ;;  %v652_v5 = vmul.f32 1.442695, %v628_v58 }
 0x10e   : > { %v581_v3 = vld [vmem:[#allocation2 + $0x48] sm:$0xff]  ;;  %v1064_v4 = vpop.f32.mrb[9].mxu1  ;;  %556 = vst.msk [vmem:[#allocation2 + $0x18] sm:$0xff] %vm294_vm0, %v539_v59  ;;  %1150 = vpow2.f32 %v636_v60  ;;  %766 = vrot.lane.b32.xlu1 %v573_v0, %s1207_s25  ;;  %589 = vst.msk [vmem:[%s1415_s24 + $0x8] sm:$0xff] %vm294_vm0, %v573_v0  ;;  %780 = vrot.lane.b32.xlu0 %v580_v54, %s1207_s25  ;;  %v1041_v6 = vadd.f32 %v1040_v2, %v1039_v62  ;;  %v621_v32 = vmul.f32 0.5, %v573_v0 }
 0x10f   : > { %564 = vst.msk [vmem:[#allocation2 + $0x58] sm:$0xff] %vm294_vm0, %v547_v61  ;;  %597 = vst.msk [vmem:[%s1415_s24 + $0x48] sm:$0xff] %vm294_vm0, %v581_v3  ;;  %v629_v7 = vmul.f32 0.5, %v581_v3  ;;  %v1065_v9 = vadd.f32 %v1064_v4, %v1063_v63  ;;  %1152 = vpow2.f32 %v652_v5 }
 0x110   : > { %v540_v10 = vadd.f32 %v1041_v6, %v315_v1  ;;  %v1042_v12 = vpop.f32.mrb[10].mxu0  ;;  %v638_v47 = vmul.f32 1.442695, %v621_v32 }
 0x111   : > { %v654_v11 = vmul.f32 1.442695, %v629_v7  ;;  %v1066_v13 = vpop.f32.mrb[10].mxu1  ;;  %v574_v14 = vld [vmem:[#allocation2 + $0x10] sm:$0xff]  ;;  %v1043_v16 = vpop.f32.mrb[11].mxu0  ;;  %v548_v17 = vadd.f32 %v1065_v9, %v323_v8 }
 0x112   : > { %v582_v18 = vld [vmem:[#allocation2 + $0x50] sm:$0xff]  ;;  %v1067_v19 = vpop.f32.mrb[11].mxu1  ;;  %557 = vst.msk [vmem:[#allocation2 + $0x20] sm:$0xff] %vm294_vm0, %v540_v10  ;;  %782 = vrot.lane.b32.xlu1 %v581_v3, %s1207_s25  ;;  %590 = vst.msk [vmem:[%s1415_s24 + $0x10] sm:$0xff] %vm294_vm0, %v574_v14  ;;  %768 = vrot.lane.b32.xlu0 %v574_v14, %s1207_s25  ;;  %v1044_v20 = vadd.f32 %v1043_v16, %v1042_v12  ;;  %v622_v35 = vmul.f32 0.5, %v574_v14 }
 0x113   : > { %598 = vst.msk [vmem:[%s1415_s24 + $0x50] sm:$0xff] %vm294_vm0, %v582_v18  ;;  %1154 = vpow2.f32 %v654_v11  ;;  %565 = vst.msk [vmem:[#allocation2 + $0x60] sm:$0xff] %vm294_vm0, %v548_v17  ;;  %v1068_v22 = vadd.f32 %v1067_v19, %v1066_v13  ;;  %v630_v48 = vmul.f32 0.5, %v582_v18 }
 0x114   : > { %v541_v23 = vadd.f32 %v1044_v20, %v316_v15  ;;  %v1045_v24 = vpop.f32.mrb[12].mxu0  ;;  %v640_v52 = vmul.f32 1.442695, %v622_v35  ;;  %1156 = vpow2.f32 %v638_v47 }
 0x115   : > { %v1069_v25 = vpop.f32.mrb[12].mxu1  ;;  %v575_v26 = vld [vmem:[#allocation2 + $0x18] sm:$0xff]  ;;  %v549_v27 = vadd.f32 %v1068_v22, %v324_v21  ;;  %v1046_v30 = vpop.f32.mrb[13].mxu0  ;;  %v656_v59 = vmul.f32 1.442695, %v630_v48 }
 0x116   : > { %v583_v28 = vld [vmem:[#allocation2 + $0x58] sm:$0xff]  ;;  %v1070_v31 = vpop.f32.mrb[13].mxu1  ;;  %558 = vst.msk [vmem:[#allocation2 + $0x28] sm:$0xff] %vm294_vm0, %v541_v23  ;;  %591 = vst.msk [vmem:[%s1415_s24 + $0x18] sm:$0xff] %vm294_vm0, %v575_v26  ;;  %770 = vrot.lane.b32.xlu1 %v575_v26, %s1207_s25  ;;  %784 = vrot.lane.b32.xlu0 %v582_v18, %s1207_s25  ;;  %v1047_v33 = vadd.f32 %v1046_v30, %v1045_v24  ;;  %v623_v53 = vmul.f32 0.5, %v575_v26  ;;  %1158 = vpow2.f32 %v640_v52 }
 0x117   : > { %599 = vst.msk [vmem:[%s1415_s24 + $0x58] sm:$0xff] %vm294_vm0, %v583_v28  ;;  %566 = vst.msk [vmem:[#allocation2 + $0x68] sm:$0xff] %vm294_vm0, %v549_v27  ;;  %v1071_v36 = vadd.f32 %v1070_v31, %v1069_v25  ;;  %v631_v62 = vmul.f32 0.5, %v583_v28  ;;  %1160 = vpow2.f32 %v656_v59 }
 0x118   : > { %v1151_v37 = vpop.eup %1150  ;;  %v542_v38 = vadd.f32 %v1047_v33, %v317_v29  ;;  %v1048_v39 = vpop.f32.mrb[14].mxu0  ;;  %v642_v61 = vmul.f32 1.442695, %v623_v53 }
 0x119   : > { %v1072_v40 = vpop.f32.mrb[14].mxu1  ;;  %v576_v41 = vld [vmem:[#allocation2 + $0x20] sm:$0xff]  ;;  %v1049_v43 = vpop.f32.mrb[15].mxu0  ;;  %v550_v44 = vadd.f32 %v1071_v36, %v325_v34  ;;  %v658_v1 = vmul.f32 1.442695, %v631_v62 }
 0x11a   : > { %v1073_v46 = vpop.f32.mrb[15].mxu1  ;;  %786 = vrot.lane.b32.xlu1 %v583_v28, %s1207_s25  ;;  %684 = vrot.lane.b32.xlu0 %v1151_v37, %s1208_s26  ;;  %559 = vst.msk [vmem:[#allocation2 + $0x30] sm:$0xff] %vm294_vm0, %v542_v38  ;;  %592 = vst.msk [vmem:[%s1415_s24 + $0x20] sm:$0xff] %vm294_vm0, %v576_v41  ;;  %v1050_v49 = vadd.f32 %v1049_v43, %v1048_v39  ;;  %v584_v50 = vld [vmem:[#allocation2 + $0x60] sm:$0xff]  ;;  %v1153_v54 = vpop.eup %1152  ;;  %1162 = vpow2.f32 %v642_v61  ;;  %v624_v2 = vmul.f32 0.5, %v576_v41 }
 0x11b   : > { %v1074_v51 = vadd.f32 %v1073_v46, %v1072_v40  ;;  %567 = vst.msk [vmem:[#allocation2 + $0x70] sm:$0xff] %vm294_vm0, %v550_v44  ;;  %600 = vst.msk [vmem:[%s1415_s24 + $0x60] sm:$0xff] %vm294_vm0, %v584_v50  ;;  %v632_v5 = vmul.f32 0.5, %v584_v50  ;;  %1164 = vpow2.f32 %v658_v1  ;;  %v604_v40 = vld [vmem:[%s1497_s30] sm:$0xff]  ;;  %v613_v44 = vld [vmem:[%s1497_s30 + $0x48] sm:$0xff] }
 0x11c   : > { %v543_v55 = vadd.f32 %v1050_v49, %v318_v42  ;;  %v644_v7 = vmul.f32 1.442695, %v624_v2 }
 0x11d   : > { %v551_v56 = vadd.f32 %v1074_v51, %v326_v45  ;;  %v1155_v57 = vpop.eup %1154  ;;  %v577_v58 = vld [vmem:[#allocation2 + $0x28] sm:$0xff]  ;;  %v660_v11 = vmul.f32 1.442695, %v632_v5  ;;  %v612_v45 = vld [vmem:[%s1497_s30 + $0x40] sm:$0xff] }
 0x11e   : > { %702 = vrot.lane.b32.xlu1 %v1155_v57, %s1208_s26  ;;  %700 = vrot.lane.b32.xlu0 %v1153_v54, %s1208_s26  ;;  %593 = vst.msk [vmem:[%s1415_s24 + $0x28] sm:$0xff] %vm294_vm0, %v577_v58  ;;  %560 = vst.msk [vmem:[#allocation2 + $0x38] sm:$0xff] %vm294_vm0, %v543_v55  ;;  %v585_v60 = vld [vmem:[#allocation2 + $0x68] sm:$0xff]  ;;  %v625_v6 = vmul.f32 0.5, %v577_v58  ;;  %v1157_v8 = vpop.eup %1156  ;;  %1166 = vpow2.f32 %v644_v7  ;;  %v606_v57 = vld [vmem:[%s1497_s30 + $0x10] sm:$0xff] }
 0x11f   : > { %568 = vst.msk [vmem:[#allocation2 + $0x78] sm:$0xff] %vm294_vm0, %v551_v56  ;;  %601 = vst.msk [vmem:[%s1415_s24 + $0x68] sm:$0xff] %vm294_vm0, %v585_v60  ;;  %v633_v13 = vmul.f32 0.5, %v585_v60  ;;  %1168 = vpow2.f32 %v660_v11  ;;  %v615_v7 = vld [vmem:[%s1497_s30 + $0x58] sm:$0xff] }
 0x120   : > { %v1159_v9 = vpop.eup %1158  ;;  %v646_v12 = vmul.f32 1.442695, %v625_v6 }
 0x121   : > { %v578_v63 = vld [vmem:[#allocation2 + $0x30] sm:$0xff]  ;;  %v1161_v14 = vpop.eup %1160  ;;  %v662_v19 = vmul.f32 1.442695, %v633_v13  ;;  %v608_v13 = vld [vmem:[%s1497_s30 + $0x20] sm:$0xff] }
 0x122   : > { %774 = vrot.lane.b32.xlu1 %v577_v58, %s1207_s25  ;;  %772 = vrot.lane.b32.xlu0 %v576_v41, %s1207_s25  ;;  %594 = vst.msk [vmem:[%s1415_s24 + $0x30] sm:$0xff] %vm294_vm0, %v578_v63  ;;  %v586_v0 = vld [vmem:[#allocation2 + $0x70] sm:$0xff]  ;;  %v626_v10 = vmul.f32 0.5, %v578_v63  ;;  %1170 = vpow2.f32 %v646_v12  ;;  %v605_v58 = vld [vmem:[%s1497_s30 + $0x8] sm:$0xff] }
 0x123   : > { %602 = vst.msk [vmem:[%s1415_s24 + $0x70] sm:$0xff] %vm294_vm0, %v586_v0  ;;  %v634_v15 = vmul.f32 0.5, %v586_v0 }
 0x124   : > { %v1163_v16 = vpop.eup %1162  ;;  %v648_v17 = vmul.f32 1.442695, %v626_v10 }
 0x125   : > { %v579_v3 = vld [vmem:[#allocation2 + $0x38] sm:$0xff]  ;;  %v664_v20 = vmul.f32 1.442695, %v634_v15  ;;  %v1165_v21 = vpop.eup %1164 }
 0x126   : > { %v587_v4 = vld [vmem:[#allocation2 + $0x78] sm:$0xff]  ;;  %790 = vrot.lane.b32.xlu1 %v585_v60, %s1207_s25  ;;  %788 = vrot.lane.b32.xlu0 %v584_v50, %s1207_s25  ;;  %595 = vst.msk [vmem:[%s1415_s24 + $0x38] sm:$0xff] %vm294_vm0, %v579_v3  ;;  %v627_v18 = vmul.f32 0.5, %v579_v3  ;;  %1172 = vpow2.f32 %v648_v17 }
 0x127   : > { %603 = vst.msk [vmem:[%s1415_s24 + $0x78] sm:$0xff] %vm294_vm0, %v587_v4  ;;  %v635_v23 = vmul.f32 0.5, %v587_v4  ;;  %1174 = vpow2.f32 %v662_v19  ;;  %v616_v19 = vld [vmem:[%s1497_s30 + $0x60] sm:$0xff] }
 0x128   : > { %v650_v22 = vmul.f32 1.442695, %v627_v18  ;;  %1176 = vpow2.f32 %v664_v20  ;;  %v1167_v24 = vpop.eup %1166  ;;  %v609_v18 = vld [vmem:[%s1497_s30 + $0x28] sm:$0xff] }
 0x129   : > { %v666_v25 = vmul.f32 1.442695, %v635_v23  ;;  %v1169_v26 = vpop.eup %1168 }
 0x12a   : > { %688 = vrot.lane.b32.xlu1 %v1159_v9, %s1208_s26  ;;  %686 = vrot.lane.b32.xlu0 %v1157_v8, %s1208_s26  ;;  %1178 = vpow2.f32 %v650_v22 }
 0x12b   : > { %1180 = vpow2.f32 %v666_v25  ;;  %v617_v25 = vld [vmem:[%s1497_s30 + $0x68] sm:$0xff] }
 0x12c   : > { %v1171_v27 = vpop.eup %1170 }
 0x12e   : > { %690 = vrot.lane.b32.xlu1 %v1163_v16, %s1208_s26  ;;  %704 = vrot.lane.b32.xlu0 %v1161_v14, %s1208_s26 }
 0x130   : > { %v1173_v28 = vpop.eup %1172 }
 0x131   : > { %v1175_v29 = vpop.eup %1174 }
 0x132   : > { %706 = vrot.lane.b32.xlu1 %v1165_v21, %s1208_s26  ;;  %776 = vrot.lane.b32.xlu0 %v578_v63, %s1207_s25  ;;  %v1177_v30 = vpop.eup %1176  ;;  %v607_v63 = vld [vmem:[%s1497_s30 + $0x18] sm:$0xff] }
 0x134   : > { %v1179_v31 = vpop.eup %1178 }
 0x135   : > { %v1181_v32 = vpop.eup %1180 }
 0x136   : > { %778 = vrot.lane.b32.xlu1 %v579_v3, %s1207_s25  ;;  %692 = vrot.lane.b32.xlu0 %v1167_v24, %s1208_s26 }
 0x13a   : > { %694 = vrot.lane.b32.xlu1 %v1171_v27, %s1208_s26  ;;  %708 = vrot.lane.b32.xlu0 %v1169_v26, %s1208_s26  ;;  %v610_v26 = vld [vmem:[%s1497_s30 + $0x30] sm:$0xff] }
 0x13e   : > { %710 = vrot.lane.b32.xlu1 %v1175_v29, %s1208_s26  ;;  %696 = vrot.lane.b32.xlu0 %v1173_v28, %s1208_s26 }
 0x142   : > { %698 = vrot.lane.b32.xlu1 %v1179_v31, %s1208_s26  ;;  %712 = vrot.lane.b32.xlu0 %v1177_v30, %s1208_s26 }
 0x146   : > { %714 = vrot.lane.b32.xlu1 %v1181_v32, %s1208_s26  ;;  %792 = vrot.lane.b32.xlu0 %v586_v0, %s1207_s25  ;;  %v614_v0 = vld [vmem:[%s1497_s30 + $0x50] sm:$0xff] }
 0x14a   : > { %794 = vrot.lane.b32.xlu1 %v587_v4, %s1207_s25 }
 0x17c   : > { %v765_v33 = vpop.permute.xlu0 %764 }
 0x180   : > { %v767_v34 = vpop.permute.xlu1 %766  ;;  %v781_v35 = vpop.permute.xlu0 %780 }
 0x184   : > { %v783_v36 = vpop.permute.xlu1 %782  ;;  %v769_v37 = vpop.permute.xlu0 %768 }
 0x188   : > { %v771_v38 = vpop.permute.xlu1 %770  ;;  %v785_v39 = vpop.permute.xlu0 %784 }
 0x18c   : > { %v787_v41 = vpop.permute.xlu1 %786  ;;  %v685_v42 = vpop.permute.xlu0 %684 }
 0x18d   : > { %v732_v43 = vmul.f32 %v685_v42, %v604_v40  ;;  %v619_v42 = vld [vmem:[%s1497_s30 + $0x78] sm:$0xff] }
 0x18f   : > { %v812_v46 = vadd.f32 %v765_v33, %v732_v43  ;;  %v611_v33 = vld [vmem:[%s1497_s30 + $0x38] sm:$0xff] }
 0x190   : > { %v703_v47 = vpop.permute.xlu1 %702  ;;  %v701_v48 = vpop.permute.xlu0 %700 }
 0x191   : > { %829 = vst.msk [vmem:[%s1504_s7] sm:$0xff] %vm828_vm1, %v812_v46  ;;  %v741_v49 = vmul.f32 %v703_v47, %v613_v44  ;;  %v740_v50 = vmul.f32 %v701_v48, %v612_v45 }
 0x193   : > { %v821_v51 = vadd.f32 %v783_v36, %v741_v49  ;;  %v820_v52 = vadd.f32 %v781_v35, %v740_v50 }
 0x194   : > { %v775_v53 = vpop.permute.xlu1 %774  ;;  %v773_v54 = vpop.permute.xlu0 %772 }
 0x195   : > { %838 = vst.msk [vmem:[%s1504_s7 + $0x48] sm:$0xff] %vm828_vm1, %v821_v51  ;;  %837 = vst.msk [vmem:[%s1504_s7 + $0x40] sm:$0xff] %vm828_vm1, %v820_v52 }
 0x198   : > { %v791_v55 = vpop.permute.xlu1 %790  ;;  %v789_v56 = vpop.permute.xlu0 %788 }
 0x19c   : > { %v689_v59 = vpop.permute.xlu1 %688  ;;  %v687_v60 = vpop.permute.xlu0 %686 }
 0x19d   : > { %v734_v61 = vmul.f32 %v689_v59, %v606_v57  ;;  %v733_v62 = vmul.f32 %v687_v60, %v605_v58 }
 0x19f   : > { %v814_v1 = vadd.f32 %v769_v37, %v734_v61  ;;  %v813_v2 = vadd.f32 %v767_v34, %v733_v62  ;;  %v618_v37 = vld [vmem:[%s1497_s30 + $0x70] sm:$0xff] }
 0x1a0   : > { %v691_v3 = vpop.permute.xlu1 %690  ;;  %v705_v4 = vpop.permute.xlu0 %704 }
 0x1a1   : > { %831 = vst.msk [vmem:[%s1504_s7 + $0x10] sm:$0xff] %vm828_vm1, %v814_v1  ;;  %830 = vst.msk [vmem:[%s1504_s7 + $0x8] sm:$0xff] %vm828_vm1, %v813_v2  ;;  %v735_v5 = vmul.f32 %v691_v3, %v607_v63  ;;  %v742_v6 = vmul.f32 %v705_v4, %v614_v0 }
 0x1a3   : > { %v815_v8 = vadd.f32 %v771_v38, %v735_v5  ;;  %v822_v9 = vadd.f32 %v785_v39, %v742_v6 }
 0x1a4   : > { %v707_v10 = vpop.permute.xlu1 %706  ;;  %v777_v11 = vpop.permute.xlu0 %776 }
 0x1a5   : > { %832 = vst.msk [vmem:[%s1504_s7 + $0x18] sm:$0xff] %vm828_vm1, %v815_v8  ;;  %839 = vst.msk [vmem:[%s1504_s7 + $0x50] sm:$0xff] %vm828_vm1, %v822_v9  ;;  %v743_v12 = vmul.f32 %v707_v10, %v615_v7 }
 0x1a7   : > { %v823_v14 = vadd.f32 %v787_v41, %v743_v12 }
 0x1a8   : > { %v779_v15 = vpop.permute.xlu1 %778  ;;  %v693_v16 = vpop.permute.xlu0 %692 }
 0x1a9   : > { %840 = vst.msk [vmem:[%s1504_s7 + $0x58] sm:$0xff] %vm828_vm1, %v823_v14  ;;  %v736_v17 = vmul.f32 %v693_v16, %v608_v13 }
 0x1ab   : > { %v816_v20 = vadd.f32 %v773_v54, %v736_v17 }
 0x1ac   : > { %v695_v21 = vpop.permute.xlu1 %694  ;;  %v709_v22 = vpop.permute.xlu0 %708 }
 0x1ad   : > { %833 = vst.msk [vmem:[%s1504_s7 + $0x20] sm:$0xff] %vm828_vm1, %v816_v20  ;;  %v737_v23 = vmul.f32 %v695_v21, %v609_v18  ;;  %v744_v24 = vmul.f32 %v709_v22, %v616_v19 }
 0x1af   : > { %v817_v27 = vadd.f32 %v775_v53, %v737_v23  ;;  %v824_v28 = vadd.f32 %v789_v56, %v744_v24 }
 0x1b0   : > { %v711_v29 = vpop.permute.xlu1 %710  ;;  %v697_v30 = vpop.permute.xlu0 %696 }
 0x1b1   : > { %834 = vst.msk [vmem:[%s1504_s7 + $0x28] sm:$0xff] %vm828_vm1, %v817_v27  ;;  %841 = vst.msk [vmem:[%s1504_s7 + $0x60] sm:$0xff] %vm828_vm1, %v824_v28  ;;  %v745_v31 = vmul.f32 %v711_v29, %v617_v25  ;;  %v738_v32 = vmul.f32 %v697_v30, %v610_v26 }
 0x1b3   : > { %v825_v34 = vadd.f32 %v791_v55, %v745_v31  ;;  %v818_v35 = vadd.f32 %v777_v11, %v738_v32 }
 0x1b4   : > { %v699_v36 = vpop.permute.xlu1 %698  ;;  %v713_v38 = vpop.permute.xlu0 %712 }
 0x1b5   : > { %842 = vst.msk [vmem:[%s1504_s7 + $0x68] sm:$0xff] %vm828_vm1, %v825_v34  ;;  %835 = vst.msk [vmem:[%s1504_s7 + $0x30] sm:$0xff] %vm828_vm1, %v818_v35  ;;  %v739_v39 = vmul.f32 %v699_v36, %v611_v33  ;;  %v746_v41 = vmul.f32 %v713_v38, %v618_v37 }
 0x1b7   : > { %v819_v40 = vadd.f32 %v779_v15, %v739_v39 }
 0x1b8   : > { %v715_v43 = vpop.permute.xlu1 %714  ;;  %v793_v44 = vpop.permute.xlu0 %792 }
 0x1b9   : > { %836 = vst.msk [vmem:[%s1504_s7 + $0x38] sm:$0xff] %vm828_vm1, %v819_v40  ;;  %v826_v45 = vadd.f32 %v793_v44, %v746_v41  ;;  %v747_v46 = vmul.f32 %v715_v43, %v619_v42 }
 0x1bb   : > { %843 = vst.msk [vmem:[%s1504_s7 + $0x70] sm:$0xff] %vm828_vm1, %v826_v45 }
 0x1bc   : > { %v795_v47 = vpop.permute.xlu1 %794 }
 0x1bd   : > { %v827_v48 = vadd.f32 %v795_v47, %v747_v46 }
 0x1bf   : > { %844 = vst.msk [vmem:[%s1504_s7 + $0x78] sm:$0xff] %vm828_vm1, %v827_v48 }
 0x1c0 PF: > { %s15_s17 = sadd.s32 1, %s1204_s17   ;;  %s1567_s15 = smov %s1200_s16 }
 0x1c1   : > { %p12_p5 = scmp.ge.s32.totalorder %s15_s17, 4   ;;  %s1568_s16 = smov %s1570_s18 }
 0x1c3   :  { %14 = sbr.rel (!%p12_p5) target bundleno = 2 (0x2), region = 88 }

// kernel: sigvae_forward.11
= control target key start
LH: loop header
LB: loop body
LE: loop exit
PB: predicated region body
PF: predicated region fallthrough
CT: control target
= control target key end

     0   :  { %s1360_s9 = smov 0   ;;  %s1362_s10 = smov 0   ;;  %s1673_s0 = inlined_call_operand.vmem [shape: f32[1,256,16], index: 0, kind: input, shape index: {}, may-alias: {0,1}]   ;;  %s1674_s1 = inlined_call_operand.vmem [shape: f32[1,256,16], index: 1, kind: input, shape index: {}, may-alias: {0,1}]   ;;  %s1675_s2 = inlined_call_operand.vmem [shape: f32[1,256,256], index: 2, kind: output, shape index: {}]  }
   0x1   :  { %s1364_s11 = smov 0  }
   0x2 LB: > { %s27_s12 = sadd.s32 1, %s1339_s10  ;;  %p952_p0 = scmp.ge.s32.totalorder %s1343_s11, 1  ;;  %s1343_s11 = sphi %s1364_s11, %s12_s11   ;;  %s1339_s10 = sphi %s1362_s10, %s1679_s10   ;;  %s1335_s9 = sphi %s1360_s9, %s1678_s9  }
   0x3   : > { %p29_p1 = scmp.ge.s32.totalorder %s27_s12, 2  ;;  %p159_p2 = scmp.lt.s32.totalorder %s1343_s11, 3 }
   0x5   : > { %s1681_s12 = smov (%p29_p1, %s27_s12), 0  ;;  %p160_p3 = pnand %p952_p0, %p159_p2 }
   0x6   : > { %v271_v0 = vld [vmem:[%s1674_s1 + $0x80] sm:$0xff] (!%p160_p3)  ;;  %v272_v1 = vld [vmem:[%s1674_s1 + $0x88] sm:$0xff] (!%p160_p3)  ;;  %vm287_vm0 = vcmask (!%p160_p3), 130048   ;;  %s953_s19 = sshll.u32 (!%p160_p3), %s1335_s9, 4  ;;  %v273_v6 = vld [vmem:[%s1674_s1 + $0x90] sm:$0xff] (!%p160_p3) }
   0x7   : > { %163 = sbr.rel (%p160_p3) target bundleno = 370 (0x172), region = 28  ;;  %v255_v2 = vld [vmem:[%s1674_s1] sm:$0xff] (!%p160_p3)  ;;  %v1105_v3 = vpack.c.bf16 (!%p160_p3), %v272_v1, %v271_v0  ;;  %vm1389_vm1 = vmpackc.low (!%p160_p3), %vm287_vm0, %vm287_vm0  ;;  %v256_v5 = vld [vmem:[%s1674_s1 + $0x8] sm:$0xff] (!%p160_p3)  ;;  %p206_p4 = scmp.lt.s32.totalorder (!%p160_p3), %s953_s19, 31 }
   0x8   : > { %v1108_v7 = vpack.c.bf16 (!%p160_p3), %v256_v5, %v255_v2  ;;  %v274_v8 = vld [vmem:[%s1674_s1 + $0x98] sm:$0xff] (!%p160_p3)  ;;  %v257_v10 = vld [vmem:[%s1674_s1 + $0x10] sm:$0xff] (!%p160_p3)  ;;  %v275_v12 = vld [vmem:[%s1674_s1 + $0xa0] sm:$0xff] (!%p160_p3) }
   0x9   : > { %1107 = vmatprep.subr.msk.bf16.mxu0 (!%p160_p3), %vm1389_vm1, %v1105_v3  ;;  %1153 = vmatprep.subr.msk.bf16.mxu1 (!%p160_p3), %vm1389_vm1, %v1105_v3  ;;  %v1111_v9 = vpack.c.bf16 (!%p160_p3), %v274_v8, %v273_v6  ;;  %v258_v11 = vld [vmem:[%s1674_s1 + $0x18] sm:$0xff] (!%p160_p3)  ;;  %v276_v13 = vld [vmem:[%s1674_s1 + $0xa8] sm:$0xff] (!%p160_p3)  ;;  %v259_v18 = vld [vmem:[%s1674_s1 + $0x20] sm:$0xff] (!%p160_p3) }
   0xa   : > { %1110 = vmatpush3.bf16.xpose.msk.msra.mxu0 (!%p160_p3), %vm1389_vm1, %v1108_v7  ;;  %1161 = vmatpush3.bf16.xpose.msk.msra.mxu1 (!%p160_p3), %vm1389_vm1, %v1108_v7  ;;  %v1114_v14 = vpack.c.bf16 (!%p160_p3), %v258_v11, %v257_v10  ;;  %v1117_v15 = vpack.c.bf16 (!%p160_p3), %v276_v13, %v275_v12  ;;  %v260_v19 = vld [vmem:[%s1674_s1 + $0x28] sm:$0xff] (!%p160_p3)  ;;  %v277_v20 = vld [vmem:[%s1674_s1 + $0xb0] sm:$0xff] (!%p160_p3)  ;;  %v278_v21 = vld [vmem:[%s1674_s1 + $0xb8] sm:$0xff] (!%p160_p3) }
   0xb   : > { %1113 = vmatprep.subr.msk.bf16.mxu0 (!%p160_p3), %vm1389_vm1, %v1111_v9  ;;  %1154 = vmatprep.subr.msk.bf16.mxu1 (!%p160_p3), %vm1389_vm1, %v1111_v9  ;;  %v1120_v22 = vpack.c.bf16 (!%p160_p3), %v260_v19, %v259_v18  ;;  %v1123_v23 = vpack.c.bf16 (!%p160_p3), %v278_v21, %v277_v20  ;;  %v261_v24 = vld [vmem:[%s1674_s1 + $0x30] sm:$0xff] (!%p160_p3)  ;;  %v262_v25 = vld [vmem:[%s1674_s1 + $0x38] sm:$0xff] (!%p160_p3)  ;;  %v279_v26 = vld [vmem:[%s1674_s1 + $0xc0] sm:$0xff] (!%p160_p3) }
   0xc   : > { %v280_v27 = vld [vmem:[%s1674_s1 + $0xc8] sm:$0xff] (!%p160_p3)  ;;  %v1126_v28 = vpack.c.bf16 (!%p160_p3), %v262_v25, %v261_v24  ;;  %v263_v30 = vld [vmem:[%s1674_s1 + $0x40] sm:$0xff] (!%p160_p3)  ;;  %v281_v32 = vld [vmem:[%s1674_s1 + $0xd0] sm:$0xff] (!%p160_p3) }
   0xd   : > { %v1129_v29 = vpack.c.bf16 (!%p160_p3), %v280_v27, %v279_v26  ;;  %v264_v31 = vld [vmem:[%s1674_s1 + $0x48] sm:$0xff] (!%p160_p3)  ;;  %v282_v33 = vld [vmem:[%s1674_s1 + $0xd8] sm:$0xff] (!%p160_p3)  ;;  %v265_v36 = vld [vmem:[%s1674_s1 + $0x50] sm:$0xff] (!%p160_p3) }
   0xe   : > { %s1683_s19 = smov (!%p206_p4, %s953_s19), 31  ;;  %v1132_v34 = vpack.c.bf16 %v264_v31, %v263_v30  ;;  %v1135_v35 = vpack.c.bf16 %v282_v33, %v281_v32  ;;  %v266_v37 = vld [vmem:[%s1674_s1 + $0x58] sm:$0xff]  ;;  %v283_v38 = vld [vmem:[%s1674_s1 + $0xe0] sm:$0xff]  ;;  %v284_v39 = vld [vmem:[%s1674_s1 + $0xe8] sm:$0xff] }
   0xf   : > { %s954_s30 = sshll.u32 %s1683_s19, 3  ;;  %v1138_v40 = vpack.c.bf16 %v266_v37, %v265_v36  ;;  %v1141_v41 = vpack.c.bf16 %v284_v39, %v283_v38  ;;  %v267_v42 = vld [vmem:[%s1674_s1 + $0x60] sm:$0xff]  ;;  %v268_v43 = vld [vmem:[%s1674_s1 + $0x68] sm:$0xff]  ;;  %v285_v44 = vld [vmem:[%s1674_s1 + $0xf0] sm:$0xff] }
  0x10   : > { %s1432_s9 = scalar_lea.vmem %s1673_s0, %s954_s30  ;;  %v286_v45 = vld [vmem:[%s1674_s1 + $0xf8] sm:$0xff]  ;;  %v1144_v46 = vpack.c.bf16 %v268_v43, %v267_v42  ;;  %v269_v48 = vld [vmem:[%s1674_s1 + $0x70] sm:$0xff] }
  0x11   : > { %v1435_v16 = vld [vmem:[%s1432_s9] sm:$0xff]  ;;  %v1147_v47 = vpack.c.bf16 %v286_v45, %v285_v44  ;;  %v270_v49 = vld [vmem:[%s1674_s1 + $0x78] sm:$0xff]  ;;  %v240_v51 = vld [vmem:[%s1432_s9 + $0x8] sm:$0xff] }
  0x12   : > { %v1438_v17 = vld [vmem:[%s1432_s9 + $0x40] sm:$0xff]  ;;  %1116 = vmatpush3.bf16.xpose.msk.msra.mxu0 %vm1389_vm1, %v1114_v14  ;;  %1162 = vmatpush3.bf16.xpose.msk.msra.mxu1 %vm1389_vm1, %v1114_v14  ;;  %v1150_v50 = vpack.c.bf16 %v270_v49, %v269_v48  ;;  %v248_v52 = vld [vmem:[%s1432_s9 + $0x48] sm:$0xff]  ;;  %v241_v53 = vld [vmem:[%s1432_s9 + $0x10] sm:$0xff] }
  0x13   : > { %1119 = vmatprep.subr.msk.bf16.mxu0 %vm1389_vm1, %v1117_v15  ;;  %1155 = vmatprep.subr.msk.bf16.mxu1 %vm1389_vm1, %v1117_v15  ;;  %v249_v54 = vld [vmem:[%s1432_s9 + $0x50] sm:$0xff]  ;;  %v242_v55 = vld [vmem:[%s1432_s9 + $0x18] sm:$0xff]  ;;  %v243_v57 = vld [vmem:[%s1432_s9 + $0x20] sm:$0xff] }
  0x14   : > { %1073 = vmatprep.mubr.msk.f32.mxu0 %vm287_vm0, %v1435_v16  ;;  %1089 = vmatprep.mubr.msk.f32.mxu1 %vm287_vm0, %v1438_v17  ;;  %v250_v56 = vld [vmem:[%s1432_s9 + $0x58] sm:$0xff]  ;;  %v251_v58 = vld [vmem:[%s1432_s9 + $0x60] sm:$0xff]  ;;  %v244_v59 = vld [vmem:[%s1432_s9 + $0x28] sm:$0xff] }
  0x15   : > { %v252_v60 = vld [vmem:[%s1432_s9 + $0x68] sm:$0xff]  ;;  %v245_v61 = vld [vmem:[%s1432_s9 + $0x30] sm:$0xff]  ;;  %v246_v63 = vld [vmem:[%s1432_s9 + $0x38] sm:$0xff] }
  0x16   : > { %v253_v62 = vld [vmem:[%s1432_s9 + $0x70] sm:$0xff]  ;;  %v254_v0 = vld [vmem:[%s1432_s9 + $0x78] sm:$0xff]  ;;  %s1040_s9 = sshll.u32 %s1683_s19, 4 }
  0x17   : > { %s1612_s13 = scalar_lea.vmem %s1675_s2, %s1040_s9 }
  0x1a   : > { %1122 = vmatpush3.bf16.xpose.msk.msra.mxu0 %vm1389_vm1, %v1120_v22  ;;  %1163 = vmatpush3.bf16.xpose.msk.msra.mxu1 %vm1389_vm1, %v1120_v22 }
  0x1b   : > { %1125 = vmatprep.subr.msk.bf16.mxu0 %vm1389_vm1, %v1123_v23  ;;  %1156 = vmatprep.subr.msk.bf16.mxu1 %vm1389_vm1, %v1123_v23 }
  0x22   : > { %1128 = vmatpush3.bf16.xpose.msk.msra.mxu0 %vm1389_vm1, %v1126_v28  ;;  %1164 = vmatpush3.bf16.xpose.msk.msra.mxu1 %vm1389_vm1, %v1126_v28 }
  0x23   : > { %1131 = vmatprep.subr.msk.bf16.mxu0 %vm1389_vm1, %v1129_v29  ;;  %1157 = vmatprep.subr.msk.bf16.mxu1 %vm1389_vm1, %v1129_v29 }
  0x2a   : > { %1134 = vmatpush3.bf16.xpose.msk.msra.mxu0 %vm1389_vm1, %v1132_v34  ;;  %1165 = vmatpush3.bf16.xpose.msk.msra.mxu1 %vm1389_vm1, %v1132_v34 }
  0x2b   : > { %1137 = vmatprep.subr.msk.bf16.mxu0 %vm1389_vm1, %v1135_v35  ;;  %1158 = vmatprep.subr.msk.bf16.mxu1 %vm1389_vm1, %v1135_v35 }
  0x32   : > { %1140 = vmatpush3.bf16.xpose.msk.msra.mxu0 %vm1389_vm1, %v1138_v40  ;;  %1166 = vmatpush3.bf16.xpose.msk.msra.mxu1 %vm1389_vm1, %v1138_v40 }
  0x33   : > { %1143 = vmatprep.subr.msk.bf16.mxu0 %vm1389_vm1, %v1141_v41  ;;  %1159 = vmatprep.subr.msk.bf16.mxu1 %vm1389_vm1, %v1141_v41 }
  0x3a   : > { %1146 = vmatpush3.bf16.xpose.msk.msra.mxu0 %vm1389_vm1, %v1144_v46  ;;  %1167 = vmatpush3.bf16.xpose.msk.msra.mxu1 %vm1389_vm1, %v1144_v46 }
  0x3b   : > { %1149 = vmatprep.subr.msk.bf16.mxu0 %vm1389_vm1, %v1147_v47  ;;  %1160 = vmatprep.subr.msk.bf16.mxu1 %vm1389_vm1, %v1147_v47 }
  0x42   : > { %1152 = vmatpush3.bf16.xpose.msk.msra.mxu0 %vm1389_vm1, %v1150_v50  ;;  %1168 = vmatpush3.bf16.xpose.msk.msra.mxu1 %vm1389_vm1, %v1150_v50 }
  0x49   : > { %1074 = vmatmul.mubr.msk.f32.vlgmr.msra.gmra.mrb[0].mxu0 %vm287_vm0, %v1435_v16  ;;  %1090 = vmatmul.mubr.msk.f32.vlgmr.msra.gmra.mrb[0].mxu1 %vm287_vm0, %v1438_v17 }
  0x4a   : > { %1075 = vmatprep.mubr.msk.f32.mxu0 %vm287_vm0, %v240_v51  ;;  %1091 = vmatprep.mubr.msk.f32.mxu1 %vm287_vm0, %v248_v52 }
  0x4d   : > { %1076 = vmatmul.mubr.msk.f32.gmra.mrb[2].mxu0 %vm287_vm0, %v240_v51  ;;  %1092 = vmatmul.mubr.msk.f32.gmra.mrb[2].mxu1 %vm287_vm0, %v248_v52 }
  0x4e   : > { %1077 = vmatprep.mubr.msk.f32.mxu0 %vm287_vm0, %v241_v53  ;;  %1093 = vmatprep.mubr.msk.f32.mxu1 %vm287_vm0, %v249_v54 }
  0x51   : > { %1078 = vmatmul.mubr.msk.f32.gmra.mrb[4].mxu0 %vm287_vm0, %v241_v53  ;;  %1094 = vmatmul.mubr.msk.f32.gmra.mrb[4].mxu1 %vm287_vm0, %v249_v54 }
  0x52   : > { %1079 = vmatprep.mubr.msk.f32.mxu0 %vm287_vm0, %v242_v55  ;;  %1095 = vmatprep.mubr.msk.f32.mxu1 %vm287_vm0, %v250_v56 }
  0x55   : > { %1080 = vmatmul.mubr.msk.f32.gmra.mrb[6].mxu0 %vm287_vm0, %v242_v55  ;;  %1096 = vmatmul.mubr.msk.f32.gmra.mrb[6].mxu1 %vm287_vm0, %v250_v56 }
  0x56   : > { %1081 = vmatprep.mubr.msk.f32.mxu0 %vm287_vm0, %v243_v57  ;;  %1097 = vmatprep.mubr.msk.f32.mxu1 %vm287_vm0, %v251_v58 }
  0x59   : > { %1082 = vmatmul.mubr.msk.f32.gmra.mrb[8].mxu0 %vm287_vm0, %v243_v57  ;;  %1098 = vmatmul.mubr.msk.f32.gmra.mrb[8].mxu1 %vm287_vm0, %v251_v58 }
  0x5a   : > { %1083 = vmatprep.mubr.msk.f32.mxu0 %vm287_vm0, %v244_v59  ;;  %1099 = vmatprep.mubr.msk.f32.mxu1 %vm287_vm0, %v252_v60 }
  0x5d   : > { %1084 = vmatmul.mubr.msk.f32.gmra.mrb[10].mxu0 %vm287_vm0, %v244_v59  ;;  %1100 = vmatmul.mubr.msk.f32.gmra.mrb[10].mxu1 %vm287_vm0, %v252_v60 }
  0x5e   : > { %1085 = vmatprep.mubr.msk.f32.mxu0 %vm287_vm0, %v245_v61  ;;  %1101 = vmatprep.mubr.msk.f32.mxu1 %vm287_vm0, %v253_v62 }
  0x61   : > { %1086 = vmatmul.mubr.msk.f32.gmra.mrb[12].mxu0 %vm287_vm0, %v245_v61  ;;  %1102 = vmatmul.mubr.msk.f32.gmra.mrb[12].mxu1 %vm287_vm0, %v253_v62 }
  0x62   : > { %1087 = vmatprep.mubr.msk.f32.mxu0 %vm287_vm0, %v246_v63  ;;  %1103 = vmatprep.mubr.msk.f32.mxu1 %vm287_vm0, %v254_v0 }
  0x65   : > { %1088 = vmatmul.mubr.msk.f32.gmra.mrb[14].mxu0 %vm287_vm0, %v246_v63  ;;  %1104 = vmatmul.mubr.msk.f32.gmra.mrb[14].mxu1 %vm287_vm0, %v254_v0 }
 0x11c   : > { %v498_v1 = vpop.f32.mrb[0].mxu0  ;;  %v546_v2 = vpop.f32.mrb[0].mxu1 }
 0x11d   : > { %v1006_v3 = vmul.f32 -1.442695, %v498_v1  ;;  %v1022_v4 = vmul.f32 -1.442695, %v546_v2  ;;  %v500_v5 = vpop.f32.mrb[1].mxu0  ;;  %v548_v6 = vpop.f32.mrb[1].mxu1 }
 0x11e   : > { %v1007_v7 = vmul.f32 -1.442695, %v500_v5  ;;  %v1023_v8 = vmul.f32 -1.442695, %v548_v6 }
 0x11f   : > { %1193 = vpow2.f32 %v1006_v3 }
 0x120   : > { %1195 = vpow2.f32 %v1022_v4  ;;  %v504_v9 = vpop.f32.mrb[2].mxu0  ;;  %v552_v10 = vpop.f32.mrb[2].mxu1 }
 0x121   : > { %1197 = vpow2.f32 %v1007_v7  ;;  %v1008_v11 = vmul.f32 -1.442695, %v504_v9  ;;  %v1024_v12 = vmul.f32 -1.442695, %v552_v10  ;;  %v506_v13 = vpop.f32.mrb[3].mxu0  ;;  %v554_v14 = vpop.f32.mrb[3].mxu1 }
 0x122   : > { %1199 = vpow2.f32 %v1023_v8  ;;  %v1009_v15 = vmul.f32 -1.442695, %v506_v13  ;;  %v1025_v16 = vmul.f32 -1.442695, %v554_v14 }
 0x123   : > { %1201 = vpow2.f32 %v1008_v11 }
 0x124   : > { %1203 = vpow2.f32 %v1024_v12  ;;  %v510_v17 = vpop.f32.mrb[4].mxu0  ;;  %v558_v18 = vpop.f32.mrb[4].mxu1 }
 0x125   : > { %1205 = vpow2.f32 %v1009_v15  ;;  %v1010_v19 = vmul.f32 -1.442695, %v510_v17  ;;  %v1026_v20 = vmul.f32 -1.442695, %v558_v18  ;;  %v512_v21 = vpop.f32.mrb[5].mxu0  ;;  %v560_v22 = vpop.f32.mrb[5].mxu1 }
 0x126   : > { %1207 = vpow2.f32 %v1025_v16  ;;  %v1011_v23 = vmul.f32 -1.442695, %v512_v21  ;;  %v1027_v24 = vmul.f32 -1.442695, %v560_v22 }
 0x127   : > { %1209 = vpow2.f32 %v1010_v19 }
 0x128   : > { %1211 = vpow2.f32 %v1026_v20  ;;  %v516_v25 = vpop.f32.mrb[6].mxu0  ;;  %v564_v26 = vpop.f32.mrb[6].mxu1 }
 0x129   : > { %v1194_v27 = vpop.eup %1193  ;;  %1213 = vpow2.f32 %v1011_v23  ;;  %v1012_v28 = vmul.f32 -1.442695, %v516_v25  ;;  %v518_v29 = vpop.f32.mrb[7].mxu0  ;;  %v1028_v1 = vmul.f32 -1.442695, %v564_v26 }
 0x12a   : > { %v566_v30 = vpop.f32.mrb[7].mxu1  ;;  %v1196_v31 = vpop.eup %1195  ;;  %v689_v32 = vadd.f32 1.0, %v1194_v27  ;;  %1215 = vpow2.f32 %v1027_v24  ;;  %v1013_v5 = vmul.f32 -1.442695, %v518_v29 }
 0x12b   : > { %v1198_v33 = vpop.eup %1197  ;;  %v705_v34 = vadd.f32 1.0, %v1196_v31  ;;  %1217 = vpow2.f32 %v1012_v28  ;;  %v1029_v8 = vmul.f32 -1.442695, %v566_v30 }
 0x12c   : > { %v1200_v35 = vpop.eup %1199  ;;  %1219 = vrcp.f32 %v689_v32  ;;  %v690_v36 = vadd.f32 1.0, %v1198_v33  ;;  %v522_v37 = vpop.f32.mrb[8].mxu0 }
 0x12d   : > { %v570_v38 = vpop.f32.mrb[8].mxu1  ;;  %v1202_v39 = vpop.eup %1201  ;;  %1221 = vrcp.f32 %v705_v34  ;;  %v706_v40 = vadd.f32 1.0, %v1200_v35  ;;  %v1014_v10 = vmul.f32 -1.442695, %v522_v37 }
 0x12e   : > { %v524_v41 = vpop.f32.mrb[9].mxu0  ;;  %v1204_v42 = vpop.eup %1203  ;;  %1223 = vrcp.f32 %v690_v36  ;;  %v691_v43 = vadd.f32 1.0, %v1202_v39  ;;  %v1030_v14 = vmul.f32 -1.442695, %v570_v38 }
 0x12f   : > { %v572_v44 = vpop.f32.mrb[9].mxu1  ;;  %v1206_v45 = vpop.eup %1205  ;;  %1225 = vrcp.f32 %v706_v40  ;;  %v707_v46 = vadd.f32 1.0, %v1204_v42  ;;  %v1015_v18 = vmul.f32 -1.442695, %v524_v41 }
 0x130   : > { %v1208_v47 = vpop.eup %1207  ;;  %1227 = vrcp.f32 %v691_v43  ;;  %v692_v48 = vadd.f32 1.0, %v1206_v45  ;;  %v528_v49 = vpop.f32.mrb[10].mxu0  ;;  %v1031_v20 = vmul.f32 -1.442695, %v572_v44 }
 0x131   : > { %v576_v50 = vpop.f32.mrb[10].mxu1  ;;  %v1210_v51 = vpop.eup %1209  ;;  %1229 = vrcp.f32 %v707_v46  ;;  %v708_v52 = vadd.f32 1.0, %v1208_v47  ;;  %v1016_v22 = vmul.f32 -1.442695, %v528_v49 }
 0x132   : > { %v530_v53 = vpop.f32.mrb[11].mxu0  ;;  %v1212_v54 = vpop.eup %1211  ;;  %1231 = vrcp.f32 %v692_v48  ;;  %v693_v55 = vadd.f32 1.0, %v1210_v51  ;;  %v1032_v24 = vmul.f32 -1.442695, %v576_v50 }
 0x133   : > { %v578_v56 = vpop.f32.mrb[11].mxu1  ;;  %v1214_v57 = vpop.eup %1213  ;;  %1233 = vrcp.f32 %v708_v52  ;;  %v709_v58 = vadd.f32 1.0, %v1212_v54  ;;  %v1017_v26 = vmul.f32 -1.442695, %v530_v53 }
 0x134   : > { %v1216_v59 = vpop.eup %1215  ;;  %1235 = vrcp.f32 %v693_v55  ;;  %v694_v60 = vadd.f32 1.0, %v1214_v57  ;;  %v534_v61 = vpop.f32.mrb[12].mxu0  ;;  %v1033_v28 = vmul.f32 -1.442695, %v578_v56 }
 0x135   : > { %v582_v62 = vpop.f32.mrb[12].mxu1  ;;  %v1218_v63 = vpop.eup %1217  ;;  %1237 = vrcp.f32 %v709_v58  ;;  %v710_v0 = vadd.f32 1.0, %v1216_v59  ;;  %v1018_v30 = vmul.f32 -1.442695, %v534_v61 }
 0x136   : > { %v1614_v2 = vpop.f32.mrb[13].mxu0  ;;  %v1220_v3 = vpop.eup %1219  ;;  %1239 = vrcp.f32 %v694_v60  ;;  %v695_v4 = vadd.f32 1.0, %v1218_v63  ;;  %v1034_v32 = vmul.f32 -1.442695, %v582_v62 }
 0x137   : > { %v1616_v6 = vpop.f32.mrb[13].mxu1  ;;  %v1222_v7 = vpop.eup %1221  ;;  %785 = vst [vmem:[%s1612_s13] sm:$0xff] %v1220_v3  ;;  %1241 = vrcp.f32 %v710_v0  ;;  %v1019_v59 = vmul.f32 -1.442695, %v1614_v2 }
 0x138   : > { %v1224_v9 = vpop.eup %1223  ;;  %801 = vst [vmem:[%s1612_s13 + $0x80] sm:$0xff] %v1222_v7  ;;  %1243 = vrcp.f32 %v695_v4  ;;  %v1620_v11 = vpop.f32.mrb[14].mxu0  ;;  %v1035_v62 = vmul.f32 -1.442695, %v1616_v6 }
 0x139   : > { %v1622_v12 = vpop.f32.mrb[14].mxu1  ;;  %v1226_v13 = vpop.eup %1225  ;;  %786 = vst [vmem:[%s1612_s13 + $0x8] sm:$0xff] %v1224_v9  ;;  %1245 = vpow2.f32 %v1028_v1  ;;  %v1020_v0 = vmul.f32 -1.442695, %v1620_v11 }
 0x13a   : > { %v1625_v15 = vpop.f32.mrb[15].mxu0  ;;  %v1627_v16 = vpop.f32.mrb[15].mxu1  ;;  %802 = vst [vmem:[%s1612_s13 + $0x88] sm:$0xff] %v1226_v13  ;;  %1247 = vpow2.f32 %v1013_v5  ;;  %v1036_v3 = vmul.f32 -1.442695, %v1622_v12 }
 0x13b   : > { %v1228_v17 = vpop.eup %1227  ;;  %1249 = vpow2.f32 %v1029_v8  ;;  %v1021_v4 = vmul.f32 -1.442695, %v1625_v15  ;;  %v1037_v6 = vmul.f32 -1.442695, %v1627_v16 }
 0x13c   : > { %v1230_v19 = vpop.eup %1229  ;;  %787 = vst [vmem:[%s1612_s13 + $0x10] sm:$0xff] %v1228_v17  ;;  %1251 = vpow2.f32 %v1014_v10 }
 0x13d   : > { %v1232_v21 = vpop.eup %1231  ;;  %803 = vst [vmem:[%s1612_s13 + $0x90] sm:$0xff] %v1230_v19  ;;  %1253 = vpow2.f32 %v1030_v14 }
 0x13e   : > { %v1234_v23 = vpop.eup %1233  ;;  %788 = vst [vmem:[%s1612_s13 + $0x18] sm:$0xff] %v1232_v21  ;;  %1255 = vpow2.f32 %v1015_v18 }
 0x13f   : > { %v1236_v25 = vpop.eup %1235  ;;  %804 = vst [vmem:[%s1612_s13 + $0x98] sm:$0xff] %v1234_v23  ;;  %1257 = vpow2.f32 %v1031_v20 }
 0x140   : > { %v1238_v27 = vpop.eup %1237  ;;  %789 = vst [vmem:[%s1612_s13 + $0x20] sm:$0xff] %v1236_v25  ;;  %1259 = vpow2.f32 %v1016_v22 }
 0x141   : > { %v1240_v29 = vpop.eup %1239  ;;  %805 = vst [vmem:[%s1612_s13 + $0xa0] sm:$0xff] %v1238_v27  ;;  %1261 = vpow2.f32 %v1032_v24 }
 0x142   : > { %v1242_v31 = vpop.eup %1241  ;;  %790 = vst [vmem:[%s1612_s13 + $0x28] sm:$0xff] %v1240_v29  ;;  %1263 = vpow2.f32 %v1017_v26 }
 0x143   : > { %v1244_v33 = vpop.eup %1243  ;;  %806 = vst [vmem:[%s1612_s13 + $0xa8] sm:$0xff] %v1242_v31  ;;  %1265 = vpow2.f32 %v1033_v28 }
 0x144   : > { %v1246_v34 = vpop.eup %1245  ;;  %791 = vst [vmem:[%s1612_s13 + $0x30] sm:$0xff] %v1244_v33  ;;  %1267 = vpow2.f32 %v1018_v30 }
 0x145   : > { %v1248_v35 = vpop.eup %1247  ;;  %v711_v36 = vadd.f32 1.0, %v1246_v34  ;;  %1269 = vpow2.f32 %v1034_v32 }
 0x146   : > { %v1250_v37 = vpop.eup %1249  ;;  %v696_v38 = vadd.f32 1.0, %v1248_v35 }
 0x147   : > { %v1252_v39 = vpop.eup %1251  ;;  %1271 = vrcp.f32 %v711_v36  ;;  %v712_v40 = vadd.f32 1.0, %v1250_v37 }
 0x148   : > { %v1254_v41 = vpop.eup %1253  ;;  %1273 = vrcp.f32 %v696_v38  ;;  %v697_v42 = vadd.f32 1.0, %v1252_v39 }
 0x149   : > { %v1256_v43 = vpop.eup %1255  ;;  %1275 = vrcp.f32 %v712_v40  ;;  %v713_v44 = vadd.f32 1.0, %v1254_v41 }
 0x14a   : > { %v1258_v45 = vpop.eup %1257  ;;  %1277 = vrcp.f32 %v697_v42  ;;  %v698_v46 = vadd.f32 1.0, %v1256_v43 }
 0x14b   : > { %v1260_v47 = vpop.eup %1259  ;;  %1279 = vrcp.f32 %v713_v44  ;;  %v714_v48 = vadd.f32 1.0, %v1258_v45 }
 0x14c   : > { %v1262_v49 = vpop.eup %1261  ;;  %1281 = vrcp.f32 %v698_v46  ;;  %v699_v50 = vadd.f32 1.0, %v1260_v47 }
 0x14d   : > { %v1264_v51 = vpop.eup %1263  ;;  %1283 = vrcp.f32 %v714_v48  ;;  %v715_v52 = vadd.f32 1.0, %v1262_v49 }
 0x14e   : > { %v1266_v53 = vpop.eup %1265  ;;  %1285 = vrcp.f32 %v699_v50  ;;  %v700_v54 = vadd.f32 1.0, %v1264_v51 }
 0x14f   : > { %v1268_v55 = vpop.eup %1267  ;;  %1287 = vrcp.f32 %v715_v52  ;;  %v716_v56 = vadd.f32 1.0, %v1266_v53 }
 0x150   : > { %v1270_v57 = vpop.eup %1269  ;;  %1289 = vrcp.f32 %v700_v54  ;;  %v701_v58 = vadd.f32 1.0, %v1268_v55 }
 0x151   : > { %v1272_v60 = vpop.eup %1271  ;;  %1291 = vrcp.f32 %v716_v56  ;;  %v717_v61 = vadd.f32 1.0, %v1270_v57 }
 0x152   : > { %v1274_v63 = vpop.eup %1273  ;;  %807 = vst [vmem:[%s1612_s13 + $0xb0] sm:$0xff] %v1272_v60  ;;  %1293 = vrcp.f32 %v701_v58 }
 0x153   : > { %v1276_v1 = vpop.eup %1275  ;;  %792 = vst [vmem:[%s1612_s13 + $0x38] sm:$0xff] %v1274_v63  ;;  %1295 = vrcp.f32 %v717_v61 }
 0x154   : > { %v1278_v2 = vpop.eup %1277  ;;  %808 = vst [vmem:[%s1612_s13 + $0xb8] sm:$0xff] %v1276_v1  ;;  %1297 = vpow2.f32 %v1019_v59 }
 0x155   : > { %v1280_v5 = vpop.eup %1279  ;;  %793 = vst [vmem:[%s1612_s13 + $0x40] sm:$0xff] %v1278_v2  ;;  %1299 = vpow2.f32 %v1035_v62 }
 0x156   : > { %v1282_v7 = vpop.eup %1281  ;;  %809 = vst [vmem:[%s1612_s13 + $0xc0] sm:$0xff] %v1280_v5  ;;  %1301 = vpow2.f32 %v1020_v0 }
 0x157   : > { %v1284_v8 = vpop.eup %1283  ;;  %794 = vst [vmem:[%s1612_s13 + $0x48] sm:$0xff] %v1282_v7  ;;  %1303 = vpow2.f32 %v1036_v3 }
 0x158   : > { %v1286_v9 = vpop.eup %1285  ;;  %810 = vst [vmem:[%s1612_s13 + $0xc8] sm:$0xff] %v1284_v8  ;;  %1305 = vpow2.f32 %v1021_v4 }
 0x159   : > { %v1288_v10 = vpop.eup %1287  ;;  %795 = vst [vmem:[%s1612_s13 + $0x50] sm:$0xff] %v1286_v9  ;;  %1307 = vpow2.f32 %v1037_v6 }
 0x15a   : > { %v1290_v11 = vpop.eup %1289  ;;  %811 = vst [vmem:[%s1612_s13 + $0xd0] sm:$0xff] %v1288_v10 }
 0x15b   : > { %v1292_v12 = vpop.eup %1291  ;;  %796 = vst [vmem:[%s1612_s13 + $0x58] sm:$0xff] %v1290_v11 }
 0x15c   : > { %v1294_v13 = vpop.eup %1293  ;;  %812 = vst [vmem:[%s1612_s13 + $0xd8] sm:$0xff] %v1292_v12 }
 0x15d   : > { %v1296_v14 = vpop.eup %1295  ;;  %797 = vst [vmem:[%s1612_s13 + $0x60] sm:$0xff] %v1294_v13 }
 0x15e   : > { %v1298_v15 = vpop.eup %1297  ;;  %813 = vst [vmem:[%s1612_s13 + $0xe0] sm:$0xff] %v1296_v14 }
 0x15f   : > { %v1300_v16 = vpop.eup %1299  ;;  %v702_v17 = vadd.f32 1.0, %v1298_v15 }
 0x160   : > { %v1302_v18 = vpop.eup %1301  ;;  %v718_v19 = vadd.f32 1.0, %v1300_v16 }
 0x161   : > { %v1304_v20 = vpop.eup %1303  ;;  %1309 = vrcp.f32 %v702_v17  ;;  %v703_v21 = vadd.f32 1.0, %v1302_v18 }
 0x162   : > { %v1306_v22 = vpop.eup %1305  ;;  %1311 = vrcp.f32 %v718_v19  ;;  %v719_v23 = vadd.f32 1.0, %v1304_v20 }
 0x163   : > { %v1308_v24 = vpop.eup %1307  ;;  %1313 = vrcp.f32 %v703_v21  ;;  %v704_v25 = vadd.f32 1.0, %v1306_v22 }
 0x164   : > { %1315 = vrcp.f32 %v719_v23  ;;  %v720_v26 = vadd.f32 1.0, %v1308_v24 }
 0x165   : > { %1317 = vrcp.f32 %v704_v25 }
 0x166   : > { %1319 = vrcp.f32 %v720_v26 }
 0x16b   : > { %v1310_v27 = vpop.eup %1309 }
 0x16c   : > { %v1312_v28 = vpop.eup %1311  ;;  %798 = vst [vmem:[%s1612_s13 + $0x68] sm:$0xff] %v1310_v27 }
 0x16d   : > { %v1314_v29 = vpop.eup %1313  ;;  %814 = vst [vmem:[%s1612_s13 + $0xe8] sm:$0xff] %v1312_v28 }
 0x16e   : > { %v1316_v30 = vpop.eup %1315  ;;  %799 = vst [vmem:[%s1612_s13 + $0x70] sm:$0xff] %v1314_v29 }
 0x16f   : > { %v1318_v31 = vpop.eup %1317  ;;  %815 = vst [vmem:[%s1612_s13 + $0xf0] sm:$0xff] %v1316_v30 }
 0x170   : > { %v1320_v32 = vpop.eup %1319  ;;  %800 = vst [vmem:[%s1612_s13 + $0x78] sm:$0xff] %v1318_v31 }
 0x171   : > { %816 = vst [vmem:[%s1612_s13 + $0xf8] sm:$0xff] %v1320_v32 }
 0x172 PF: > { %s12_s11 = sadd.s32 1, %s1343_s11   ;;  %s1678_s9 = smov %s1339_s10 }
 0x173   : > { %p9_p5 = scmp.ge.s32.totalorder %s12_s11, 4   ;;  %s1679_s10 = smov %s1681_s12 }
 0x175   :  { %11 = sbr.rel (!%p9_p5) target bundleno = 2 (0x2), region = 61 }

</bundles_post_ra>
